<compile_context>
chip_gen: v7x
topology: tpu7x:2x2x1
jax: 0.10.0
libtpu: 0.0.40
codegen_flags: <defaults>
</compile_context>

<pallas_src>
import numpy as np
import jax
import jax.numpy as jnp
from jax.experimental import pallas as pl
from jax.experimental.pallas import tpu as pltpu


LANE = 128
_TARGET_BM = 512                      # low-res rows per tile (= 2048 high-res rows)
_VMEM_LIMIT = 32 * 1024 * 1024
_EPS = 1e-5


def _round_up(x, m):
    return (x + m - 1) // m * m


def _choose_bm(m, target=_TARGET_BM):
    """Tile size in low-res rows: divides m (no row padding), multiple of 8,
    capped so the parallel grid has >= 2 tiles (v7x has two TensorCores that
    only share work through the parallel grid axis)."""
    if m <= 8 or m % 8 != 0:
        return m                       # single full block (legal block shape)
    cap = min(target, max(8, (m // 2) // 8 * 8))
    bm = cap - cap % 8
    while bm > 8 and m % bm != 0:
        bm -= 8
    return bm


def _compiler_params():
    return pltpu.CompilerParams(dimension_semantics=("parallel",),
                                vmem_limit_bytes=_VMEM_LIMIT)


# --------------------------------------------------------------------------- #
# Pallas kernels
# --------------------------------------------------------------------------- #
def _stats_kernel(xh_ref, xl_ref, wh2h_ref, wl2h_ref, wcat_ref,
                  sumh_ref, sqh_ref, suml_ref, sql_ref):
    # Pass 0: conv matmuls for BatchNorm batch statistics only (f32 partial
    # sums / sums of squares per tile).  The big conv outputs are NOT stored.
    xl = xl_ref[...]
    # l->h conv at LOW resolution; nearest-up(z) is "add z to every phase".
    z = jnp.dot(xl, wl2h_ref[...], preferred_element_type=jnp.float32)

    xh0, xh1, xh2, xh3 = xh_ref[0], xh_ref[1], xh_ref[2], xh_ref[3]

    # AvgPool2d(2,2) of x_h == mean over the 4 phases (f32 math, bf16 operand).
    xd = ((xh0.astype(jnp.float32) + xh1.astype(jnp.float32) +
           xh2.astype(jnp.float32) + xh3.astype(jnp.float32)) * 0.25
          ).astype(jnp.bfloat16)

    # Fused low path: [x_l | avgpool(x_h)] @ [[W_l2l],[W_h2l]]  (K = 256).
    sl = jnp.dot(jnp.concatenate([xl, xd], axis=1), wcat_ref[...],
                 preferred_element_type=jnp.float32)
    suml_ref[...] = jnp.broadcast_to(jnp.sum(sl, axis=0, keepdims=True),
                                     suml_ref.shape)
    sql_ref[...] = jnp.broadcast_to(jnp.sum(sl * sl, axis=0, keepdims=True),
                                    sql_ref.shape)

    # High path: per-phase matmul + z, accumulate stats across the 4 phases.
    wh2h = wh2h_ref[...]
    sum_h = jnp.zeros((1, z.shape[1]), jnp.float32)
    sq_h = jnp.zeros((1, z.shape[1]), jnp.float32)
    for xp in (xh0, xh1, xh2, xh3):
        sh = jnp.dot(xp, wh2h, preferred_element_type=jnp.float32) + z
        sum_h = sum_h + jnp.sum(sh, axis=0, keepdims=True)
        sq_h = sq_h + jnp.sum(sh * sh, axis=0, keepdims=True)
    sumh_ref[...] = jnp.broadcast_to(sum_h, sumh_ref.shape)
    sqh_ref[...] = jnp.broadcast_to(sq_h, sqh_ref.shape)


def _apply_kernel(xh_ref, xl_ref, wh2h_ref, wl2h_ref, wcat_ref,
                  sc_h_ref, sf_h_ref, sc_l_ref, sf_l_ref,
                  yh_ref, yl_ref):
    # Pass 1: recompute the matmuls and fuse BN (scale/shift) + ReLU; store
    # bf16 in the padded phase-separated layout so the next layer's matmuls
    # consume the result directly (no XLA re-pad / re-cast pass).
    xl = xl_ref[...]
    z = jnp.dot(xl, wl2h_ref[...], preferred_element_type=jnp.float32)

    xh0, xh1, xh2, xh3 = xh_ref[0], xh_ref[1], xh_ref[2], xh_ref[3]
    xd = ((xh0.astype(jnp.float32) + xh1.astype(jnp.float32) +
           xh2.astype(jnp.float32) + xh3.astype(jnp.float32)) * 0.25
          ).astype(jnp.bfloat16)

    sl = jnp.dot(jnp.concatenate([xl, xd], axis=1), wcat_ref[...],
                 preferred_element_type=jnp.float32)
    yl = jnp.maximum(sl * sc_l_ref[...] + sf_l_ref[...], 0.0)
    yl_ref[...] = yl.astype(yl_ref.dtype)

    wh2h = wh2h_ref[...]
    sc_h = sc_h_ref[...]
    sf_h = sf_h_ref[...]
    for p, xp in enumerate((xh0, xh1, xh2, xh3)):
        sh = jnp.dot(xp, wh2h, preferred_element_type=jnp.float32) + z
        yh_ref[p] = jnp.maximum(sh * sc_h + sf_h, 0.0).astype(yh_ref.dtype)


# --------------------------------------------------------------------------- #
# pallas_call wrappers (tiled over low-res rows, weights resident, parallel)
# --------------------------------------------------------------------------- #
def _stats_pass(xh_p, xl, wh2h, wl2h, wcat, bm):
    _, ml, khp = xh_p.shape
    klp = xl.shape[1]
    chp = wh2h.shape[1]
    clp = wcat.shape[1]
    nt = ml // bm
    sh_, sq_h, sl_, sq_l = pl.pallas_call(
        _stats_kernel,
        grid=(nt,),
        in_specs=[
            pl.BlockSpec((4, bm, khp), lambda i: (0, i, 0)),
            pl.BlockSpec((bm, klp), lambda i: (i, 0)),
            pl.BlockSpec((khp, chp), lambda i: (0, 0)),
            pl.BlockSpec((klp, chp), lambda i: (0, 0)),
            pl.BlockSpec((klp + khp, clp), lambda i: (0, 0)),
        ],
        out_specs=(
            pl.BlockSpec((8, chp), lambda i: (i, 0)),
            pl.BlockSpec((8, chp), lambda i: (i, 0)),
            pl.BlockSpec((8, clp), lambda i: (i, 0)),
            pl.BlockSpec((8, clp), lambda i: (i, 0)),
        ),
        out_shape=(
            jax.ShapeDtypeStruct((nt * 8, chp), jnp.float32),
            jax.ShapeDtypeStruct((nt * 8, chp), jnp.float32),
            jax.ShapeDtypeStruct((nt * 8, clp), jnp.float32),
            jax.ShapeDtypeStruct((nt * 8, clp), jnp.float32),
        ),
        compiler_params=_compiler_params(),
    )(xh_p, xl, wh2h, wl2h, wcat)

    def red(x, c):
        return x.reshape(nt, 8, c)[:, 0, :].sum(axis=0)

    return red(sh_, chp), red(sq_h, chp), red(sl_, clp), red(sq_l, clp)


def _apply_pass(xh_p, xl, wh2h, wl2h, wcat, sc_h, sf_h, sc_l, sf_l, bm):
    _, ml, khp = xh_p.shape
    klp = xl.shape[1]
    chp = wh2h.shape[1]
    clp = wcat.shape[1]
    nt = ml // bm
    return pl.pallas_call(
        _apply_kernel,
        grid=(nt,),
        in_specs=[
            pl.BlockSpec((4, bm, khp), lambda i: (0, i, 0)),
            pl.BlockSpec((bm, klp), lambda i: (i, 0)),
            pl.BlockSpec((khp, chp), lambda i: (0, 0)),
            pl.BlockSpec((klp, chp), lambda i: (0, 0)),
            pl.BlockSpec((klp + khp, clp), lambda i: (0, 0)),
            pl.BlockSpec((1, chp), lambda i: (0, 0)),
            pl.BlockSpec((1, chp), lambda i: (0, 0)),
            pl.BlockSpec((1, clp), lambda i: (0, 0)),
            pl.BlockSpec((1, clp), lambda i: (0, 0)),
        ],
        out_specs=(
            pl.BlockSpec((4, bm, chp), lambda i: (0, i, 0)),
            pl.BlockSpec((bm, clp), lambda i: (i, 0)),
        ),
        out_shape=(
            jax.ShapeDtypeStruct((4, ml, chp), jnp.bfloat16),
            jax.ShapeDtypeStruct((ml, clp), jnp.bfloat16),
        ),
        compiler_params=_compiler_params(),
    )(xh_p, xl, wh2h, wl2h, wcat, sc_h, sf_h, sc_l, sf_l)


# --------------------------------------------------------------------------- #
# One OCTConv_BN_ACT layer (alpha_in = alpha_out = 0.5, k = 1)
# --------------------------------------------------------------------------- #
def _pad_mat(w, rows, cols):
    return jnp.pad(w, ((0, rows - w.shape[0]), (0, cols - w.shape[1])))


def _bn_coeffs(psum, psq, count, gamma, beta, cpad, eps=_EPS):
    gamma = jnp.pad(gamma, (0, cpad - gamma.shape[0]))
    beta = jnp.pad(beta, (0, cpad - beta.shape[0]))
    mean = psum / count
    # TODO(synk): uncentered E[x^2]-E[x]^2 can cancel for huge activations;
    # fine at these scales (clamped), consider a shifted accumulation at scale.
    var = jnp.maximum(psq / count - mean * mean, 0.0)    # biased batch variance
    inv = gamma * jax.lax.rsqrt(var + eps)
    scale = inv[None, :].astype(jnp.float32)
    shift = (beta - mean * inv)[None, :].astype(jnp.float32)
    return scale, shift


def _oct_layer(p, xh_p, xl):
    # xh_p: (4, Ml, Khp) bf16 phase-separated high stream; xl: (Ml, Klp) bf16.
    _, ml, khp = xh_p.shape
    klp = xl.shape[1]
    ch_out = p['w_h2h'].shape[1]
    cl_out = p['w_l2l'].shape[1]
    chp = _round_up(ch_out, LANE)
    clp = _round_up(cl_out, LANE)

    wh2h = _pad_mat(p['w_h2h'], khp, chp).astype(jnp.bfloat16)
    wl2h = _pad_mat(p['w_l2h'], klp, chp).astype(jnp.bfloat16)
    # Fused low-path weight: [x_l | avgpool(x_h)] @ [[W_l2l], [W_h2l]].
    wcat = jnp.concatenate([_pad_mat(p['w_l2l'], klp, clp),
                            _pad_mat(p['w_h2l'], khp, clp)], axis=0
                           ).astype(jnp.bfloat16)

    bm = _choose_bm(ml)

    sum_h, sq_h, sum_l, sq_l = _stats_pass(xh_p, xl, wh2h, wl2h, wcat, bm)
    sc_h, sf_h = _bn_coeffs(sum_h, sq_h, 4.0 * ml, p['gamma_h'], p['beta_h'], chp)
    sc_l, sf_l = _bn_coeffs(sum_l, sq_l, float(ml), p['gamma_l'], p['beta_l'], clp)

    return _apply_pass(xh_p, xl, wh2h, wl2h, wcat, sc_h, sf_h, sc_l, sf_l, bm)


# --------------------------------------------------------------------------- #
# Layout conversion (done once per forward, outside the kernels)
# --------------------------------------------------------------------------- #
def _to_phase(h):
    # (N, C, H, W) -> (4, N*(H/2)*(W/2), C); phase index = 2*sy + sx.
    n, c, H, W = h.shape
    hl, wl = H // 2, W // 2
    t = h.reshape(n, c, hl, 2, wl, 2)
    t = jnp.transpose(t, (3, 5, 0, 2, 4, 1))          # (sy, sx, n, yl, xl, c)
    return t.reshape(4, n * hl * wl, c)


def _from_phase(yp, n, hl, wl, c_real):
    # (4, Ml, Cpad) -> (N, c_real, H, W) f32
    t = yp[:, :, :c_real].astype(jnp.float32).reshape(2, 2, n, hl, wl, c_real)
    t = jnp.transpose(t, (2, 5, 3, 0, 4, 1))          # (n, c, yl, sy, xl, sx)
    return t.reshape(n, c_real, 2 * hl, 2 * wl)


def _pad_lanes(x, cols):
    pad = [(0, 0)] * (x.ndim - 1) + [(0, cols - x.shape[-1])]
    return jnp.pad(x, pad)


# --------------------------------------------------------------------------- #
# double_oct: params + forward (public API is NCHW, PyTorch convention)
# --------------------------------------------------------------------------- #
def _init_oct(key, cin, cout):
    cl_in = int(0.5 * cin)
    ch_in = cin - cl_in
    cl_out = int(0.5 * cout)
    ch_out = cout - cl_out
    ks = jax.random.split(key, 4)

    def mk(k, i, o):
        b = 1.0 / np.sqrt(i)
        return jax.random.uniform(k, (i, o), jnp.float32, -b, b)

    return {
        'w_h2h': mk(ks[0], ch_in, ch_out),
        'w_l2h': mk(ks[1], cl_in, ch_out),
        'w_h2l': mk(ks[2], ch_in, cl_out),
        'w_l2l': mk(ks[3], cl_in, cl_out),
        'gamma_h': jnp.ones((ch_out,), jnp.float32),
        'beta_h': jnp.zeros((ch_out,), jnp.float32),
        'gamma_l': jnp.ones((cl_out,), jnp.float32),
        'beta_l': jnp.zeros((cl_out,), jnp.float32),
    }


def init_params(key, in_channels, out_channels):
    mid = in_channels // 4
    k1, k2 = jax.random.split(key)
    return {'conv1': _init_oct(k1, in_channels, mid),
            'conv2': _init_oct(k2, mid, out_channels)}


def double_oct_forward(params, h, l):
    # h: (N, Ch_in, H, W), l: (N, Cl_in, H/2, W/2)  NCHW float32.
    n, ch_in, H, W = h.shape
    _, cl_in, hl, wl = l.shape
    ml = n * hl * wl

    xh_p = _pad_lanes(_to_phase(h), _round_up(ch_in, LANE)).astype(jnp.bfloat16)
    xl = _pad_lanes(jnp.transpose(l, (0, 2, 3, 1)).reshape(ml, cl_in),
                    _round_up(cl_in, LANE)).astype(jnp.bfloat16)

    xh_p, xl = _oct_layer(params['conv1'], xh_p, xl)
    xh_p, xl = _oct_layer(params['conv2'], xh_p, xl)

    ch_out = params['conv2']['w_h2h'].shape[1]
    cl_out = params['conv2']['w_l2l'].shape[1]
    hh = _from_phase(xh_p, n, hl, wl, ch_out)
    ll = jnp.transpose(
        xl[:, :cl_out].astype(jnp.float32).reshape(n, hl, wl, cl_out),
        (0, 3, 1, 2))
    return hh, ll


# --------------------------------------------------------------------------- #
# Pure-JAX f32 reference for a correctness sanity check
# --------------------------------------------------------------------------- #
def _reference_layer(p, h, l, eps=_EPS):
    def conv(x, wm):                      # 1x1 conv, NCHW, weight (cin, cout)
        return jnp.einsum('nchw,cd->ndhw', x, wm)

    def bn_relu(x, gamma, beta):
        mean = jnp.mean(x, axis=(0, 2, 3), keepdims=True)
        var = jnp.mean(jnp.square(x - mean), axis=(0, 2, 3), keepdims=True)
        y = (x - mean) / jnp.sqrt(var + eps)
        y = y * gamma.reshape(1, -1, 1, 1) + beta.reshape(1, -1, 1, 1)
        return jnp.maximum(y, 0.0)

    n, c, hh, ww = h.shape
    h_ds = h.reshape(n, c, hh // 2, 2, ww // 2, 2).mean(axis=(3, 5))
    x_h2h = conv(h, p['w_h2h'])
    x_h2l = conv(h_ds, p['w_h2l'])
    x_l2h = jnp.repeat(jnp.repeat(conv(l, p['w_l2h']), 2, axis=2), 2, axis=3)
    x_l2l = conv(l, p['w_l2l'])
    y_h = bn_relu(x_h2h + x_l2h, p['gamma_h'], p['beta_h'])
    y_l = bn_relu(x_h2l + x_l2l, p['gamma_l'], p['beta_l'])
    return y_h, y_l


def _reference_forward(params, h, l):
    h, l = _reference_layer(params['conv1'], h, l)
    h, l = _reference_layer(params['conv2'], h, l)
    return h, l


if __name__ == "__main__":
    key = jax.random.PRNGKey(0)
    in_channels, out_channels = 32, 32
    N, H, W = 2, 32, 32
    cl_in = in_channels // 2
    ch_in = in_channels - cl_in

    k = jax.random.split(key, 3)
    h = jax.random.normal(k[0], (N, ch_in, H, W), jnp.float32)
    l = jax.random.normal(k[1], (N, cl_in, H // 2, W // 2), jnp.float32)
    params = init_params(k[2], in_channels, out_channels)

    fwd = jax.jit(double_oct_forward)
    hh, ll = fwd(params, h, l)
    hh = jax.block_until_ready(hh)
    ll = jax.block_until_ready(ll)

    cl_out = out_channels // 2
    ch_out = out_channels - cl_out
    assert hh.shape == (N, ch_out, H, W), hh.shape
    assert ll.shape == (N, cl_out, H // 2, W // 2), ll.shape

    rh, rl = _reference_forward(params, h, l)
    err_h = float(jnp.max(jnp.abs(hh - rh)))
    err_l = float(jnp.max(jnp.abs(ll - rl)))
    # bf16 storage of inter-layer / final activations is an intentional
    # precision tradeoff (f32 accumulation + f32 BN math everywhere).
    ok_h = bool(jnp.allclose(hh, rh, atol=7.5e-2, rtol=5e-2))
    ok_l = bool(jnp.allclose(ll, rl, atol=7.5e-2, rtol=5e-2))
    assert ok_h and ok_l, (err_h, err_l)

    print("KERNEL_OK")
</pallas_src>

<mosaic_0001>
module attributes {stable_mosaic.version = 11 : i64} {
  func.func @_stats_kernel(%arg0: i32, %arg1: memref<4x256x128xbf16, #tpu.memory_space<vmem>>, %arg2: memref<256x128xbf16, #tpu.memory_space<vmem>>, %arg3: memref<128x128xbf16, #tpu.memory_space<vmem>>, %arg4: memref<128x128xbf16, #tpu.memory_space<vmem>>, %arg5: memref<256x128xbf16, #tpu.memory_space<vmem>>, %arg6: memref<8x128xf32, #tpu.memory_space<vmem>>, %arg7: memref<8x128xf32, #tpu.memory_space<vmem>>, %arg8: memref<8x128xf32, #tpu.memory_space<vmem>>, %arg9: memref<8x128xf32, #tpu.memory_space<vmem>>) attributes {dimension_semantics = [#tpu.dimension_semantics<parallel>], iteration_bounds = array<i64: 2>, scalar_prefetch = 0 : i64, scratch_operands = 0 : i64, tpu.core_type = #tpu.core_type<tc>, window_params = [{transform_indices = @transform_0, window_bounds = array<i64: 4, 256, 128>}, {transform_indices = @transform_1, window_bounds = array<i64: 256, 128>}, {pipeline_mode = #tpu.pipeline_mode<synchronous>, transform_indices = @transform_2, window_bounds = array<i64: 128, 128>}, {pipeline_mode = #tpu.pipeline_mode<synchronous>, transform_indices = @transform_3, window_bounds = array<i64: 128, 128>}, {pipeline_mode = #tpu.pipeline_mode<synchronous>, transform_indices = @transform_4, window_bounds = array<i64: 256, 128>}, {transform_indices = @transform_5, window_bounds = array<i64: 8, 128>}, {transform_indices = @transform_6, window_bounds = array<i64: 8, 128>}, {transform_indices = @transform_7, window_bounds = array<i64: 8, 128>}, {transform_indices = @transform_8, window_bounds = array<i64: 8, 128>}]} {
    %c0 = arith.constant 0 : index
    %c0_0 = arith.constant 0 : index
    %0 = vector.load %arg2[%c0, %c0_0] : memref<256x128xbf16, #tpu.memory_space<vmem>>, vector<256x128xbf16>
    %c0_1 = arith.constant 0 : index
    %c0_2 = arith.constant 0 : index
    %1 = vector.load %arg4[%c0_1, %c0_2] : memref<128x128xbf16, #tpu.memory_space<vmem>>, vector<128x128xbf16>
    %cst = arith.constant dense<0.000000e+00> : vector<256x128xf32>
    %2 = tpu.matmul %0, %1, %cst {dimension_numbers = #tpu.dot_dimension_numbers<[1], [0], [0], [1], [0, 0, 1, 1], [], []>} : vector<256x128xbf16>, vector<128x128xbf16>, vector<256x128xf32> -> vector<256x128xf32>
    %c0_3 = arith.constant 0 : index
    %c0_4 = arith.constant 0 : index
    %c0_5 = arith.constant 0 : index
    %3 = vector.load %arg1[%c0_3, %c0_4, %c0_5] : memref<4x256x128xbf16, #tpu.memory_space<vmem>>, vector<1x256x128xbf16>
    %4 = vector.shape_cast %3 : vector<1x256x128xbf16> to vector<256x128xbf16>
    %c1 = arith.constant 1 : index
    %c0_6 = arith.constant 0 : index
    %c0_7 = arith.constant 0 : index
    %5 = vector.load %arg1[%c1, %c0_6, %c0_7] : memref<4x256x128xbf16, #tpu.memory_space<vmem>>, vector<1x256x128xbf16>
    %6 = vector.shape_cast %5 : vector<1x256x128xbf16> to vector<256x128xbf16>
    %c2 = arith.constant 2 : index
    %c0_8 = arith.constant 0 : index
    %c0_9 = arith.constant 0 : index
    %7 = vector.load %arg1[%c2, %c0_8, %c0_9] : memref<4x256x128xbf16, #tpu.memory_space<vmem>>, vector<1x256x128xbf16>
    %8 = vector.shape_cast %7 : vector<1x256x128xbf16> to vector<256x128xbf16>
    %c3 = arith.constant 3 : index
    %c0_10 = arith.constant 0 : index
    %c0_11 = arith.constant 0 : index
    %9 = vector.load %arg1[%c3, %c0_10, %c0_11] : memref<4x256x128xbf16, #tpu.memory_space<vmem>>, vector<1x256x128xbf16>
    %10 = vector.shape_cast %9 : vector<1x256x128xbf16> to vector<256x128xbf16>
    %11 = arith.extf %4 : vector<256x128xbf16> to vector<256x128xf32>
    %12 = arith.extf %6 : vector<256x128xbf16> to vector<256x128xf32>
    %13 = arith.addf %11, %12 : vector<256x128xf32>
    %14 = arith.extf %8 : vector<256x128xbf16> to vector<256x128xf32>
    %15 = arith.addf %13, %14 : vector<256x128xf32>
    %16 = arith.extf %10 : vector<256x128xbf16> to vector<256x128xf32>
    %17 = arith.addf %15, %16 : vector<256x128xf32>
    %cst_12 = arith.constant 2.500000e-01 : f32
    %18 = vector.broadcast %cst_12 : f32 to vector<256x128xf32>
    %19 = arith.mulf %17, %18 : vector<256x128xf32>
    %20 = arith.truncf %19 : vector<256x128xf32> to vector<256x128xbf16>
    %21 = tpu.concatenate %0, %20 in 1 : vector<256x128xbf16>, vector<256x128xbf16> -> vector<256x256xbf16>
    %c0_13 = arith.constant 0 : index
    %c0_14 = arith.constant 0 : index
    %22 = vector.load %arg5[%c0_13, %c0_14] : memref<256x128xbf16, #tpu.memory_space<vmem>>, vector<256x128xbf16>
    %cst_15 = arith.constant dense<0.000000e+00> : vector<256x128xf32>
    %23 = tpu.matmul %21, %22, %cst_15 {dimension_numbers = #tpu.dot_dimension_numbers<[1], [0], [0], [1], [0, 0, 1, 1], [], []>} : vector<256x256xbf16>, vector<256x128xbf16>, vector<256x128xf32> -> vector<256x128xf32>
    %cst_16 = arith.constant dense<0.000000e+00> : vector<128xf32>
    %24 = vector.multi_reduction <add>, %23, %cst_16 [0] : vector<256x128xf32> to vector<128xf32>
    %25 = vector.shape_cast %24 : vector<128xf32> to vector<1x128xf32>
    %26 = vector.shape_cast %25 : vector<1x128xf32> to vector<1x128xf32>
    %27 = vector.broadcast %26 : vector<1x128xf32> to vector<8x128xf32>
    %c0_17 = arith.constant 0 : index
    %c0_18 = arith.constant 0 : index
    %28 = vector.load %arg8[%c0_17, %c0_18] : memref<8x128xf32, #tpu.memory_space<vmem>>, vector<8x128xf32>
    tpu.vector_store %arg8[%c0_17, %c0_18], %27 {strides = array<i32>} : memref<8x128xf32, #tpu.memory_space<vmem>>, vector<8x128xf32>,
    %29 = arith.mulf %23, %23 : vector<256x128xf32>
    %cst_19 = arith.constant dense<0.000000e+00> : vector<128xf32>
    %30 = vector.multi_reduction <add>, %29, %cst_19 [0] : vector<256x128xf32> to vector<128xf32>
    %31 = vector.shape_cast %30 : vector<128xf32> to vector<1x128xf32>
    %32 = vector.shape_cast %31 : vector<1x128xf32> to vector<1x128xf32>
    %33 = vector.broadcast %32 : vector<1x128xf32> to vector<8x128xf32>
    %c0_20 = arith.constant 0 : index
    %c0_21 = arith.constant 0 : index
    %34 = vector.load %arg9[%c0_20, %c0_21] : memref<8x128xf32, #tpu.memory_space<vmem>>, vector<8x128xf32>
    tpu.vector_store %arg9[%c0_20, %c0_21], %33 {strides = array<i32>} : memref<8x128xf32, #tpu.memory_space<vmem>>, vector<8x128xf32>,
    %c0_22 = arith.constant 0 : index
    %c0_23 = arith.constant 0 : index
    %35 = vector.load %arg3[%c0_22, %c0_23] : memref<128x128xbf16, #tpu.memory_space<vmem>>, vector<128x128xbf16>
    %cst_24 = arith.constant 0.000000e+00 : f32
    %36 = vector.broadcast %cst_24 : f32 to vector<1x128xf32>
    %cst_25 = arith.constant 0.000000e+00 : f32
    %37 = vector.broadcast %cst_25 : f32 to vector<1x128xf32>
    %cst_26 = arith.constant dense<0.000000e+00> : vector<256x128xf32>
    %38 = tpu.matmul %4, %35, %cst_26 {dimension_numbers = #tpu.dot_dimension_numbers<[1], [0], [0], [1], [0, 0, 1, 1], [], []>} : vector<256x128xbf16>, vector<128x128xbf16>, vector<256x128xf32> -> vector<256x128xf32>
    %39 = arith.addf %38, %2 : vector<256x128xf32>
    %cst_27 = arith.constant dense<0.000000e+00> : vector<128xf32>
    %40 = vector.multi_reduction <add>, %39, %cst_27 [0] : vector<256x128xf32> to vector<128xf32>
    %41 = vector.shape_cast %40 : vector<128xf32> to vector<1x128xf32>
    %42 = arith.addf %36, %41 : vector<1x128xf32>
    %43 = arith.mulf %39, %39 : vector<256x128xf32>
    %cst_28 = arith.constant dense<0.000000e+00> : vector<128xf32>
    %44 = vector.multi_reduction <add>, %43, %cst_28 [0] : vector<256x128xf32> to vector<128xf32>
    %45 = vector.shape_cast %44 : vector<128xf32> to vector<1x128xf32>
    %46 = arith.addf %37, %45 : vector<1x128xf32>
    %cst_29 = arith.constant dense<0.000000e+00> : vector<256x128xf32>
    %47 = tpu.matmul %6, %35, %cst_29 {dimension_numbers = #tpu.dot_dimension_numbers<[1], [0], [0], [1], [0, 0, 1, 1], [], []>} : vector<256x128xbf16>, vector<128x128xbf16>, vector<256x128xf32> -> vector<256x128xf32>
    %48 = arith.addf %47, %2 : vector<256x128xf32>
    %cst_30 = arith.constant dense<0.000000e+00> : vector<128xf32>
    %49 = vector.multi_reduction <add>, %48, %cst_30 [0] : vector<256x128xf32> to vector<128xf32>
    %50 = vector.shape_cast %49 : vector<128xf32> to vector<1x128xf32>
    %51 = arith.addf %42, %50 : vector<1x128xf32>
    %52 = arith.mulf %48, %48 : vector<256x128xf32>
    %cst_31 = arith.constant dense<0.000000e+00> : vector<128xf32>
    %53 = vector.multi_reduction <add>, %52, %cst_31 [0] : vector<256x128xf32> to vector<128xf32>
    %54 = vector.shape_cast %53 : vector<128xf32> to vector<1x128xf32>
    %55 = arith.addf %46, %54 : vector<1x128xf32>
    %cst_32 = arith.constant dense<0.000000e+00> : vector<256x128xf32>
    %56 = tpu.matmul %8, %35, %cst_32 {dimension_numbers = #tpu.dot_dimension_numbers<[1], [0], [0], [1], [0, 0, 1, 1], [], []>} : vector<256x128xbf16>, vector<128x128xbf16>, vector<256x128xf32> -> vector<256x128xf32>
    %57 = arith.addf %56, %2 : vector<256x128xf32>
    %cst_33 = arith.constant dense<0.000000e+00> : vector<128xf32>
    %58 = vector.multi_reduction <add>, %57, %cst_33 [0] : vector<256x128xf32> to vector<128xf32>
    %59 = vector.shape_cast %58 : vector<128xf32> to vector<1x128xf32>
    %60 = arith.addf %51, %59 : vector<1x128xf32>
    %61 = arith.mulf %57, %57 : vector<256x128xf32>
    %cst_34 = arith.constant dense<0.000000e+00> : vector<128xf32>
    %62 = vector.multi_reduction <add>, %61, %cst_34 [0] : vector<256x128xf32> to vector<128xf32>
    %63 = vector.shape_cast %62 : vector<128xf32> to vector<1x128xf32>
    %64 = arith.addf %55, %63 : vector<1x128xf32>
    %cst_35 = arith.constant dense<0.000000e+00> : vector<256x128xf32>
    %65 = tpu.matmul %10, %35, %cst_35 {dimension_numbers = #tpu.dot_dimension_numbers<[1], [0], [0], [1], [0, 0, 1, 1], [], []>} : vector<256x128xbf16>, vector<128x128xbf16>, vector<256x128xf32> -> vector<256x128xf32>
    %66 = arith.addf %65, %2 : vector<256x128xf32>
    %cst_36 = arith.constant dense<0.000000e+00> : vector<128xf32>
    %67 = vector.multi_reduction <add>, %66, %cst_36 [0] : vector<256x128xf32> to vector<128xf32>
    %68 = vector.shape_cast %67 : vector<128xf32> to vector<1x128xf32>
    %69 = arith.addf %60, %68 : vector<1x128xf32>
    %70 = arith.mulf %66, %66 : vector<256x128xf32>
    %cst_37 = arith.constant dense<0.000000e+00> : vector<128xf32>
    %71 = vector.multi_reduction <add>, %70, %cst_37 [0] : vector<256x128xf32> to vector<128xf32>
    %72 = vector.shape_cast %71 : vector<128xf32> to vector<1x128xf32>
    %73 = arith.addf %64, %72 : vector<1x128xf32>
    %74 = vector.shape_cast %69 : vector<1x128xf32> to vector<1x128xf32>
    %75 = vector.broadcast %74 : vector<1x128xf32> to vector<8x128xf32>
    %c0_38 = arith.constant 0 : index
    %c0_39 = arith.constant 0 : index
    %76 = vector.load %arg6[%c0_38, %c0_39] : memref<8x128xf32, #tpu.memory_space<vmem>>, vector<8x128xf32>
    tpu.vector_store %arg6[%c0_38, %c0_39], %75 {strides = array<i32>} : memref<8x128xf32, #tpu.memory_space<vmem>>, vector<8x128xf32>,
    %77 = vector.shape_cast %73 : vector<1x128xf32> to vector<1x128xf32>
    %78 = vector.broadcast %77 : vector<1x128xf32> to vector<8x128xf32>
    %c0_40 = arith.constant 0 : index
    %c0_41 = arith.constant 0 : index
    %79 = vector.load %arg7[%c0_40, %c0_41] : memref<8x128xf32, #tpu.memory_space<vmem>>, vector<8x128xf32>
    tpu.vector_store %arg7[%c0_40, %c0_41], %78 {strides = array<i32>} : memref<8x128xf32, #tpu.memory_space<vmem>>, vector<8x128xf32>,
    return
  }
  func.func @transform_0(%arg0: i32) -> (i32, i32, i32) {
    %c0_i32 = arith.constant 0 : i32
    %c0_i32_0 = arith.constant 0 : i32
    %c0_i32_1 = arith.constant 0 : i32
    return %c0_i32, %arg0, %c0_i32_0 : i32, i32, i32
  }
  func.func @transform_1(%arg0: i32) -> (i32, i32) {
    %c0_i32 = arith.constant 0 : i32
    %c0_i32_0 = arith.constant 0 : i32
    return %arg0, %c0_i32 : i32, i32
  }
  func.func @transform_2(%arg0: i32) -> (i32, i32) {
    %c0_i32 = arith.constant 0 : i32
    %c0_i32_0 = arith.constant 0 : i32
    %c0_i32_1 = arith.constant 0 : i32
    return %c0_i32, %c0_i32_0 : i32, i32
  }
  func.func @transform_3(%arg0: i32) -> (i32, i32) {
    %c0_i32 = arith.constant 0 : i32
    %c0_i32_0 = arith.constant 0 : i32
    %c0_i32_1 = arith.constant 0 : i32
    return %c0_i32, %c0_i32_0 : i32, i32
  }
  func.func @transform_4(%arg0: i32) -> (i32, i32) {
    %c0_i32 = arith.constant 0 : i32
    %c0_i32_0 = arith.constant 0 : i32
    %c0_i32_1 = arith.constant 0 : i32
    return %c0_i32, %c0_i32_0 : i32, i32
  }
  func.func @transform_5(%arg0: i32) -> (i32, i32) {
    %c0_i32 = arith.constant 0 : i32
    %c0_i32_0 = arith.constant 0 : i32
    return %arg0, %c0_i32 : i32, i32
  }
  func.func @transform_6(%arg0: i32) -> (i32, i32) {
    %c0_i32 = arith.constant 0 : i32
    %c0_i32_0 = arith.constant 0 : i32
    return %arg0, %c0_i32 : i32, i32
  }
  func.func @transform_7(%arg0: i32) -> (i32, i32) {
    %c0_i32 = arith.constant 0 : i32
    %c0_i32_0 = arith.constant 0 : i32
    return %arg0, %c0_i32 : i32, i32
  }
  func.func @transform_8(%arg0: i32) -> (i32, i32) {
    %c0_i32 = arith.constant 0 : i32
    %c0_i32_0 = arith.constant 0 : i32
    return %arg0, %c0_i32 : i32, i32
  }
}

module attributes {stable_mosaic.version = 11 : i64} {
  func.func @_apply_kernel(%arg0: i32, %arg1: memref<4x256x128xbf16, #tpu.memory_space<vmem>>, %arg2: memref<256x128xbf16, #tpu.memory_space<vmem>>, %arg3: memref<128x128xbf16, #tpu.memory_space<vmem>>, %arg4: memref<128x128xbf16, #tpu.memory_space<vmem>>, %arg5: memref<256x128xbf16, #tpu.memory_space<vmem>>, %arg6: memref<1x128xf32, #tpu.memory_space<vmem>>, %arg7: memref<1x128xf32, #tpu.memory_space<vmem>>, %arg8: memref<1x128xf32, #tpu.memory_space<vmem>>, %arg9: memref<1x128xf32, #tpu.memory_space<vmem>>, %arg10: memref<4x256x128xbf16, #tpu.memory_space<vmem>>, %arg11: memref<256x128xbf16, #tpu.memory_space<vmem>>) attributes {dimension_semantics = [#tpu.dimension_semantics<parallel>], iteration_bounds = array<i64: 2>, scalar_prefetch = 0 : i64, scratch_operands = 0 : i64, tpu.core_type = #tpu.core_type<tc>, window_params = [{transform_indices = @transform_0, window_bounds = array<i64: 4, 256, 128>}, {transform_indices = @transform_1, window_bounds = array<i64: 256, 128>}, {pipeline_mode = #tpu.pipeline_mode<synchronous>, transform_indices = @transform_2, window_bounds = array<i64: 128, 128>}, {pipeline_mode = #tpu.pipeline_mode<synchronous>, transform_indices = @transform_3, window_bounds = array<i64: 128, 128>}, {pipeline_mode = #tpu.pipeline_mode<synchronous>, transform_indices = @transform_4, window_bounds = array<i64: 256, 128>}, {pipeline_mode = #tpu.pipeline_mode<synchronous>, transform_indices = @transform_5, window_bounds = array<i64: 1, 128>}, {pipeline_mode = #tpu.pipeline_mode<synchronous>, transform_indices = @transform_6, window_bounds = array<i64: 1, 128>}, {pipeline_mode = #tpu.pipeline_mode<synchronous>, transform_indices = @transform_7, window_bounds = array<i64: 1, 128>}, {pipeline_mode = #tpu.pipeline_mode<synchronous>, transform_indices = @transform_8, window_bounds = array<i64: 1, 128>}, {transform_indices = @transform_9, window_bounds = array<i64: 4, 256, 128>}, {transform_indices = @transform_10, window_bounds = array<i64: 256, 128>}]} {
    %c0 = arith.constant 0 : index
    %c0_0 = arith.constant 0 : index
    %0 = vector.load %arg2[%c0, %c0_0] : memref<256x128xbf16, #tpu.memory_space<vmem>>, vector<256x128xbf16>
    %c0_1 = arith.constant 0 : index
    %c0_2 = arith.constant 0 : index
    %1 = vector.load %arg4[%c0_1, %c0_2] : memref<128x128xbf16, #tpu.memory_space<vmem>>, vector<128x128xbf16>
    %cst = arith.constant dense<0.000000e+00> : vector<256x128xf32>
    %2 = tpu.matmul %0, %1, %cst {dimension_numbers = #tpu.dot_dimension_numbers<[1], [0], [0], [1], [0, 0, 1, 1], [], []>} : vector<256x128xbf16>, vector<128x128xbf16>, vector<256x128xf32> -> vector<256x128xf32>
    %c0_3 = arith.constant 0 : index
    %c0_4 = arith.constant 0 : index
    %c0_5 = arith.constant 0 : index
    %3 = vector.load %arg1[%c0_3, %c0_4, %c0_5] : memref<4x256x128xbf16, #tpu.memory_space<vmem>>, vector<1x256x128xbf16>
    %4 = vector.shape_cast %3 : vector<1x256x128xbf16> to vector<256x128xbf16>
    %c1 = arith.constant 1 : index
    %c0_6 = arith.constant 0 : index
    %c0_7 = arith.constant 0 : index
    %5 = vector.load %arg1[%c1, %c0_6, %c0_7] : memref<4x256x128xbf16, #tpu.memory_space<vmem>>, vector<1x256x128xbf16>
    %6 = vector.shape_cast %5 : vector<1x256x128xbf16> to vector<256x128xbf16>
    %c2 = arith.constant 2 : index
    %c0_8 = arith.constant 0 : index
    %c0_9 = arith.constant 0 : index
    %7 = vector.load %arg1[%c2, %c0_8, %c0_9] : memref<4x256x128xbf16, #tpu.memory_space<vmem>>, vector<1x256x128xbf16>
    %8 = vector.shape_cast %7 : vector<1x256x128xbf16> to vector<256x128xbf16>
    %c3 = arith.constant 3 : index
    %c0_10 = arith.constant 0 : index
    %c0_11 = arith.constant 0 : index
    %9 = vector.load %arg1[%c3, %c0_10, %c0_11] : memref<4x256x128xbf16, #tpu.memory_space<vmem>>, vector<1x256x128xbf16>
    %10 = vector.shape_cast %9 : vector<1x256x128xbf16> to vector<256x128xbf16>
    %11 = arith.extf %4 : vector<256x128xbf16> to vector<256x128xf32>
    %12 = arith.extf %6 : vector<256x128xbf16> to vector<256x128xf32>
    %13 = arith.addf %11, %12 : vector<256x128xf32>
    %14 = arith.extf %8 : vector<256x128xbf16> to vector<256x128xf32>
    %15 = arith.addf %13, %14 : vector<256x128xf32>
    %16 = arith.extf %10 : vector<256x128xbf16> to vector<256x128xf32>
    %17 = arith.addf %15, %16 : vector<256x128xf32>
    %cst_12 = arith.constant 2.500000e-01 : f32
    %18 = vector.broadcast %cst_12 : f32 to vector<256x128xf32>
    %19 = arith.mulf %17, %18 : vector<256x128xf32>
    %20 = arith.truncf %19 : vector<256x128xf32> to vector<256x128xbf16>
    %21 = tpu.concatenate %0, %20 in 1 : vector<256x128xbf16>, vector<256x128xbf16> -> vector<256x256xbf16>
    %c0_13 = arith.constant 0 : index
    %c0_14 = arith.constant 0 : index
    %22 = vector.load %arg5[%c0_13, %c0_14] : memref<256x128xbf16, #tpu.memory_space<vmem>>, vector<256x128xbf16>
    %cst_15 = arith.constant dense<0.000000e+00> : vector<256x128xf32>
    %23 = tpu.matmul %21, %22, %cst_15 {dimension_numbers = #tpu.dot_dimension_numbers<[1], [0], [0], [1], [0, 0, 1, 1], [], []>} : vector<256x256xbf16>, vector<256x128xbf16>, vector<256x128xf32> -> vector<256x128xf32>
    %c0_16 = arith.constant 0 : index
    %c0_17 = arith.constant 0 : index
    %24 = vector.load %arg8[%c0_16, %c0_17] : memref<1x128xf32, #tpu.memory_space<vmem>>, vector<1x128xf32>
    %25 = vector.broadcast %24 : vector<1x128xf32> to vector<256x128xf32>
    %26 = arith.mulf %23, %25 : vector<256x128xf32>
    %c0_18 = arith.constant 0 : index
    %c0_19 = arith.constant 0 : index
    %27 = vector.load %arg9[%c0_18, %c0_19] : memref<1x128xf32, #tpu.memory_space<vmem>>, vector<1x128xf32>
    %28 = vector.broadcast %27 : vector<1x128xf32> to vector<256x128xf32>
    %29 = arith.addf %26, %28 : vector<256x128xf32>
    %cst_20 = arith.constant 0.000000e+00 : f32
    %30 = vector.broadcast %cst_20 : f32 to vector<256x128xf32>
    %31 = arith.maximumf %29, %30 : vector<256x128xf32>
    %32 = arith.truncf %31 : vector<256x128xf32> to vector<256x128xbf16>
    %c0_21 = arith.constant 0 : index
    %c0_22 = arith.constant 0 : index
    %33 = vector.load %arg11[%c0_21, %c0_22] : memref<256x128xbf16, #tpu.memory_space<vmem>>, vector<256x128xbf16>
    tpu.vector_store %arg11[%c0_21, %c0_22], %32 {strides = array<i32>} : memref<256x128xbf16, #tpu.memory_space<vmem>>, vector<256x128xbf16>,
    %c0_23 = arith.constant 0 : index
    %c0_24 = arith.constant 0 : index
    %34 = vector.load %arg3[%c0_23, %c0_24] : memref<128x128xbf16, #tpu.memory_space<vmem>>, vector<128x128xbf16>
    %c0_25 = arith.constant 0 : index
    %c0_26 = arith.constant 0 : index
    %35 = vector.load %arg6[%c0_25, %c0_26] : memref<1x128xf32, #tpu.memory_space<vmem>>, vector<1x128xf32>
    %c0_27 = arith.constant 0 : index
    %c0_28 = arith.constant 0 : index
    %36 = vector.load %arg7[%c0_27, %c0_28] : memref<1x128xf32, #tpu.memory_space<vmem>>, vector<1x128xf32>
    %cst_29 = arith.constant dense<0.000000e+00> : vector<256x128xf32>
    %37 = tpu.matmul %4, %34, %cst_29 {dimension_numbers = #tpu.dot_dimension_numbers<[1], [0], [0], [1], [0, 0, 1, 1], [], []>} : vector<256x128xbf16>, vector<128x128xbf16>, vector<256x128xf32> -> vector<256x128xf32>
    %38 = arith.addf %37, %2 : vector<256x128xf32>
    %39 = vector.broadcast %35 : vector<1x128xf32> to vector<256x128xf32>
    %40 = arith.mulf %38, %39 : vector<256x128xf32>
    %41 = vector.broadcast %36 : vector<1x128xf32> to vector<256x128xf32>
    %42 = arith.addf %40, %41 : vector<256x128xf32>
    %cst_30 = arith.constant 0.000000e+00 : f32
    %43 = vector.broadcast %cst_30 : f32 to vector<256x128xf32>
    %44 = arith.maximumf %42, %43 : vector<256x128xf32>
    %45 = arith.truncf %44 : vector<256x128xf32> to vector<256x128xbf16>
    %c0_31 = arith.constant 0 : index
    %c0_32 = arith.constant 0 : index
    %c0_33 = arith.constant 0 : index
    %46 = vector.load %arg10[%c0_31, %c0_32, %c0_33] : memref<4x256x128xbf16, #tpu.memory_space<vmem>>, vector<1x256x128xbf16>
    %47 = vector.shape_cast %46 : vector<1x256x128xbf16> to vector<256x128xbf16>
    %48 = vector.shape_cast %45 : vector<256x128xbf16> to vector<1x256x128xbf16>
    tpu.vector_store %arg10[%c0_31, %c0_32, %c0_33], %48 {strides = array<i32>} : memref<4x256x128xbf16, #tpu.memory_space<vmem>>, vector<1x256x128xbf16>,
    %cst_34 = arith.constant dense<0.000000e+00> : vector<256x128xf32>
    %49 = tpu.matmul %6, %34, %cst_34 {dimension_numbers = #tpu.dot_dimension_numbers<[1], [0], [0], [1], [0, 0, 1, 1], [], []>} : vector<256x128xbf16>, vector<128x128xbf16>, vector<256x128xf32> -> vector<256x128xf32>
    %50 = arith.addf %49, %2 : vector<256x128xf32>
    %51 = vector.broadcast %35 : vector<1x128xf32> to vector<256x128xf32>
    %52 = arith.mulf %50, %51 : vector<256x128xf32>
    %53 = vector.broadcast %36 : vector<1x128xf32> to vector<256x128xf32>
    %54 = arith.addf %52, %53 : vector<256x128xf32>
    %cst_35 = arith.constant 0.000000e+00 : f32
    %55 = vector.broadcast %cst_35 : f32 to vector<256x128xf32>
    %56 = arith.maximumf %54, %55 : vector<256x128xf32>
    %57 = arith.truncf %56 : vector<256x128xf32> to vector<256x128xbf16>
    %c1_36 = arith.constant 1 : index
    %c0_37 = arith.constant 0 : index
    %c0_38 = arith.constant 0 : index
    %58 = vector.load %arg10[%c1_36, %c0_37, %c0_38] : memref<4x256x128xbf16, #tpu.memory_space<vmem>>, vector<1x256x128xbf16>
    %59 = vector.shape_cast %58 : vector<1x256x128xbf16> to vector<256x128xbf16>
    %60 = vector.shape_cast %57 : vector<256x128xbf16> to vector<1x256x128xbf16>
    tpu.vector_store %arg10[%c1_36, %c0_37, %c0_38], %60 {strides = array<i32>} : memref<4x256x128xbf16, #tpu.memory_space<vmem>>, vector<1x256x128xbf16>,
    %cst_39 = arith.constant dense<0.000000e+00> : vector<256x128xf32>
    %61 = tpu.matmul %8, %34, %cst_39 {dimension_numbers = #tpu.dot_dimension_numbers<[1], [0], [0], [1], [0, 0, 1, 1], [], []>} : vector<256x128xbf16>, vector<128x128xbf16>, vector<256x128xf32> -> vector<256x128xf32>
    %62 = arith.addf %61, %2 : vector<256x128xf32>
    %63 = vector.broadcast %35 : vector<1x128xf32> to vector<256x128xf32>
    %64 = arith.mulf %62, %63 : vector<256x128xf32>
    %65 = vector.broadcast %36 : vector<1x128xf32> to vector<256x128xf32>
    %66 = arith.addf %64, %65 : vector<256x128xf32>
    %cst_40 = arith.constant 0.000000e+00 : f32
    %67 = vector.broadcast %cst_40 : f32 to vector<256x128xf32>
    %68 = arith.maximumf %66, %67 : vector<256x128xf32>
    %69 = arith.truncf %68 : vector<256x128xf32> to vector<256x128xbf16>
    %c2_41 = arith.constant 2 : index
    %c0_42 = arith.constant 0 : index
    %c0_43 = arith.constant 0 : index
    %70 = vector.load %arg10[%c2_41, %c0_42, %c0_43] : memref<4x256x128xbf16, #tpu.memory_space<vmem>>, vector<1x256x128xbf16>
    %71 = vector.shape_cast %70 : vector<1x256x128xbf16> to vector<256x128xbf16>
    %72 = vector.shape_cast %69 : vector<256x128xbf16> to vector<1x256x128xbf16>
    tpu.vector_store %arg10[%c2_41, %c0_42, %c0_43], %72 {strides = array<i32>} : memref<4x256x128xbf16, #tpu.memory_space<vmem>>, vector<1x256x128xbf16>,
    %cst_44 = arith.constant dense<0.000000e+00> : vector<256x128xf32>
    %73 = tpu.matmul %10, %34, %cst_44 {dimension_numbers = #tpu.dot_dimension_numbers<[1], [0], [0], [1], [0, 0, 1, 1], [], []>} : vector<256x128xbf16>, vector<128x128xbf16>, vector<256x128xf32> -> vector<256x128xf32>
    %74 = arith.addf %73, %2 : vector<256x128xf32>
    %75 = vector.broadcast %35 : vector<1x128xf32> to vector<256x128xf32>
    %76 = arith.mulf %74, %75 : vector<256x128xf32>
    %77 = vector.broadcast %36 : vector<1x128xf32> to vector<256x128xf32>
    %78 = arith.addf %76, %77 : vector<256x128xf32>
    %cst_45 = arith.constant 0.000000e+00 : f32
    %79 = vector.broadcast %cst_45 : f32 to vector<256x128xf32>
    %80 = arith.maximumf %78, %79 : vector<256x128xf32>
    %81 = arith.truncf %80 : vector<256x128xf32> to vector<256x128xbf16>
    %c3_46 = arith.constant 3 : index
    %c0_47 = arith.constant 0 : index
    %c0_48 = arith.constant 0 : index
    %82 = vector.load %arg10[%c3_46, %c0_47, %c0_48] : memref<4x256x128xbf16, #tpu.memory_space<vmem>>, vector<1x256x128xbf16>
    %83 = vector.shape_cast %82 : vector<1x256x128xbf16> to vector<256x128xbf16>
    %84 = vector.shape_cast %81 : vector<256x128xbf16> to vector<1x256x128xbf16>
    tpu.vector_store %arg10[%c3_46, %c0_47, %c0_48], %84 {strides = array<i32>} : memref<4x256x128xbf16, #tpu.memory_space<vmem>>, vector<1x256x128xbf16>,
    return
  }
  func.func @transform_0(%arg0: i32) -> (i32, i32, i32) {
    %c0_i32 = arith.constant 0 : i32
    %c0_i32_0 = arith.constant 0 : i32
    %c0_i32_1 = arith.constant 0 : i32
    return %c0_i32, %arg0, %c0_i32_0 : i32, i32, i32
  }
  func.func @transform_1(%arg0: i32) -> (i32, i32) {
    %c0_i32 = arith.constant 0 : i32
    %c0_i32_0 = arith.constant 0 : i32
    return %arg0, %c0_i32 : i32, i32
  }
  func.func @transform_2(%arg0: i32) -> (i32, i32) {
    %c0_i32 = arith.constant 0 : i32
    %c0_i32_0 = arith.constant 0 : i32
    %c0_i32_1 = arith.constant 0 : i32
    return %c0_i32, %c0_i32_0 : i32, i32
  }
  func.func @transform_3(%arg0: i32) -> (i32, i32) {
    %c0_i32 = arith.constant 0 : i32
    %c0_i32_0 = arith.constant 0 : i32
    %c0_i32_1 = arith.constant 0 : i32
    return %c0_i32, %c0_i32_0 : i32, i32
  }
  func.func @transform_4(%arg0: i32) -> (i32, i32) {
    %c0_i32 = arith.constant 0 : i32
    %c0_i32_0 = arith.constant 0 : i32
    %c0_i32_1 = arith.constant 0 : i32
    return %c0_i32, %c0_i32_0 : i32, i32
  }
  func.func @transform_5(%arg0: i32) -> (i32, i32) {
    %c0_i32 = arith.constant 0 : i32
    %c0_i32_0 = arith.constant 0 : i32
    %c0_i32_1 = arith.constant 0 : i32
    return %c0_i32, %c0_i32_0 : i32, i32
  }
  func.func @transform_6(%arg0: i32) -> (i32, i32) {
    %c0_i32 = arith.constant 0 : i32
    %c0_i32_0 = arith.constant 0 : i32
    %c0_i32_1 = arith.constant 0 : i32
    return %c0_i32, %c0_i32_0 : i32, i32
  }
  func.func @transform_7(%arg0: i32) -> (i32, i32) {
    %c0_i32 = arith.constant 0 : i32
    %c0_i32_0 = arith.constant 0 : i32
    %c0_i32_1 = arith.constant 0 : i32
    return %c0_i32, %c0_i32_0 : i32, i32
  }
  func.func @transform_8(%arg0: i32) -> (i32, i32) {
    %c0_i32 = arith.constant 0 : i32
    %c0_i32_0 = arith.constant 0 : i32
    %c0_i32_1 = arith.constant 0 : i32
    return %c0_i32, %c0_i32_0 : i32, i32
  }
  func.func @transform_9(%arg0: i32) -> (i32, i32, i32) {
    %c0_i32 = arith.constant 0 : i32
    %c0_i32_0 = arith.constant 0 : i32
    %c0_i32_1 = arith.constant 0 : i32
    return %c0_i32, %arg0, %c0_i32_0 : i32, i32, i32
  }
  func.func @transform_10(%arg0: i32) -> (i32, i32) {
    %c0_i32 = arith.constant 0 : i32
    %c0_i32_0 = arith.constant 0 : i32
    return %arg0, %c0_i32 : i32, i32
  }
}

</mosaic_0001>

<bundles_post_ra>
// kernel: double_oct_forward.4
= control target key start
LH: loop header
LB: loop body
LE: loop exit
PB: predicated region body
PF: predicated region fallthrough
CT: control target
= control target key end

     0   :  { %s4739_s27 = smov 0   ;;  %s4741_s28 = smov 0   ;;  %s5768_s0 = inlined_call_operand.vmem [shape: bf16[4,512,128], index: 0, kind: input, shape index: {}]   ;;  %s5769_s1 = inlined_call_operand.vmem [shape: bf16[512,128], index: 1, kind: input, shape index: {}]   ;;  %s5770_s2 = inlined_call_operand.vmem [shape: bf16[128,128], index: 2, kind: input, shape index: {}]   ;;  %s5771_s3 = inlined_call_operand.vmem [shape: bf16[128,128], index: 3, kind: input, shape index: {}]   ;;  %s5772_s4 = inlined_call_operand.vmem [shape: bf16[256,128], index: 4, kind: input, shape index: {}]   ;;  %s5773_s5 = inlined_call_operand.vmem [shape: f32[16,128], index: 5, kind: output, shape index: {0}]   ;;  %s5774_s6 = inlined_call_operand.vmem [shape: f32[16,128], index: 6, kind: output, shape index: {1}]   ;;  %s5775_s7 = inlined_call_operand.vmem [shape: f32[16,128], index: 7, kind: output, shape index: {2}]   ;;  %s5776_s8 = inlined_call_operand.vmem [shape: f32[16,128], index: 8, kind: output, shape index: {3}]  }
   0x1   :  { %s4743_s29 = smov 0  }
   0x2 LB: > { %s4755_s30 = sadd.s32 4294967295, %s4692_s29   ;;  %s4758_s9 = sadd.s32 1, %s4692_s29   ;;  %s4692_s29 = sphi %s4743_s29, %s5831_s29   ;;  %s4688_s28 = sphi %s4741_s28, %s5830_s28   ;;  %s4684_s27 = sphi %s4739_s27, %s5829_s27  }
   0x3   : > { %s23_s10 = ssub.s32 %s4692_s29, %s4758_s9  ;;  %s26_s11 = sadd.s32 1, %s4688_s28 }
   0x4   : > { %p24_p0 = scmp.eq.s32.totalorder %s23_s10, 0  ;;  %p33_p1 = scmp.ne.s32.totalorder %s4688_s28, %s4684_s27 }
   0x5   : > { %p34_p2 = scmp.eq.s32.totalorder %s4692_s29, 0  ;;  %p3755_p4 = scmp.ge.s32.totalorder %s4692_s29, 2 }
   0x6   : > { %s4767_s12 = scalar_select %p24_p0, %s4688_s28, %s26_s11  }
   0x7   : > { %p35_p3 = por %p34_p2, %p33_p1  ;;  %261 = sbr.rel (%p3755_p4) target bundleno = 50 (0x32), region = 28 }
   0xe   : > { %264 = sbr.rel (!%p35_p3) target bundleno = 50 (0x32), region = 32  ;;  %s266_s13 = sand.u32 (%p35_p3), 1, %s4688_s28  }
   0xf   : > { %s3977_s14 = sshll.u32 (%p35_p3), %s4692_s29, 7  ;;  %s3756_s15 = sshll.u32 (%p35_p3), %s266_s13, 9 }
  0x10   : > { %s4775_s18 = scalar_lea.vmem (%p35_p3), %s5768_s0, %s3977_s14  ;;  %s4780_s19 = scalar_lea.vmem (%p35_p3), [#allocation2], %s3756_s15 }
  0x11   : > { %v287_v0 = vld [vmem:[%s4775_s18] sm:$0xff] (%p35_p3)   ;;  %v291_v1 = vld [vmem:[%s4775_s18 + $0x8] sm:$0xff] (%p35_p3)   ;;  %v295_v2 = vld [vmem:[%s4775_s18 + $0x10] sm:$0xff] (%p35_p3)  }
  0x12   : > { %288 = vst [vmem:[%s4780_s19] sm:$0xff] (%p35_p3), %v287_v0   ;;  %292 = vst [vmem:[%s4780_s19 + $0x8] sm:$0xff] (%p35_p3), %v291_v1   ;;  %v299_v3 = vld [vmem:[%s4775_s18 + $0x18] sm:$0xff] (%p35_p3)   ;;  %v303_v4 = vld [vmem:[%s4775_s18 + $0x20] sm:$0xff] (%p35_p3)  }
  0x13   : > { %296 = vst [vmem:[%s4780_s19 + $0x10] sm:$0xff] (%p35_p3), %v295_v2   ;;  %v307_v5 = vld [vmem:[%s4775_s18 + $0x28] sm:$0xff] (%p35_p3)   ;;  %300 = vst [vmem:[%s4780_s19 + $0x18] sm:$0xff] (%p35_p3), %v299_v3   ;;  %v311_v6 = vld [vmem:[%s4775_s18 + $0x30] sm:$0xff] (%p35_p3)  }
  0x14   : > { %304 = vst [vmem:[%s4780_s19 + $0x20] sm:$0xff] (%p35_p3), %v303_v4   ;;  %308 = vst [vmem:[%s4780_s19 + $0x28] sm:$0xff] (%p35_p3), %v307_v5   ;;  %v315_v7 = vld [vmem:[%s4775_s18 + $0x38] sm:$0xff] (%p35_p3)   ;;  %v319_v8 = vld [vmem:[%s4775_s18 + $0x40] sm:$0xff] (%p35_p3)  }
  0x15   : > { %312 = vst [vmem:[%s4780_s19 + $0x30] sm:$0xff] %v311_v6   ;;  %316 = vst [vmem:[%s4780_s19 + $0x38] sm:$0xff] %v315_v7   ;;  %v323_v9 = vld [vmem:[%s4775_s18 + $0x48] sm:$0xff]   ;;  %v327_v10 = vld [vmem:[%s4775_s18 + $0x50] sm:$0xff]  }
  0x16   : > { %320 = vst [vmem:[%s4780_s19 + $0x40] sm:$0xff] %v319_v8   ;;  %v331_v11 = vld [vmem:[%s4775_s18 + $0x58] sm:$0xff]   ;;  %324 = vst [vmem:[%s4780_s19 + $0x48] sm:$0xff] %v323_v9   ;;  %v335_v12 = vld [vmem:[%s4775_s18 + $0x60] sm:$0xff]  }
  0x17   : > { %328 = vst [vmem:[%s4780_s19 + $0x50] sm:$0xff] %v327_v10   ;;  %332 = vst [vmem:[%s4780_s19 + $0x58] sm:$0xff] %v331_v11   ;;  %v339_v13 = vld [vmem:[%s4775_s18 + $0x68] sm:$0xff]   ;;  %v343_v14 = vld [vmem:[%s4775_s18 + $0x70] sm:$0xff]  }
  0x18   : > { %336 = vst [vmem:[%s4780_s19 + $0x60] sm:$0xff] %v335_v12   ;;  %340 = vst [vmem:[%s4780_s19 + $0x68] sm:$0xff] %v339_v13   ;;  %v347_v15 = vld [vmem:[%s4775_s18 + $0x78] sm:$0xff]   ;;  %v351_v16 = vld [vmem:[%s4775_s18 + $0x100] sm:$0xff]  }
  0x19   : > { %344 = vst [vmem:[%s4780_s19 + $0x70] sm:$0xff] %v343_v14   ;;  %v355_v17 = vld [vmem:[%s4775_s18 + $0x108] sm:$0xff]   ;;  %348 = vst [vmem:[%s4780_s19 + $0x78] sm:$0xff] %v347_v15   ;;  %v359_v18 = vld [vmem:[%s4775_s18 + $0x110] sm:$0xff]  }
  0x1a   : > { %352 = vst [vmem:[%s4780_s19 + $0x80] sm:$0xff] %v351_v16   ;;  %356 = vst [vmem:[%s4780_s19 + $0x88] sm:$0xff] %v355_v17   ;;  %v363_v19 = vld [vmem:[%s4775_s18 + $0x118] sm:$0xff]   ;;  %v367_v20 = vld [vmem:[%s4775_s18 + $0x120] sm:$0xff]  }
  0x1b   : > { %360 = vst [vmem:[%s4780_s19 + $0x90] sm:$0xff] %v359_v18   ;;  %364 = vst [vmem:[%s4780_s19 + $0x98] sm:$0xff] %v363_v19   ;;  %v371_v21 = vld [vmem:[%s4775_s18 + $0x128] sm:$0xff]   ;;  %v375_v22 = vld [vmem:[%s4775_s18 + $0x130] sm:$0xff]  }
  0x1c   : > { %368 = vst [vmem:[%s4780_s19 + $0xa0] sm:$0xff] %v367_v20   ;;  %v379_v23 = vld [vmem:[%s4775_s18 + $0x138] sm:$0xff]   ;;  %372 = vst [vmem:[%s4780_s19 + $0xa8] sm:$0xff] %v371_v21   ;;  %v383_v24 = vld [vmem:[%s4775_s18 + $0x140] sm:$0xff]  }
  0x1d   : > { %376 = vst [vmem:[%s4780_s19 + $0xb0] sm:$0xff] %v375_v22   ;;  %380 = vst [vmem:[%s4780_s19 + $0xb8] sm:$0xff] %v379_v23   ;;  %v387_v25 = vld [vmem:[%s4775_s18 + $0x148] sm:$0xff]   ;;  %v391_v26 = vld [vmem:[%s4775_s18 + $0x150] sm:$0xff]  }
  0x1e   : > { %384 = vst [vmem:[%s4780_s19 + $0xc0] sm:$0xff] %v383_v24   ;;  %388 = vst [vmem:[%s4780_s19 + $0xc8] sm:$0xff] %v387_v25   ;;  %v395_v27 = vld [vmem:[%s4775_s18 + $0x158] sm:$0xff]   ;;  %v399_v28 = vld [vmem:[%s4775_s18 + $0x160] sm:$0xff]  }
  0x1f   : > { %392 = vst [vmem:[%s4780_s19 + $0xd0] sm:$0xff] %v391_v26   ;;  %v403_v29 = vld [vmem:[%s4775_s18 + $0x168] sm:$0xff]   ;;  %396 = vst [vmem:[%s4780_s19 + $0xd8] sm:$0xff] %v395_v27   ;;  %v407_v30 = vld [vmem:[%s4775_s18 + $0x170] sm:$0xff]  }
  0x20   : > { %400 = vst [vmem:[%s4780_s19 + $0xe0] sm:$0xff] %v399_v28   ;;  %404 = vst [vmem:[%s4780_s19 + $0xe8] sm:$0xff] %v403_v29   ;;  %v411_v31 = vld [vmem:[%s4775_s18 + $0x178] sm:$0xff]   ;;  %v415_v32 = vld [vmem:[%s4775_s18 + $0x200] sm:$0xff]  }
  0x21   : > { %408 = vst [vmem:[%s4780_s19 + $0xf0] sm:$0xff] %v407_v30   ;;  %412 = vst [vmem:[%s4780_s19 + $0xf8] sm:$0xff] %v411_v31   ;;  %v419_v33 = vld [vmem:[%s4775_s18 + $0x208] sm:$0xff]   ;;  %v423_v34 = vld [vmem:[%s4775_s18 + $0x210] sm:$0xff]  }
  0x22   : > { %416 = vst [vmem:[%s4780_s19 + $0x100] sm:$0xff] %v415_v32   ;;  %v427_v35 = vld [vmem:[%s4775_s18 + $0x218] sm:$0xff]   ;;  %420 = vst [vmem:[%s4780_s19 + $0x108] sm:$0xff] %v419_v33   ;;  %v431_v36 = vld [vmem:[%s4775_s18 + $0x220] sm:$0xff]  }
  0x23   : > { %424 = vst [vmem:[%s4780_s19 + $0x110] sm:$0xff] %v423_v34   ;;  %428 = vst [vmem:[%s4780_s19 + $0x118] sm:$0xff] %v427_v35   ;;  %v435_v37 = vld [vmem:[%s4775_s18 + $0x228] sm:$0xff]   ;;  %v439_v38 = vld [vmem:[%s4775_s18 + $0x230] sm:$0xff]  }
  0x24   : > { %432 = vst [vmem:[%s4780_s19 + $0x120] sm:$0xff] %v431_v36   ;;  %436 = vst [vmem:[%s4780_s19 + $0x128] sm:$0xff] %v435_v37   ;;  %v443_v39 = vld [vmem:[%s4775_s18 + $0x238] sm:$0xff]   ;;  %v447_v40 = vld [vmem:[%s4775_s18 + $0x240] sm:$0xff]  }
  0x25   : > { %440 = vst [vmem:[%s4780_s19 + $0x130] sm:$0xff] %v439_v38   ;;  %v451_v41 = vld [vmem:[%s4775_s18 + $0x248] sm:$0xff]   ;;  %444 = vst [vmem:[%s4780_s19 + $0x138] sm:$0xff] %v443_v39   ;;  %v455_v42 = vld [vmem:[%s4775_s18 + $0x250] sm:$0xff]  }
  0x26   : > { %448 = vst [vmem:[%s4780_s19 + $0x140] sm:$0xff] %v447_v40   ;;  %452 = vst [vmem:[%s4780_s19 + $0x148] sm:$0xff] %v451_v41   ;;  %v459_v43 = vld [vmem:[%s4775_s18 + $0x258] sm:$0xff]   ;;  %v463_v44 = vld [vmem:[%s4775_s18 + $0x260] sm:$0xff]  }
  0x27   : > { %456 = vst [vmem:[%s4780_s19 + $0x150] sm:$0xff] %v455_v42   ;;  %460 = vst [vmem:[%s4780_s19 + $0x158] sm:$0xff] %v459_v43   ;;  %v467_v45 = vld [vmem:[%s4775_s18 + $0x268] sm:$0xff]   ;;  %v471_v46 = vld [vmem:[%s4775_s18 + $0x270] sm:$0xff]  }
  0x28   : > { %464 = vst [vmem:[%s4780_s19 + $0x160] sm:$0xff] %v463_v44   ;;  %v475_v47 = vld [vmem:[%s4775_s18 + $0x278] sm:$0xff]   ;;  %468 = vst [vmem:[%s4780_s19 + $0x168] sm:$0xff] %v467_v45   ;;  %v479_v48 = vld [vmem:[%s4775_s18 + $0x300] sm:$0xff]  }
  0x29   : > { %472 = vst [vmem:[%s4780_s19 + $0x170] sm:$0xff] %v471_v46   ;;  %476 = vst [vmem:[%s4780_s19 + $0x178] sm:$0xff] %v475_v47   ;;  %v483_v49 = vld [vmem:[%s4775_s18 + $0x308] sm:$0xff]   ;;  %v487_v50 = vld [vmem:[%s4775_s18 + $0x310] sm:$0xff]  }
  0x2a   : > { %480 = vst [vmem:[%s4780_s19 + $0x180] sm:$0xff] %v479_v48   ;;  %484 = vst [vmem:[%s4780_s19 + $0x188] sm:$0xff] %v483_v49   ;;  %v491_v51 = vld [vmem:[%s4775_s18 + $0x318] sm:$0xff]   ;;  %v495_v52 = vld [vmem:[%s4775_s18 + $0x320] sm:$0xff]  }
  0x2b   : > { %488 = vst [vmem:[%s4780_s19 + $0x190] sm:$0xff] %v487_v50   ;;  %v499_v53 = vld [vmem:[%s4775_s18 + $0x328] sm:$0xff]   ;;  %492 = vst [vmem:[%s4780_s19 + $0x198] sm:$0xff] %v491_v51   ;;  %v503_v54 = vld [vmem:[%s4775_s18 + $0x330] sm:$0xff]  }
  0x2c   : > { %496 = vst [vmem:[%s4780_s19 + $0x1a0] sm:$0xff] %v495_v52   ;;  %500 = vst [vmem:[%s4780_s19 + $0x1a8] sm:$0xff] %v499_v53   ;;  %v507_v55 = vld [vmem:[%s4775_s18 + $0x338] sm:$0xff]   ;;  %v511_v56 = vld [vmem:[%s4775_s18 + $0x340] sm:$0xff]  }
  0x2d   : > { %504 = vst [vmem:[%s4780_s19 + $0x1b0] sm:$0xff] %v503_v54   ;;  %508 = vst [vmem:[%s4780_s19 + $0x1b8] sm:$0xff] %v507_v55   ;;  %v515_v57 = vld [vmem:[%s4775_s18 + $0x348] sm:$0xff]   ;;  %v519_v58 = vld [vmem:[%s4775_s18 + $0x350] sm:$0xff]  }
  0x2e   : > { %512 = vst [vmem:[%s4780_s19 + $0x1c0] sm:$0xff] %v511_v56   ;;  %v523_v59 = vld [vmem:[%s4775_s18 + $0x358] sm:$0xff]   ;;  %516 = vst [vmem:[%s4780_s19 + $0x1c8] sm:$0xff] %v515_v57   ;;  %v527_v60 = vld [vmem:[%s4775_s18 + $0x360] sm:$0xff]  }
  0x2f   : > { %520 = vst [vmem:[%s4780_s19 + $0x1d0] sm:$0xff] %v519_v58   ;;  %524 = vst [vmem:[%s4780_s19 + $0x1d8] sm:$0xff] %v523_v59   ;;  %v531_v61 = vld [vmem:[%s4775_s18 + $0x368] sm:$0xff]   ;;  %v535_v62 = vld [vmem:[%s4775_s18 + $0x370] sm:$0xff]  }
  0x30   : > { %528 = vst [vmem:[%s4780_s19 + $0x1e0] sm:$0xff] %v527_v60   ;;  %532 = vst [vmem:[%s4780_s19 + $0x1e8] sm:$0xff] %v531_v61   ;;  %v539_v63 = vld [vmem:[%s4775_s18 + $0x378] sm:$0xff]  }
  0x31   : > { %536 = vst [vmem:[%s4780_s19 + $0x1f0] sm:$0xff] %v535_v62   ;;  %540 = vst [vmem:[%s4780_s19 + $0x1f8] sm:$0xff] %v539_v63  }
  0x32 PF: > { %p3759_p5 = scmp.ge.s32.totalorder %s4692_s29, 1  ;;  %p829_p6 = scmp.lt.s32.totalorder %s4692_s29, 3 }
  0x34   : > { %p830_p7 = pnand %p3759_p5, %p829_p6 }
  0x36   : > { %833 = sbr.rel (%p830_p7) target bundleno = 558 (0x22e), region = 77 }
  0x3d   : > { %v4490_v0 = vld [vmem:[%s5771_s3] sm:$0xff]   ;;  %s3761_s22 = sshll.u32 %s4755_s30, 5  ;;  %v4491_v1 = vld [vmem:[%s5771_s3 + $0x8] sm:$0xff]   ;;  %v4492_v2 = vld [vmem:[%s5771_s3 + $0x10] sm:$0xff]   ;;  %s836_s14 = sand.u32 1, %s4684_s27  }
  0x3e   : > { %p887_p8 = scmp.lt.s32.totalorder %s3761_s22, 63  ;;  %4210 = vmatprep.subr.bf16.mxu0 %v4490_v0  ;;  %4450 = vmatprep.subr.bf16.mxu1 %v4490_v0  ;;  %v4493_v3 = vld [vmem:[%s5771_s3 + $0x18] sm:$0xff]   ;;  %v4494_v6 = vld [vmem:[%s5771_s3 + $0x20] sm:$0xff]   ;;  %v4495_v7 = vld [vmem:[%s5771_s3 + $0x28] sm:$0xff]   ;;  %s3760_s17 = sshll.u32 %s836_s14, 9 }
  0x3f   : > { %4211 = vmatpush3.bf16.msra.mxu0 %v4490_v0  ;;  %4458 = vmatpush3.bf16.msra.mxu1 %v4490_v0  ;;  %v4496_v8 = vld [vmem:[%s5771_s3 + $0x30] sm:$0xff]   ;;  %v4497_v9 = vld [vmem:[%s5771_s3 + $0x38] sm:$0xff]   ;;  %v4502_v10 = vld [vmem:[%s5772_s4 + $0x40] sm:$0xff]   ;;  %p892_p9 = scmp.lt.s32.totalorder %s4755_s30, 1 }
  0x40   : > { %s5833_s22 = smov (!%p887_p8, %s3761_s22), 63  ;;  %4212 = vmatprep.subr.bf16.mxu0 %v4491_v1  ;;  %4451 = vmatprep.subr.bf16.mxu1 %v4491_v1  ;;  %v4956_v13 = vld [vmem:[%s5770_s2] sm:$0xff]   ;;  %v4505_v15 = vld [vmem:[%s5772_s4 + $0x48] sm:$0xff]   ;;  %v4512_v20 = vld [vmem:[%s5772_s4 + $0x50] sm:$0xff]  }
  0x41   : > { %s3762_s29 = sshll.u32 %s5833_s22, 2  ;;  %v4504_v14 = vld [vmem:[%s5772_s4] sm:$0xff]   ;;  %v4967_v16 = vld [vmem:[%s5770_s2 + $0x8] sm:$0xff]   ;;  %v4993_v23 = vld [vmem:[%s5770_s2 + $0x10] sm:$0xff]   ;;  %s5835_s30 = smov (!%p892_p9, %s4755_s30), 1 }
  0x42   : > { %s4922_s13 = scalar_lea.vmem %s5769_s1, %s3762_s29  ;;  %v4507_v19 = vld [vmem:[%s5772_s4 + $0x8] sm:$0xff]   ;;  %v4514_v24 = vld [vmem:[%s5772_s4 + $0x10] sm:$0xff]   ;;  %v4515_v25 = vld [vmem:[%s5772_s4 + $0x58] sm:$0xff]   ;;  %s5053_s29 = scalar_lea.vmem [#allocation2], %s3760_s17 }
  0x43   : > { %4213 = vmatpush3.bf16.msra.mxu0 %v4491_v1  ;;  %4459 = vmatpush3.bf16.msra.mxu1 %v4491_v1  ;;  %v4928_v4 = vld [vmem:[%s4922_s13] sm:$0xff]   ;;  %v4948_v11 = vld [vmem:[%s4922_s13 + $0x8] sm:$0xff]   ;;  %v4971_v17 = vld [vmem:[%s4922_s13 + $0x10] sm:$0xff]  }
  0x44   : > { %4214 = vmatprep.subr.bf16.mxu0 %v4492_v2  ;;  %4452 = vmatprep.subr.bf16.mxu1 %v4492_v2  ;;  %v4499_v5 = vld [vmem:[%s4922_s13 + $0x40] sm:$0xff]   ;;  %v4951_v12 = vld [vmem:[%s4922_s13 + $0x48] sm:$0xff]   ;;  %v4974_v18 = vld [vmem:[%s4922_s13 + $0x50] sm:$0xff]  }
  0x45   : > { %4226 = vmatprep.mubr.bf16.mxu0 %v4928_v4  ;;  %4242 = vmatprep.mubr.bf16.mxu1 %v4499_v5  ;;  %v4987_v21 = vld [vmem:[%s4922_s13 + $0x18] sm:$0xff]   ;;  %v5012_v27 = vld [vmem:[%s4922_s13 + $0x20] sm:$0xff]   ;;  %v5025_v31 = vld [vmem:[%s4922_s13 + $0x28] sm:$0xff]  }
  0x46   : > { %v4511_v22 = vld [vmem:[%s4922_s13 + $0x58] sm:$0xff]   ;;  %v4519_v28 = vld [vmem:[%s4922_s13 + $0x60] sm:$0xff]   ;;  %v4521_v32 = vld [vmem:[%s4922_s13 + $0x68] sm:$0xff]  }
  0x47   : > { %4215 = vmatpush3.bf16.msra.mxu0 %v4492_v2  ;;  %4460 = vmatpush3.bf16.msra.mxu1 %v4492_v2  ;;  %v5007_v26 = vld [vmem:[%s5770_s2 + $0x18] sm:$0xff]   ;;  %v4522_v30 = vld [vmem:[%s5772_s4 + $0x60] sm:$0xff]   ;;  %v4525_v35 = vld [vmem:[%s5772_s4 + $0x68] sm:$0xff]  }
  0x48   : > { %4216 = vmatprep.subr.bf16.mxu0 %v4493_v3  ;;  %4453 = vmatprep.subr.bf16.mxu1 %v4493_v3  ;;  %v4517_v29 = vld [vmem:[%s5772_s4 + $0x18] sm:$0xff]   ;;  %v5031_v33 = vld [vmem:[%s5770_s2 + $0x20] sm:$0xff]   ;;  %v5043_v36 = vld [vmem:[%s5770_s2 + $0x28] sm:$0xff]  }
  0x49   : > { %v4524_v34 = vld [vmem:[%s5772_s4 + $0x20] sm:$0xff]   ;;  %v5047_v37 = vld [vmem:[%s4922_s13 + $0x30] sm:$0xff]   ;;  %v5072_v47 = vld [vmem:[%s5053_s29 + $0x8] sm:$0xff]  }
  0x4a   : > { %v5050_v38 = vld [vmem:[%s4922_s13 + $0x70] sm:$0xff]   ;;  %v5056_v39 = vld [vmem:[%s5053_s29] sm:$0xff]   ;;  %v5075_v48 = vld [vmem:[%s5053_s29 + $0x88] sm:$0xff]   ;;  %v1395_v60 = vunpack.c.l.bf16 %v5072_v47  ;;  %v1396_v61 = vunpack.c.h.bf16 %v5072_v47 }
  0x4b   : > { %4217 = vmatpush3.bf16.msra.mxu0 %v4493_v3  ;;  %4461 = vmatpush3.bf16.msra.mxu1 %v4493_v3  ;;  %v5059_v40 = vld [vmem:[%s5053_s29 + $0x80] sm:$0xff]   ;;  %v1393_v43 = vunpack.c.l.bf16 %v5056_v39  ;;  %v1394_v44 = vunpack.c.h.bf16 %v5056_v39  ;;  %v5081_v51 = vld [vmem:[%s5053_s29 + $0x108] sm:$0xff]   ;;  %v4532_v58 = vld [vmem:[%s5772_s4 + $0x70] sm:$0xff]   ;;  %v1427_v62 = vunpack.c.l.bf16 %v5075_v48  ;;  %v1428_v63 = vunpack.c.h.bf16 %v5075_v48 }
  0x4c   : > { %4218 = vmatprep.subr.bf16.mxu0 %v4494_v6  ;;  %4454 = vmatprep.subr.bf16.mxu1 %v4494_v6  ;;  %v5062_v41 = vld [vmem:[%s5053_s29 + $0x100] sm:$0xff]   ;;  %v1425_v45 = vunpack.c.l.bf16 %v5059_v40  ;;  %v1426_v46 = vunpack.c.h.bf16 %v5059_v40  ;;  %v4527_v52 = vld [vmem:[%s5772_s4 + $0x28] sm:$0xff]   ;;  %v5099_v59 = vld [vmem:[%s5770_s2 + $0x30] sm:$0xff]   ;;  %v1491_v3 = vunpack.c.l.bf16 %v5081_v51  ;;  %v1492_v5 = vunpack.c.h.bf16 %v5081_v51 }
  0x4d   : > { %v5065_v42 = vld [vmem:[%s5053_s29 + $0x180] sm:$0xff]   ;;  %v1489_v49 = vunpack.c.l.bf16 %v5062_v41  ;;  %v1490_v50 = vunpack.c.h.bf16 %v5062_v41  ;;  %v5090_v57 = vld [vmem:[%s5053_s29 + $0x188] sm:$0xff]   ;;  %v5106_v0 = vld [vmem:[%s5053_s29 + $0x10] sm:$0xff]  }
  0x4e   : > { %v1457_v53 = vadd.f32 %v1425_v45, %v1393_v43  ;;  %v1458_v54 = vadd.f32 %v1426_v46, %v1394_v44  ;;  %v1553_v55 = vunpack.c.l.bf16 %v5065_v42  ;;  %v1554_v56 = vunpack.c.h.bf16 %v5065_v42  ;;  %v5141_v45 = vld [vmem:[%s5053_s29 + $0x98] sm:$0xff]  }
  0x4f   : > { %4219 = vmatpush3.bf16.msra.mxu0 %v4494_v6  ;;  %4462 = vmatpush3.bf16.msra.mxu1 %v4494_v6  ;;  %v5113_v6 = vld [vmem:[%s5053_s29 + $0x90] sm:$0xff]  }
  0x50   : > { %4220 = vmatprep.subr.bf16.mxu0 %v4495_v7  ;;  %4455 = vmatprep.subr.bf16.mxu1 %v4495_v7  ;;  %v1521_v1 = vadd.f32 %v1489_v49, %v1457_v53  ;;  %v1522_v2 = vadd.f32 %v1490_v50, %v1458_v54  ;;  %v1430_v44 = vunpack.c.h.bf16 %v5113_v6  ;;  %v5146_v50 = vld [vmem:[%s5053_s29 + $0x18] sm:$0xff]   ;;  %v5152_v53 = vld [vmem:[%s5053_s29 + $0x190] sm:$0xff]  }
  0x51   : > { %v4537_v54 = vld [vmem:[%s5772_s4 + $0x38] sm:$0xff]  }
  0x53   : > { %4221 = vmatpush3.bf16.msra.mxu0 %v4495_v7  ;;  %4463 = vmatpush3.bf16.msra.mxu1 %v4495_v7  ;;  %v5116_v7 = vld [vmem:[%s4922_s13 + $0x38] sm:$0xff]  }
  0x54   : > { %4222 = vmatprep.subr.bf16.mxu0 %v4496_v8  ;;  %4456 = vmatprep.subr.bf16.mxu1 %v4496_v8 }
  0x57   : > { %4223 = vmatpush3.bf16.msra.mxu0 %v4496_v8  ;;  %4464 = vmatpush3.bf16.msra.mxu1 %v4496_v8  ;;  %v5119_v8 = vld [vmem:[%s4922_s13 + $0x78] sm:$0xff]  }
  0x58   : > { %4224 = vmatprep.subr.bf16.mxu0 %v4497_v9  ;;  %4457 = vmatprep.subr.bf16.mxu1 %v4497_v9 }
  0x5b   : > { %4225 = vmatpush3.bf16.msra.mxu0 %v4497_v9  ;;  %4465 = vmatpush3.bf16.msra.mxu1 %v4497_v9  ;;  %v1459_v9 = vadd.f32 %v1427_v62, %v1395_v60  ;;  %v1399_v60 = vunpack.c.l.bf16 %v5146_v50 }
  0x5c   : > { %4002 = vmatprep.subr.bf16.mxu1 %v4502_v10  ;;  %4258 = vmatprep.subr.bf16.mxu0 %v4956_v13  ;;  %v1460_v10 = vadd.f32 %v1428_v63, %v1396_v61  ;;  %v1400_v63 = vunpack.c.h.bf16 %v5146_v50 }
  0x5e   : > { %4227 = vmatmul.mubr.bf16.vlgmr.msra.gmra.mrb[0].mxu0 %v4948_v11  ;;  %4243 = vmatmul.mubr.bf16.vlgmr.msra.gmra.mrb[0].mxu1 %v4951_v12 }
  0x5f   : > { %4003 = vmatpush3.bf16.msra.mxu1 %v4504_v14  ;;  %4259 = vmatpush3.bf16.msra.mxu0 %v4956_v13  ;;  %v1555_v14 = vunpack.c.l.bf16 %v5090_v57 }
  0x60   : > { %4004 = vmatprep.subr.bf16.mxu1 %v4505_v15  ;;  %4260 = vmatprep.subr.bf16.mxu0 %v4967_v16  ;;  %v1556_v15 = vunpack.c.h.bf16 %v5090_v57 }
  0x61   : > { %4230 = vmatprep.mubr.bf16.mxu0 %v4971_v17  ;;  %4246 = vmatprep.mubr.bf16.mxu1 %v4974_v18 }
  0x63   : > { %4005 = vmatpush3.bf16.msra.mxu1 %v4507_v19  ;;  %4261 = vmatpush3.bf16.msra.mxu0 %v4967_v16  ;;  %v4534_v19 = vld [vmem:[%s5772_s4 + $0x30] sm:$0xff]  }
  0x64   : > { %4006 = vmatprep.subr.bf16.mxu1 %v4512_v20  ;;  %4262 = vmatprep.subr.bf16.mxu0 %v4993_v23  ;;  %v1585_v20 = vadd.f32 %v1553_v55, %v1521_v1  ;;  %v1431_v1 = vunpack.c.l.bf16 %v5141_v45 }
  0x66   : > { %4231 = vmatmul.mubr.bf16.gmra.mrb[4].mxu0 %v4987_v21  ;;  %4247 = vmatmul.mubr.bf16.gmra.mrb[4].mxu1 %v4511_v22  ;;  %v1586_v22 = vadd.f32 %v1554_v56, %v1522_v2  ;;  %v1432_v2 = vunpack.c.h.bf16 %v5141_v45 }
  0x67   : > { %4007 = vmatpush3.bf16.msra.mxu1 %v4514_v24  ;;  %4263 = vmatpush3.bf16.msra.mxu0 %v4993_v23  ;;  %v1397_v24 = vunpack.c.l.bf16 %v5106_v0 }
  0x68   : > { %4008 = vmatprep.subr.bf16.mxu1 %v4515_v25  ;;  %4264 = vmatprep.subr.bf16.mxu0 %v5007_v26  ;;  %v4535_v25 = vld [vmem:[%s5772_s4 + $0x78] sm:$0xff]   ;;  %v1618_v43 = vmul.f32 0.25, %v1586_v22  ;;  %v5175_v22 = vld [vmem:[%s5053_s29 + $0xa0] sm:$0xff]  }
  0x69   : > { %4234 = vmatprep.mubr.bf16.mxu0 %v5012_v27  ;;  %4250 = vmatprep.mubr.bf16.mxu1 %v4519_v28  ;;  %v5135_v28 = vld [vmem:[%s5770_s2 + $0x38] sm:$0xff]  }
  0x6b   : > { %4009 = vmatpush3.bf16.msra.mxu1 %v4517_v29  ;;  %4265 = vmatpush3.bf16.msra.mxu0 %v5007_v26  ;;  %v1523_v29 = vadd.f32 %v1491_v3, %v1459_v9  ;;  %v1557_v9 = vunpack.c.l.bf16 %v5152_v53 }
  0x6c   : > { %4010 = vmatprep.subr.bf16.mxu1 %v4522_v30  ;;  %4266 = vmatprep.subr.bf16.mxu0 %v5031_v33  ;;  %v1524_v30 = vadd.f32 %v1492_v5, %v1460_v10  ;;  %v1558_v10 = vunpack.c.h.bf16 %v5152_v53 }
  0x6d   : > { %v1587_v46 = vadd.f32 %v1555_v14, %v1523_v29 }
  0x6e   : > { %4235 = vmatmul.mubr.bf16.gmra.mrb[8].mxu0 %v5025_v31  ;;  %4251 = vmatmul.mubr.bf16.gmra.mrb[8].mxu1 %v4521_v32  ;;  %v1398_v32 = vunpack.c.h.bf16 %v5106_v0  ;;  %v1588_v49 = vadd.f32 %v1556_v15, %v1524_v30  ;;  %v1270_v30 = vld [vmem:[%s5053_s29 + $0x20] sm:$0xff]  }
  0x6f   : > { %4011 = vmatpush3.bf16.msra.mxu1 %v4524_v34  ;;  %4267 = vmatpush3.bf16.msra.mxu0 %v5031_v33  ;;  %v1429_v34 = vunpack.c.l.bf16 %v5113_v6  ;;  %v1619_v61 = vmul.f32 0.25, %v1587_v46 }
  0x70   : > { %4012 = vmatprep.subr.bf16.mxu1 %v4525_v35  ;;  %4268 = vmatprep.subr.bf16.mxu0 %v5043_v36  ;;  %v1617_v35 = vmul.f32 0.25, %v1585_v20  ;;  %v1620_v62 = vmul.f32 0.25, %v1588_v49  ;;  %v1463_v20 = vadd.f32 %v1431_v1, %v1399_v60  ;;  %v1433_v49 = vunpack.c.l.bf16 %v5175_v22 }
  0x71   : > { %4238 = vmatprep.mubr.bf16.mxu0 %v5047_v37  ;;  %4254 = vmatprep.mubr.bf16.mxu1 %v5050_v38  ;;  %v1461_v56 = vadd.f32 %v1429_v34, %v1397_v24  ;;  %v1464_v24 = vadd.f32 %v1432_v2, %v1400_v63  ;;  %v1401_v34 = vunpack.c.l.bf16 %v1270_v30  ;;  %v5199_v63 = vld [vmem:[%s5053_s29 + $0xa8] sm:$0xff]  }
  0x72   : > { %v1649_v55 = vpack.c.bf16 %v1618_v43, %v1617_v35  ;;  %v1402_v35 = vunpack.c.h.bf16 %v1270_v30 }
  0x73   : > { %4013 = vmatpush3.bf16.msra.mxu1 %v4527_v52  ;;  %4269 = vmatpush3.bf16.msra.mxu0 %v5043_v36  ;;  %v5149_v52 = vld [vmem:[%s5053_s29 + $0x110] sm:$0xff]  }
  0x74   : > { %4014 = vmatprep.subr.bf16.mxu1 %v4532_v58  ;;  %4270 = vmatprep.subr.bf16.mxu0 %v5099_v59  ;;  %v1462_v58 = vadd.f32 %v1430_v44, %v1398_v32  ;;  %v1493_v3 = vunpack.c.l.bf16 %v5149_v52  ;;  %v1494_v5 = vunpack.c.h.bf16 %v5149_v52  ;;  %v5179_v32 = vld [vmem:[%s5053_s29 + $0x198] sm:$0xff]  }
  0x76   : > { %4239 = vmatmul.mubr.bf16.gmra.mrb[12].mxu0 %v5116_v7  ;;  %4255 = vmatmul.mubr.bf16.gmra.mrb[12].mxu1 %v5119_v8  ;;  %v1525_v14 = vadd.f32 %v1493_v3, %v1461_v56  ;;  %v1526_v15 = vadd.f32 %v1494_v5, %v1462_v58  ;;  %v1560_v56 = vunpack.c.h.bf16 %v5179_v32  ;;  %v1272_v3 = vld [vmem:[%s5053_s29 + $0x28] sm:$0xff]   ;;  %v5205_v5 = vld [vmem:[%s5053_s29 + $0x1a0] sm:$0xff]  }
  0x77   : > { %4015 = vmatpush3.bf16.msra.mxu1 %v4534_v19  ;;  %4271 = vmatpush3.bf16.msra.mxu0 %v5099_v59  ;;  %v5170_v19 = vld [vmem:[%s5053_s29 + $0x118] sm:$0xff]   ;;  %5797 = vst [vmem:[#allocation3_spill] sm:$0xff] %v5205_v5 }
  0x78   : > { %4016 = vmatprep.subr.bf16.mxu1 %v4535_v25  ;;  %4272 = vmatprep.subr.bf16.mxu0 %v5135_v28  ;;  %v1589_v25 = vadd.f32 %v1557_v9, %v1525_v14  ;;  %v1590_v29 = vadd.f32 %v1558_v10, %v1526_v15  ;;  %v1495_v43 = vunpack.c.l.bf16 %v5170_v19  ;;  %v1403_v9 = vunpack.c.l.bf16 %v1272_v3 }
  0x79   : > { %1825 = vmatprep.mubr.bf16.mxu1 %v1649_v55  ;;  %4274 = vmatprep.mubr.bf16.mxu0 %v5056_v39  ;;  %v1650_v39 = vpack.c.bf16 %v1620_v62, %v1619_v61  ;;  %v1559_v55 = vunpack.c.l.bf16 %v5179_v32  ;;  %v5195_v61 = vld [vmem:[%s5053_s29 + $0x120] sm:$0xff]   ;;  %v1465_v62 = vadd.f32 %v1433_v49, %v1401_v34  ;;  %v1404_v10 = vunpack.c.h.bf16 %v1272_v3 }
  0x7a   : > { %v1621_v44 = vmul.f32 0.25, %v1589_v25  ;;  %v1622_v46 = vmul.f32 0.25, %v1590_v29  ;;  %v1497_v14 = vunpack.c.l.bf16 %v5195_v61  ;;  %v1435_v15 = vunpack.c.l.bf16 %v5199_v63  ;;  %v1274_v29 = vld [vmem:[%s5053_s29 + $0x30] sm:$0xff]  }
  0x7b   : > { %4017 = vmatpush3.bf16.msra.mxu1 %v4537_v54  ;;  %4273 = vmatpush3.bf16.msra.mxu0 %v5135_v28  ;;  %v1496_v54 = vunpack.c.h.bf16 %v5170_v19 }
  0x7c   : > { %4354 = vmatprep.subr.bf16.mxu1 %v4956_v13  ;;  %4306 = vmatprep.subr.bf16.mxu0 %v4956_v13  ;;  %v1529_v34 = vadd.f32 %v1497_v14, %v1465_v62  ;;  %v1276_v14 = vld [vmem:[%s5053_s29 + $0x38] sm:$0xff]  }
  0x7d   : > { %v1528_v58 = vadd.f32 %v1496_v54, %v1464_v24  ;;  %v1498_v24 = vunpack.c.h.bf16 %v5195_v61 }
  0x7e   : > { %1826 = vmatmul.mubr.bf16.vlgmr.msra.gmra.mrb[16].mxu1 %v4928_v4  ;;  %4275 = vmatmul.mubr.bf16.vlgmr.msra.gmra.mrb[16].mxu0 %v5072_v47  ;;  %v1434_v4 = vunpack.c.h.bf16 %v5175_v22  ;;  %v1527_v47 = vadd.f32 %v1495_v43, %v1463_v20  ;;  %v5220_v43 = vld [vmem:[%s5053_s29 + $0x128] sm:$0xff]  }
  0x7f   : > { %4355 = vmatpush3.bf16.msra.mxu1 %v4956_v13  ;;  %4307 = vmatpush3.bf16.msra.mxu0 %v4956_v13  ;;  %v1592_v1 = vadd.f32 %v1560_v56, %v1528_v58  ;;  %5798 = vst [vmem:[#allocation4_spill] sm:$0xff] %v5220_v43  ;;  %v1500_v56 = vunpack.c.h.bf16 %v5220_v43  ;;  %v1405_v58 = vunpack.c.l.bf16 %v1274_v29 }
  0x80   : > { %1833 = vmatprep.mubr.bf16.mxu1 %v1650_v39  ;;  %4278 = vmatprep.mubr.bf16.mxu0 %v5106_v0  ;;  %v1591_v60 = vadd.f32 %v1559_v55, %v1527_v47  ;;  %v1651_v0 = vpack.c.bf16 %v1622_v46, %v1621_v44  ;;  %v1466_v2 = vadd.f32 %v1434_v4, %v1402_v35  ;;  %v1436_v39 = vunpack.c.h.bf16 %v5199_v63  ;;  %v5225_v46 = vld [vmem:[%s5053_s29 + $0xb0] sm:$0xff]   ;;  %v5228_v47 = vld [vmem:[%s5053_s29 + $0x1a8] sm:$0xff]  }
  0x81   : > { %4308 = vmatprep.subr.bf16.mxu0 %v4967_v16  ;;  %4356 = vmatprep.subr.bf16.mxu1 %v4967_v16  ;;  %v1624_v25 = vmul.f32 0.25, %v1592_v1  ;;  %v1561_v35 = vunpack.c.l.bf16 %v5205_v5  ;;  %5799 = vst [vmem:[#allocation5_spill] sm:$0xff] %v5228_v47  ;;  %v1499_v55 = vunpack.c.l.bf16 %v5220_v43  ;;  %v1438_v62 = vunpack.c.h.bf16 %v5225_v46 }
  0x82   : > { %v1623_v20 = vmul.f32 0.25, %v1591_v60  ;;  %v1468_v44 = vadd.f32 %v1436_v39, %v1404_v10  ;;  %v1406_v60 = vunpack.c.h.bf16 %v1274_v29  ;;  %v1564_v10 = vunpack.c.h.bf16 %v5228_v47 }
  0x83   : > { %4309 = vmatpush3.bf16.msra.mxu0 %v4967_v16  ;;  %4357 = vmatpush3.bf16.msra.mxu1 %v4967_v16  ;;  %v1593_v54 = vadd.f32 %v1561_v35, %v1529_v34 }
  0x84   : > { %4310 = vmatprep.subr.bf16.mxu0 %v4993_v23  ;;  %4358 = vmatprep.subr.bf16.mxu1 %v4993_v23  ;;  %v1652_v49 = vpack.c.bf16 %v1624_v25, %v1623_v20  ;;  %v5243_v20 = vld [vmem:[%s5053_s29 + $0x40] sm:$0xff]   ;;  %v5253_v25 = vld [vmem:[%s5053_s29 + $0xb8] sm:$0xff]  }
  0x86   : > { %1834 = vmatmul.mubr.bf16.gmra.mrb[20].mxu1 %v4948_v11  ;;  %4279 = vmatmul.mubr.bf16.gmra.mrb[20].mxu0 %v5146_v50  ;;  %v1562_v11 = vunpack.c.h.bf16 %v5205_v5  ;;  %v1530_v50 = vadd.f32 %v1498_v24, %v1466_v2  ;;  %v1532_v2 = vadd.f32 %v1500_v56, %v1468_v44  ;;  %v5247_v24 = vld [vmem:[%s5053_s29 + $0x130] sm:$0xff]   ;;  %v1407_v44 = vunpack.c.l.bf16 %v1276_v14 }
  0x87   : > { %1841 = vmatprep.mubr.bf16.mxu1 %v1651_v0  ;;  %4282 = vmatprep.mubr.bf16.mxu0 %v1270_v30  ;;  %v1467_v30 = vadd.f32 %v1435_v15, %v1403_v9  ;;  %v1437_v0 = vunpack.c.l.bf16 %v5225_v46  ;;  %v1563_v9 = vunpack.c.l.bf16 %v5228_v47  ;;  %v1625_v15 = vmul.f32 0.25, %v1593_v54  ;;  %5800 = vst [vmem:[#allocation6_spill] sm:$0xff] %v5247_v24 }
  0x88   : > { %4311 = vmatpush3.bf16.msra.mxu0 %v4993_v23  ;;  %4359 = vmatpush3.bf16.msra.mxu1 %v4993_v23  ;;  %v1594_v4 = vadd.f32 %v1562_v11, %v1530_v50  ;;  %v1596_v34 = vadd.f32 %v1564_v10, %v1532_v2  ;;  %v1501_v11 = vunpack.c.l.bf16 %v5247_v24  ;;  %v1502_v50 = vunpack.c.h.bf16 %v5247_v24  ;;  %v5277_v2 = vld [vmem:[%s5053_s29 + $0x50] sm:$0xff]   ;;  %v5342_v24 = vld [vmem:[%s5053_s29 + $0x1c8] sm:$0xff]  }
  0x89   : > { %4312 = vmatprep.subr.bf16.mxu0 %v5007_v26  ;;  %4360 = vmatprep.subr.bf16.mxu1 %v5007_v26  ;;  %v1531_v1 = vadd.f32 %v1499_v55, %v1467_v30  ;;  %v5259_v30 = vld [vmem:[%s5053_s29 + $0x1b0] sm:$0xff]   ;;  %v1408_v54 = vunpack.c.h.bf16 %v1276_v14  ;;  %5807 = vst [vmem:[#allocation13_spill] sm:$0xff] %v5342_v24 }
  0x8a   : > { %v1626_v39 = vmul.f32 0.25, %v1594_v4  ;;  %5801 = vst [vmem:[#allocation7_spill] sm:$0xff] %v5259_v30  ;;  %v1440_v4 = vunpack.c.h.bf16 %v5253_v25  ;;  %v1628_v56 = vmul.f32 0.25, %v1596_v34  ;;  %v5289_v34 = vld [vmem:[%s5053_s29 + $0x1b8] sm:$0xff]  }
  0x8b   : > { %5803 = vst [vmem:[#allocation9_spill] sm:$0xff] %v5289_v34 }
  0x8c   : > { %4313 = vmatpush3.bf16.msra.mxu0 %v5007_v26  ;;  %4361 = vmatpush3.bf16.msra.mxu1 %v5007_v26  ;;  %v1653_v35 = vpack.c.bf16 %v1626_v39, %v1625_v15  ;;  %v1472_v10 = vadd.f32 %v1440_v4, %v1408_v54  ;;  %v1567_v4 = vunpack.c.l.bf16 %v5289_v34 }
  0x8d   : > { %4314 = vmatprep.subr.bf16.mxu0 %v5031_v33  ;;  %4362 = vmatprep.subr.bf16.mxu1 %v5031_v33 }
  0x8e   : > { %1842 = vmatmul.mubr.bf16.gmra.mrb[24].mxu1 %v4971_v17  ;;  %4283 = vmatmul.mubr.bf16.gmra.mrb[24].mxu0 %v1272_v3  ;;  %v1469_v17 = vadd.f32 %v1437_v0, %v1405_v58  ;;  %v1470_v3 = vadd.f32 %v1438_v62, %v1406_v60  ;;  %v5269_v58 = vld [vmem:[%s5053_s29 + $0x48] sm:$0xff]   ;;  %v1565_v62 = vunpack.c.l.bf16 %v5259_v30 }
  0x8f   : > { %1849 = vmatprep.mubr.bf16.mxu1 %v1652_v49  ;;  %4286 = vmatprep.mubr.bf16.mxu0 %v1274_v29  ;;  %v1595_v29 = vadd.f32 %v1563_v9, %v1531_v1  ;;  %v1439_v49 = vunpack.c.l.bf16 %v5253_v25  ;;  %v1566_v1 = vunpack.c.h.bf16 %v5259_v30 }
  0x90   : > { %4315 = vmatpush3.bf16.msra.mxu0 %v5031_v33  ;;  %4363 = vmatpush3.bf16.msra.mxu1 %v5031_v33  ;;  %v1533_v60 = vadd.f32 %v1501_v11, %v1469_v17  ;;  %v1534_v0 = vadd.f32 %v1502_v50, %v1470_v3  ;;  %v1410_v11 = vunpack.c.h.bf16 %v5243_v20 }
  0x91   : > { %4316 = vmatprep.subr.bf16.mxu0 %v5043_v36  ;;  %4364 = vmatprep.subr.bf16.mxu1 %v5043_v36  ;;  %v1627_v55 = vmul.f32 0.25, %v1595_v29  ;;  %v1471_v9 = vadd.f32 %v1439_v49, %v1407_v44 }
  0x92   : > { %v1597_v3 = vadd.f32 %v1565_v62, %v1533_v60  ;;  %v1598_v29 = vadd.f32 %v1566_v1, %v1534_v0  ;;  %v5307_v0 = vld [vmem:[%s5053_s29 + $0x60] sm:$0xff]  }
  0x93   : > { %v1654_v17 = vpack.c.bf16 %v1628_v56, %v1627_v55  ;;  %v1568_v55 = vunpack.c.h.bf16 %v5289_v34  ;;  %v5310_v62 = vld [vmem:[%s5053_s29 + $0x140] sm:$0xff]  }
  0x94   : > { %4317 = vmatpush3.bf16.msra.mxu0 %v5043_v36  ;;  %4365 = vmatpush3.bf16.msra.mxu1 %v5043_v36  ;;  %v1629_v56 = vmul.f32 0.25, %v1597_v3  ;;  %v1630_v60 = vmul.f32 0.25, %v1598_v29  ;;  %5804 = vst [vmem:[#allocation10_spill] sm:$0xff] %v5310_v62  ;;  %v1506_v34 = vunpack.c.h.bf16 %v5310_v62  ;;  %v1411_v3 = vunpack.c.l.bf16 %v5269_v58 }
  0x95   : > { %4318 = vmatprep.subr.bf16.mxu0 %v5099_v59  ;;  %4366 = vmatprep.subr.bf16.mxu1 %v5099_v59 }
  0x96   : > { %1850 = vmatmul.mubr.bf16.gmra.mrb[28].mxu1 %v4987_v21  ;;  %4287 = vmatmul.mubr.bf16.gmra.mrb[28].mxu0 %v1276_v14  ;;  %v5274_v21 = vld [vmem:[%s5053_s29 + $0x138] sm:$0xff]   ;;  %v5284_v14 = vld [vmem:[%s5053_s29 + $0xc0] sm:$0xff]  }
  0x97   : > { %1857 = vmatprep.mubr.bf16.mxu1 %v1653_v35  ;;  %4290 = vmatprep.mubr.bf16.mxu0 %v5243_v20  ;;  %5802 = vst [vmem:[#allocation8_spill] sm:$0xff] %v5274_v21  ;;  %v1503_v15 = vunpack.c.l.bf16 %v5274_v21  ;;  %v1504_v39 = vunpack.c.h.bf16 %v5274_v21  ;;  %v1409_v35 = vunpack.c.l.bf16 %v5243_v20  ;;  %v1441_v50 = vunpack.c.l.bf16 %v5284_v14  ;;  %v5304_v20 = vld [vmem:[%s5053_s29 + $0x58] sm:$0xff]   ;;  %v5318_v21 = vld [vmem:[%s5053_s29 + $0x1c0] sm:$0xff]  }
  0x98   : > { %4319 = vmatpush3.bf16.msra.mxu0 %v5099_v59  ;;  %4367 = vmatpush3.bf16.msra.mxu1 %v5099_v59  ;;  %v1442_v44 = vunpack.c.h.bf16 %v5284_v14  ;;  %5805 = vst [vmem:[#allocation11_spill] sm:$0xff] %v5318_v21 }
  0x99   : > { %4320 = vmatprep.subr.bf16.mxu0 %v5135_v28  ;;  %4368 = vmatprep.subr.bf16.mxu1 %v5135_v28  ;;  %v1535_v49 = vadd.f32 %v1503_v15, %v1471_v9  ;;  %v1536_v54 = vadd.f32 %v1504_v39, %v1472_v10  ;;  %v5313_v9 = vld [vmem:[%s5053_s29 + $0xc8] sm:$0xff]   ;;  %v1655_v39 = vpack.c.bf16 %v1630_v60, %v1629_v56  ;;  %v1570_v56 = vunpack.c.h.bf16 %v5318_v21 }
  0x9a   : > { %v1474_v1 = vadd.f32 %v1442_v44, %v1410_v11  ;;  %v1443_v29 = vunpack.c.l.bf16 %v5313_v9  ;;  %v1444_v11 = vunpack.c.h.bf16 %v5313_v9  ;;  %v5336_v60 = vld [vmem:[%s5053_s29 + $0x148] sm:$0xff]  }
  0x9b   : > { %v1599_v10 = vadd.f32 %v1567_v4, %v1535_v49  ;;  %v1600_v15 = vadd.f32 %v1568_v55, %v1536_v54  ;;  %v5328_v49 = vld [vmem:[%s5053_s29 + $0x68] sm:$0xff]   ;;  %v5331_v54 = vld [vmem:[%s5053_s29 + $0x70] sm:$0xff]   ;;  %5806 = vst [vmem:[#allocation12_spill] sm:$0xff] %v5336_v60  ;;  %v1507_v47 = vunpack.c.l.bf16 %v5336_v60 }
  0x9c   : > { %4321 = vmatpush3.bf16.msra.mxu0 %v5135_v28  ;;  %4369 = vmatpush3.bf16.msra.mxu1 %v5135_v28  ;;  %v1538_v55 = vadd.f32 %v1506_v34, %v1474_v1  ;;  %v1508_v34 = vunpack.c.h.bf16 %v5336_v60  ;;  %v5363_v60 = vld [vmem:[%s5053_s29 + $0xd8] sm:$0xff]  }
  0x9d   : > { %4402 = vmatprep.subr.bf16.mxu0 %v4956_v13  ;;  %v1632_v44 = vmul.f32 0.25, %v1600_v15 }
  0x9e   : > { %1858 = vmatmul.mubr.bf16.gmra.mrb[32].mxu1 %v5012_v27  ;;  %4291 = vmatmul.mubr.bf16.gmra.mrb[32].mxu0 %v5269_v58  ;;  %v1473_v27 = vadd.f32 %v1441_v50, %v1409_v35  ;;  %v1412_v35 = vunpack.c.h.bf16 %v5269_v58  ;;  %v1631_v50 = vmul.f32 0.25, %v1599_v10  ;;  %v1569_v58 = vunpack.c.l.bf16 %v5318_v21  ;;  %v5339_v10 = vld [vmem:[%s5053_s29 + $0xd0] sm:$0xff]  }
  0x9f   : > { %1865 = vmatprep.mubr.bf16.mxu1 %v1654_v17  ;;  %4294 = vmatprep.mubr.bf16.mxu0 %v5277_v2  ;;  %v1505_v17 = vunpack.c.l.bf16 %v5310_v62  ;;  %v1602_v30 = vadd.f32 %v1570_v56, %v1538_v55  ;;  %v1445_v1 = vunpack.c.l.bf16 %v5339_v10  ;;  %v5359_v55 = vld [vmem:[%s5053_s29 + $0x150] sm:$0xff]  }
  0xa0   : > { %v1476_v62 = vadd.f32 %v1444_v11, %v1412_v35  ;;  %v1656_v15 = vpack.c.bf16 %v1632_v44, %v1631_v50  ;;  %v1572_v35 = vunpack.c.h.bf16 %v5342_v24  ;;  %v5356_v11 = vld [vmem:[%s5053_s29 + $0x78] sm:$0xff]   ;;  %v1509_v56 = vunpack.c.l.bf16 %v5359_v55 }
  0xa1   : > { %v1537_v4 = vadd.f32 %v1505_v17, %v1473_v27  ;;  %v1413_v27 = vunpack.c.l.bf16 %v5277_v2  ;;  %v1414_v17 = vunpack.c.h.bf16 %v5277_v2  ;;  %v1634_v44 = vmul.f32 0.25, %v1602_v30 }
  0xa2   : > { %v1510_v5 = vunpack.c.h.bf16 %v5359_v55  ;;  %v1415_v30 = vunpack.c.l.bf16 %v5304_v20 }
  0xa6   : > { %1866 = vmatmul.mubr.bf16.gmra.mrb[36].mxu1 %v5025_v31  ;;  %4295 = vmatmul.mubr.bf16.gmra.mrb[36].mxu0 %v5304_v20  ;;  %v1475_v31 = vadd.f32 %v1443_v29, %v1411_v3  ;;  %v1446_v3 = vunpack.c.h.bf16 %v5339_v10  ;;  %v1571_v29 = vunpack.c.l.bf16 %v5342_v24 }
  0xa7   : > { %1873 = vmatprep.mubr.bf16.mxu1 %v1655_v39  ;;  %4298 = vmatprep.mubr.bf16.mxu0 %v5307_v0  ;;  %v1601_v39 = vadd.f32 %v1569_v58, %v1537_v4  ;;  %v1540_v4 = vadd.f32 %v1508_v34, %v1476_v62  ;;  %v1477_v58 = vadd.f32 %v1445_v1, %v1413_v27  ;;  %v1447_v62 = vunpack.c.l.bf16 %v5363_v60 }
  0xa8   : > { %v1539_v2 = vadd.f32 %v1507_v47, %v1475_v31  ;;  %v1416_v47 = vunpack.c.h.bf16 %v5304_v20  ;;  %v1448_v31 = vunpack.c.h.bf16 %v5363_v60 }
  0xa9   : > { %v1633_v50 = vmul.f32 0.25, %v1601_v39  ;;  %v1604_v43 = vadd.f32 %v1572_v35, %v1540_v4  ;;  %v1541_v20 = vadd.f32 %v1509_v56, %v1477_v58  ;;  %v4666_v58 = vld [vmem:[%s4922_s13 + $0x40] sm:$0xff]  }
  0xaa   : > { %v1603_v24 = vadd.f32 %v1571_v29, %v1539_v2  ;;  %v1479_v29 = vadd.f32 %v1447_v62, %v1415_v30  ;;  %v1480_v35 = vadd.f32 %v1448_v31, %v1416_v47 }
  0xab   : > { %v1657_v21 = vpack.c.bf16 %v1634_v44, %v1633_v50  ;;  %v1636_v1 = vmul.f32 0.25, %v1604_v43  ;;  %v1417_v43 = vunpack.c.l.bf16 %v5307_v0 }
  0xac   : > { %v1635_v27 = vmul.f32 0.25, %v1603_v24 }
  0xae   : > { %1874 = vmatmul.mubr.bf16.gmra.mrb[40].mxu1 %v5047_v37  ;;  %4299 = vmatmul.mubr.bf16.gmra.mrb[40].mxu0 %v5328_v49  ;;  %v1478_v37 = vadd.f32 %v1446_v3, %v1414_v17  ;;  %v5379_v3 = vld [vmem:[%s5053_s29 + $0x158] sm:$0xff]   ;;  %v1658_v44 = vpack.c.bf16 %v1636_v1, %v1635_v27 }
  0xaf   : > { %1881 = vmatprep.mubr.bf16.mxu1 %v1656_v15  ;;  %4302 = vmatprep.mubr.bf16.mxu0 %v5331_v54  ;;  %v5366_v15 = vld [vmem:[%s5053_s29 + $0x1d0] sm:$0xff]   ;;  %v1511_v50 = vunpack.c.l.bf16 %v5379_v3 }
  0xb0   : > { %5808 = vst [vmem:[#allocation14_spill] sm:$0xff] %v5366_v15  ;;  %v1573_v39 = vunpack.c.l.bf16 %v5366_v15  ;;  %v1574_v34 = vunpack.c.h.bf16 %v5366_v15  ;;  %v1542_v17 = vadd.f32 %v1510_v5, %v1478_v37  ;;  %v5386_v15 = vld [vmem:[%s5053_s29 + $0x1d8] sm:$0xff]   ;;  %v1418_v5 = vunpack.c.h.bf16 %v5307_v0  ;;  %v5401_v0 = vld [vmem:[%s5053_s29 + $0x160] sm:$0xff]  }
  0xb1   : > { %v1543_v37 = vadd.f32 %v1511_v50, %v1479_v29  ;;  %v1575_v56 = vunpack.c.l.bf16 %v5386_v15  ;;  %v1576_v31 = vunpack.c.h.bf16 %v5386_v15  ;;  %v1514_v29 = vunpack.c.h.bf16 %v5401_v0 }
  0xb2   : > { %v1605_v2 = vadd.f32 %v1573_v39, %v1541_v20  ;;  %v1606_v4 = vadd.f32 %v1574_v34, %v1542_v17  ;;  %v5404_v34 = vld [vmem:[%s5053_s29 + $0xe8] sm:$0xff]   ;;  %v5408_v20 = vld [vmem:[%s5053_s29 + $0x1e0] sm:$0xff]   ;;  %v1513_v17 = vunpack.c.l.bf16 %v5401_v0  ;;  %v1420_v50 = vunpack.c.h.bf16 %v5328_v49 }
  0xb3   : > { %v1607_v27 = vadd.f32 %v1575_v56, %v1543_v37 }
  0xb4   : > { %v1637_v30 = vmul.f32 0.25, %v1605_v2  ;;  %v1638_v47 = vmul.f32 0.25, %v1606_v4  ;;  %v1578_v2 = vunpack.c.h.bf16 %v5408_v20 }
  0xb5   : > { %v1639_v4 = vmul.f32 0.25, %v1607_v27 }
  0xb6   : > { %1882 = vmatmul.mubr.bf16.gmra.mrb[44].mxu1 %v5116_v7  ;;  %4303 = vmatmul.mubr.bf16.gmra.mrb[44].mxu0 %v5356_v11  ;;  %v5382_v7 = vld [vmem:[%s5053_s29 + $0xe0] sm:$0xff]  }
  0xb7   : > { %1889 = vmatprep.mubr.bf16.mxu1 %v1657_v21  ;;  %4322 = vmatprep.mubr.bf16.mxu0 %v5059_v40  ;;  %v1512_v40 = vunpack.c.h.bf16 %v5379_v3  ;;  %v1449_v24 = vunpack.c.l.bf16 %v5382_v7  ;;  %v1450_v21 = vunpack.c.h.bf16 %v5382_v7 }
  0xb9   : > { %v1544_v62 = vadd.f32 %v1512_v40, %v1480_v35  ;;  %v1481_v39 = vadd.f32 %v1449_v24, %v1417_v43  ;;  %v1451_v35 = vunpack.c.l.bf16 %v5404_v34 }
  0xbb   : > { %v1608_v1 = vadd.f32 %v1576_v31, %v1544_v62  ;;  %v1545_v43 = vadd.f32 %v1513_v17, %v1481_v39  ;;  %v1422_v62 = vunpack.c.h.bf16 %v5331_v54 }
  0xbd   : > { %v1640_v40 = vmul.f32 0.25, %v1608_v1 }
  0xbe   : > { %1890 = vmatmul.mubr.bf16.gmra.mrb[48].mxu1 %v4666_v58  ;;  %4323 = vmatmul.mubr.bf16.vlgmr.msra.gmra.mrb[48].mxu0 %v5075_v48  ;;  %v1482_v48 = vadd.f32 %v1450_v21, %v1418_v5 }
  0xbf   : > { %4403 = vmatpush3.bf16.msra.mxu0 %v4956_v13  ;;  %1897 = vmatprep.mubr.bf16.mxu1 %v1658_v44  ;;  %v1659_v13 = vpack.c.bf16 %v1638_v47, %v1637_v30  ;;  %v1452_v44 = vunpack.c.h.bf16 %v5404_v34  ;;  %v1660_v58 = vpack.c.bf16 %v1640_v40, %v1639_v4  ;;  %v4667_v40 = vld [vmem:[%s4922_s13 + $0x58] sm:$0xff]  }
  0xc0   : > { %4326 = vmatprep.mubr.bf16.mxu0 %v5113_v6  ;;  %4404 = vmatprep.subr.bf16.mxu0 %v4967_v16  ;;  %v1419_v6 = vunpack.c.l.bf16 %v5328_v49  ;;  %v1546_v24 = vadd.f32 %v1514_v29, %v1482_v48  ;;  %v5423_v49 = vld [vmem:[%s5053_s29 + $0x168] sm:$0xff]  }
  0xc1   : > { %v1515_v21 = vunpack.c.l.bf16 %v5423_v49  ;;  %v1516_v30 = vunpack.c.h.bf16 %v5423_v49 }
  0xc2   : > { %v1483_v5 = vadd.f32 %v1451_v35, %v1419_v6  ;;  %v1610_v56 = vadd.f32 %v1578_v2, %v1546_v24  ;;  %v1424_v2 = vunpack.c.h.bf16 %v5356_v11 }
  0xc3   : > { %4405 = vmatpush3.bf16.msra.mxu0 %v4967_v16  ;;  %v1577_v16 = vunpack.c.l.bf16 %v5408_v20 }
  0xc4   : > { %4406 = vmatprep.subr.bf16.mxu0 %v4993_v23  ;;  %v1642_v27 = vmul.f32 0.25, %v1610_v56 }
  0xc5   : > { %v1609_v37 = vadd.f32 %v1577_v16, %v1545_v43  ;;  %v1423_v16 = vunpack.c.l.bf16 %v5356_v11  ;;  %v5468_v11 = vld [vmem:[%s5053_s29 + $0x178] sm:$0xff]  }
  0xc6   : > { %1898 = vmatmul.mubr.bf16.gmra.mrb[52].mxu1 %v4951_v12  ;;  %4327 = vmatmul.mubr.bf16.gmra.mrb[52].mxu0 %v5141_v45  ;;  %v1484_v12 = vadd.f32 %v1452_v44, %v1420_v50  ;;  %v5428_v45 = vld [vmem:[%s5053_s29 + $0xf0] sm:$0xff]  }
  0xc7   : > { %1905 = vmatprep.mubr.bf16.mxu1 %v1659_v13  ;;  %4330 = vmatprep.mubr.bf16.mxu0 %v5175_v22  ;;  %v5432_v22 = vld [vmem:[%s5053_s29 + $0x1e8] sm:$0xff]   ;;  %v1453_v47 = vunpack.c.l.bf16 %v5428_v45  ;;  %v1454_v31 = vunpack.c.h.bf16 %v5428_v45  ;;  %v1641_v48 = vmul.f32 0.25, %v1609_v37  ;;  %v1547_v13 = vadd.f32 %v1515_v21, %v1483_v5 }
  0xc8   : > { %4407 = vmatpush3.bf16.msra.mxu0 %v4993_v23  ;;  %v1421_v23 = vunpack.c.l.bf16 %v5331_v54  ;;  %v1579_v39 = vunpack.c.l.bf16 %v5432_v22  ;;  %v1548_v1 = vadd.f32 %v1516_v30, %v1484_v12  ;;  %v5447_v54 = vld [vmem:[%s5053_s29 + $0x170] sm:$0xff]  }
  0xc9   : > { %4408 = vmatprep.subr.bf16.mxu0 %v5007_v26  ;;  %v1517_v29 = vunpack.c.l.bf16 %v5447_v54  ;;  %v1661_v6 = vpack.c.bf16 %v1642_v27, %v1641_v48  ;;  %v1518_v44 = vunpack.c.h.bf16 %v5447_v54 }
  0xca   : > { %v1485_v17 = vadd.f32 %v1453_v47, %v1421_v23  ;;  %v1611_v35 = vadd.f32 %v1579_v39, %v1547_v13  ;;  %v5472_v23 = vld [vmem:[%s5053_s29 + $0x1f8] sm:$0xff]   ;;  %v1520_v47 = vunpack.c.h.bf16 %v5468_v11 }
  0xcc   : > { %4409 = vmatpush3.bf16.msra.mxu0 %v5007_v26  ;;  %v1580_v26 = vunpack.c.h.bf16 %v5432_v22  ;;  %v1549_v43 = vadd.f32 %v1517_v29, %v1485_v17 }
  0xcd   : > { %4410 = vmatprep.subr.bf16.mxu0 %v5031_v33 }
  0xce   : > { %1906 = vmatmul.mubr.bf16.gmra.mrb[56].mxu1 %v4974_v18  ;;  %4331 = vmatmul.mubr.bf16.gmra.mrb[56].mxu0 %v5199_v63  ;;  %v1486_v18 = vadd.f32 %v1454_v31, %v1422_v62  ;;  %v3821_v63 = vld [vmem:[%s5053_s29 + $0xf8] sm:$0xff]   ;;  %v1612_v50 = vadd.f32 %v1580_v26, %v1548_v1  ;;  %v4668_v62 = vld [vmem:[%s4922_s13 + $0x60] sm:$0xff]   ;;  %v1584_v31 = vunpack.c.h.bf16 %v5472_v23 }
  0xcf   : > { %1913 = vmatprep.mubr.bf16.mxu1 %v1660_v58  ;;  %4334 = vmatprep.mubr.bf16.mxu0 %v5225_v46  ;;  %v5454_v46 = vld [vmem:[%s5053_s29 + $0x1f0] sm:$0xff]   ;;  %v1456_v4 = vunpack.c.h.bf16 %v3821_v63 }
  0xd0   : > { %4411 = vmatpush3.bf16.msra.mxu0 %v5031_v33  ;;  %v1455_v33 = vunpack.c.l.bf16 %v3821_v63  ;;  %v1581_v24 = vunpack.c.l.bf16 %v5454_v46  ;;  %v1644_v5 = vmul.f32 0.25, %v1612_v50  ;;  %v1550_v12 = vadd.f32 %v1518_v44, %v1486_v18  ;;  %v4669_v18 = vld [vmem:[%s4922_s13 + $0x68] sm:$0xff]   ;;  %s5672_s13 = sshll.u32 %s5835_s30, 3 }
  0xd1   : > { %4412 = vmatprep.subr.bf16.mxu0 %v5043_v36  ;;  %v1582_v21 = vunpack.c.h.bf16 %v5454_v46  ;;  %s903_s26 = scalar_lea.vmem %s5775_s7, %s5672_s13  ;;  %s907_s11 = scalar_lea.vmem %s5776_s8, %s5672_s13 }
  0xd2   : > { %v1487_v58 = vadd.f32 %v1455_v33, %v1423_v16  ;;  %v1613_v37 = vadd.f32 %v1581_v24, %v1549_v43  ;;  %s895_s16 = scalar_lea.vmem %s5773_s5, %s5672_s13  ;;  %s899_s18 = scalar_lea.vmem %s5774_s6, %s5672_s13 }
  0xd3   : > { %v1614_v30 = vadd.f32 %v1582_v21, %v1550_v12 }
  0xd4   : > { %4413 = vmatpush3.bf16.msra.mxu0 %v5043_v36  ;;  %v1643_v36 = vmul.f32 0.25, %v1611_v35  ;;  %v1645_v39 = vmul.f32 0.25, %v1613_v37 }
  0xd5   : > { %4414 = vmatprep.subr.bf16.mxu0 %v5099_v59  ;;  %v1646_v26 = vmul.f32 0.25, %v1614_v30 }
  0xd6   : > { %1914 = vmatmul.mubr.bf16.gmra.mrb[60].mxu1 %v4667_v40  ;;  %4335 = vmatmul.mubr.bf16.gmra.mrb[60].mxu0 %v5253_v25  ;;  %v1488_v25 = vadd.f32 %v1456_v4, %v1424_v2  ;;  %v1662_v56 = vpack.c.bf16 %v1644_v5, %v1643_v36 }
  0xd7   : > { %1921 = vmatprep.mubr.bf16.mxu1 %v1661_v6  ;;  %4338 = vmatprep.mubr.bf16.mxu0 %v5284_v14  ;;  %v1519_v14 = vunpack.c.l.bf16 %v5468_v11  ;;  %v1663_v13 = vpack.c.bf16 %v1646_v26, %v1645_v39 }
  0xd8   : > { %4415 = vmatpush3.bf16.msra.mxu0 %v5099_v59  ;;  %v1583_v59 = vunpack.c.l.bf16 %v5472_v23  ;;  %v1552_v27 = vadd.f32 %v1520_v47, %v1488_v25 }
  0xd9   : > { %4416 = vmatprep.subr.bf16.mxu0 %v5135_v28  ;;  %v1551_v48 = vadd.f32 %v1519_v14, %v1487_v58 }
  0xda   : > { %v1616_v17 = vadd.f32 %v1584_v31, %v1552_v27 }
  0xdb   : > { %v1615_v1 = vadd.f32 %v1583_v59, %v1551_v48 }
  0xdc   : > { %4417 = vmatpush3.bf16.msra.mxu0 %v5135_v28 }
  0xdd   : > { %v1647_v28 = vmul.f32 0.25, %v1615_v1 }
  0xde   : > { %1922 = vmatmul.mubr.bf16.gmra.mrb[64].mxu1 %v4668_v62  ;;  %4339 = vmatmul.mubr.bf16.gmra.mrb[64].mxu0 %v5313_v9  ;;  %v1648_v9 = vmul.f32 0.25, %v1616_v17 }
  0xdf   : > { %1929 = vmatprep.mubr.bf16.mxu1 %v1662_v56  ;;  %4342 = vmatprep.mubr.bf16.mxu0 %v5339_v10 }
  0xe0   : > { %v1664_v29 = vpack.c.bf16 %v1648_v9, %v1647_v28 }
  0xe6   : > { %1930 = vmatmul.mubr.bf16.gmra.mrb[68].mxu1 %v4669_v18  ;;  %4343 = vmatmul.mubr.bf16.gmra.mrb[68].mxu0 %v5363_v60  ;;  %v5820_v60 = vld [vmem:[#allocation14_spill] sm:$0xff] }
  0xe7   : > { %1937 = vmatprep.mubr.bf16.mxu1 %v1663_v13  ;;  %4346 = vmatprep.mubr.bf16.mxu0 %v5382_v7 }
  0xee   : > { %1938 = vmatmul.mubr.bf16.gmra.mrb[72].mxu1 %v5050_v38  ;;  %4347 = vmatmul.mubr.bf16.gmra.mrb[72].mxu0 %v5404_v34  ;;  %v5809_v38 = vld [vmem:[#allocation3_spill] sm:$0xff] }
  0xef   : > { %1945 = vmatprep.mubr.bf16.mxu1 %v1664_v29  ;;  %4350 = vmatprep.mubr.bf16.mxu0 %v5428_v45 }
  0xf6   : > { %1946 = vmatmul.mubr.bf16.gmra.mrb[76].mxu1 %v5119_v8  ;;  %4351 = vmatmul.mubr.bf16.gmra.mrb[76].mxu0 %v3821_v63  ;;  %v5810_v8 = vld [vmem:[#allocation4_spill] sm:$0xff] }
  0xf7   : > { %4370 = vmatprep.mubr.bf16.mxu1 %v5062_v41  ;;  %4418 = vmatprep.mubr.bf16.mxu0 %v5065_v42  ;;  %v5811_v41 = vld [vmem:[#allocation5_spill] sm:$0xff]  ;;  %v5812_v42 = vld [vmem:[#allocation6_spill] sm:$0xff] }
  0xfe   : > { %4371 = vmatmul.mubr.bf16.vlgmr.msra.gmra.mrb[80].mxu1 %v5081_v51  ;;  %4419 = vmatmul.mubr.bf16.vlgmr.msra.gmra.mrb[80].mxu0 %v5090_v57  ;;  %v5813_v51 = vld [vmem:[#allocation7_spill] sm:$0xff]  ;;  %v5814_v57 = vld [vmem:[#allocation8_spill] sm:$0xff] }
  0xff   : > { %4374 = vmatprep.mubr.bf16.mxu1 %v5149_v52  ;;  %4422 = vmatprep.mubr.bf16.mxu0 %v5152_v53  ;;  %v5815_v52 = vld [vmem:[#allocation9_spill] sm:$0xff]  ;;  %v5816_v53 = vld [vmem:[#allocation10_spill] sm:$0xff] }
 0x106   : > { %4375 = vmatmul.mubr.bf16.gmra.mrb[84].mxu1 %v5170_v19  ;;  %4423 = vmatmul.mubr.bf16.gmra.mrb[84].mxu0 %v5179_v32  ;;  %v5817_v19 = vld [vmem:[#allocation11_spill] sm:$0xff]  ;;  %v5818_v32 = vld [vmem:[#allocation12_spill] sm:$0xff] }
 0x107   : > { %4378 = vmatprep.mubr.bf16.mxu1 %v5195_v61  ;;  %4426 = vmatprep.mubr.bf16.mxu0 %v5809_v38  ;;  %v5819_v61 = vld [vmem:[#allocation13_spill] sm:$0xff] }
 0x10e   : > { %4379 = vmatmul.mubr.bf16.gmra.mrb[88].mxu1 %v5810_v8  ;;  %4427 = vmatmul.mubr.bf16.gmra.mrb[88].mxu0 %v5811_v41 }
 0x10f   : > { %4382 = vmatprep.mubr.bf16.mxu1 %v5812_v42  ;;  %4430 = vmatprep.mubr.bf16.mxu0 %v5813_v51 }
 0x116   : > { %4383 = vmatmul.mubr.bf16.gmra.mrb[92].mxu1 %v5814_v57  ;;  %4431 = vmatmul.mubr.bf16.gmra.mrb[92].mxu0 %v5815_v52 }
 0x117   : > { %4386 = vmatprep.mubr.bf16.mxu1 %v5816_v53  ;;  %4434 = vmatprep.mubr.bf16.mxu0 %v5817_v19 }
 0x11e   : > { %4387 = vmatmul.mubr.bf16.gmra.mrb[96].mxu1 %v5818_v32  ;;  %4435 = vmatmul.mubr.bf16.gmra.mrb[96].mxu0 %v5819_v61 }
 0x11f   : > { %4390 = vmatprep.mubr.bf16.mxu1 %v5359_v55  ;;  %4438 = vmatprep.mubr.bf16.mxu0 %v5820_v60 }
 0x126   : > { %4391 = vmatmul.mubr.bf16.gmra.mrb[100].mxu1 %v5379_v3  ;;  %4439 = vmatmul.mubr.bf16.gmra.mrb[100].mxu0 %v5386_v15 }
 0x127   : > { %4394 = vmatprep.mubr.bf16.mxu1 %v5401_v0  ;;  %4442 = vmatprep.mubr.bf16.mxu0 %v5408_v20 }
 0x12e   : > { %4395 = vmatmul.mubr.bf16.gmra.mrb[104].mxu1 %v5423_v49  ;;  %4443 = vmatmul.mubr.bf16.gmra.mrb[104].mxu0 %v5432_v22 }
 0x12f   : > { %4398 = vmatprep.mubr.bf16.mxu1 %v5447_v54  ;;  %4446 = vmatprep.mubr.bf16.mxu0 %v5454_v46 }
 0x131   : > { %v5519_v10 = vpop.f32.mrb[0].mxu0  ;;  %v5521_v55 = vpop.f32.mrb[0].mxu1 }
 0x132   : > { %v5523_v7 = vpop.f32.mrb[1].mxu0  ;;  %v5525_v3 = vpop.f32.mrb[1].mxu1 }
 0x133   : > { %v5527_v15 = vpop.f32.mrb[2].mxu0  ;;  %v5529_v0 = vpop.f32.mrb[2].mxu1 }
 0x134   : > { %v5531_v34 = vpop.f32.mrb[3].mxu0  ;;  %v5533_v20 = vpop.f32.mrb[3].mxu1 }
 0x136   : > { %4399 = vmatmul.mubr.bf16.gmra.mrb[108].mxu1 %v5468_v11  ;;  %4447 = vmatmul.mubr.bf16.gmra.mrb[108].mxu0 %v5472_v23 }
 0x139   : > { %v5537_v49 = vpop.f32.mrb[4].mxu0  ;;  %v5539_v45 = vpop.f32.mrb[4].mxu1 }
 0x13a   : > { %v5541_v22 = vpop.f32.mrb[5].mxu0  ;;  %v5543_v54 = vpop.f32.mrb[5].mxu1 }
 0x13b   : > { %5821 = vst [vmem:[#allocation3_spill] sm:$0xff] %v5543_v54  ;;  %v5545_v63 = vpop.f32.mrb[6].mxu0  ;;  %v5547_v6 = vpop.f32.mrb[6].mxu1 }
 0x13c   : > { %5822 = vst [vmem:[#allocation4_spill] sm:$0xff] %v5545_v63  ;;  %5823 = vst [vmem:[#allocation5_spill] sm:$0xff] %v5547_v6  ;;  %v5549_v35 = vpop.f32.mrb[7].mxu0  ;;  %v5551_v50 = vpop.f32.mrb[7].mxu1 }
 0x141   : > { %v5553_v46 = vpop.f32.mrb[8].mxu0  ;;  %v5555_v44 = vpop.f32.mrb[8].mxu1 }
 0x142   : > { %v5557_v16 = vpop.f32.mrb[9].mxu0  ;;  %v5559_v33 = vpop.f32.mrb[9].mxu1 }
 0x143   : > { %v5561_v2 = vpop.f32.mrb[10].mxu0  ;;  %v5563_v4 = vpop.f32.mrb[10].mxu1 }
 0x144   : > { %5824 = vst [vmem:[#allocation6_spill] sm:$0xff] %v5561_v2  ;;  %v5565_v40 = vpop.f32.mrb[11].mxu0  ;;  %v5567_v43 = vpop.f32.mrb[11].mxu1 }
 0x149   : > { %v5569_v24 = vpop.f32.mrb[12].mxu0  ;;  %v5571_v36 = vpop.f32.mrb[12].mxu1 }
 0x14a   : > { %v5573_v5 = vpop.f32.mrb[13].mxu0  ;;  %v5575_v12 = vpop.f32.mrb[13].mxu1 }
 0x14b   : > { %v5577_v21 = vpop.f32.mrb[14].mxu0  ;;  %v5579_v11 = vpop.f32.mrb[14].mxu1 }
 0x14c   : > { %v5581_v58 = vpop.f32.mrb[15].mxu0  ;;  %v5583_v25 = vpop.f32.mrb[15].mxu1 }
 0x151   : > { %v4018_v37 = vpop.f32.mrb[16].mxu1  ;;  %v4276_v56 = vpop.f32.mrb[16].mxu0 }
 0x152   : > { %v2265_v30 = vadd.f32 %v4276_v56, %v5519_v10  ;;  %v4019_v23 = vpop.f32.mrb[17].mxu1  ;;  %v2256_v14 = vpop.f32.mrb[17].mxu0 }
 0x153   : > { %v4020_v47 = vadd.f32 %v4019_v23, %v4018_v37  ;;  %v2257_v62 = vadd.f32 %v2256_v14, %v5523_v7  ;;  %v4021_v59 = vpop.f32.mrb[18].mxu1  ;;  %v4277_v31 = vpop.f32.mrb[18].mxu0 }
 0x154   : > { %v2268_v39 = vadd.f32 %v4277_v31, %v5527_v15  ;;  %v4022_v26 = vpop.f32.mrb[19].mxu1  ;;  %v2259_v48 = vpop.f32.mrb[19].mxu0  ;;  %v2423_v38 = vmul.f32 %v2265_v30, %v2265_v30 }
 0x155   : > { %v4023_v27 = vadd.f32 %v4022_v26, %v4021_v59  ;;  %v2260_v13 = vadd.f32 %v2259_v48, %v5531_v34  ;;  %v1992_v1 = vmul.f32 %v4020_v47, %v4020_v47  ;;  %v2421_v17 = vmul.f32 %v2257_v62, %v2257_v62 }
 0x156   : > { %v2424_v14 = vmul.f32 %v2268_v39, %v2268_v39 }
 0x157   : > { %v1954_v18 = vadd.f32 %v4023_v27, %v4020_v47  ;;  %v1993_v28 = vmul.f32 %v4023_v27, %v4023_v27  ;;  %v2383_v9 = vadd.f32 %v2260_v13, %v2257_v62  ;;  %v2422_v29 = vmul.f32 %v2260_v13, %v2260_v13 }
 0x159   : > { %v2024_v8 = vadd.f32 %v1993_v28, %v1992_v1  ;;  %v2384_v41 = vadd.f32 %v2383_v9, %v2265_v30  ;;  %v2453_v42 = vadd.f32 %v2422_v29, %v2421_v17  ;;  %v4024_v51 = vpop.f32.mrb[20].mxu1  ;;  %v4280_v57 = vpop.f32.mrb[20].mxu0 }
 0x15a   : > { %v2281_v52 = vadd.f32 %v4280_v57, %v5537_v49  ;;  %v4025_v53 = vpop.f32.mrb[21].mxu1  ;;  %v2272_v19 = vpop.f32.mrb[21].mxu0 }
 0x15b   : > { %v2454_v32 = vadd.f32 %v2453_v42, %v2423_v38  ;;  %v4026_v61 = vadd.f32 %v4025_v53, %v4024_v51  ;;  %v2273_v60 = vadd.f32 %v2272_v19, %v5541_v22  ;;  %v2385_v37 = vadd.f32 %v2384_v41, %v2268_v39  ;;  %v4027_v56 = vpop.f32.mrb[22].mxu1  ;;  %v4281_v23 = vpop.f32.mrb[22].mxu0 }
 0x15c   : > { %v2284_v47 = vadd.f32 %v4281_v23, %v5545_v63  ;;  %v4028_v62 = vpop.f32.mrb[23].mxu1  ;;  %v2275_v59 = vpop.f32.mrb[23].mxu0 }
 0x15d   : > { %v1955_v30 = vadd.f32 %v4026_v61, %v1954_v18  ;;  %v1994_v31 = vmul.f32 %v4026_v61, %v4026_v61  ;;  %v2386_v26 = vadd.f32 %v2385_v37, %v2273_v60  ;;  %v2425_v48 = vmul.f32 %v2273_v60, %v2273_v60 }
 0x15e   : > { %v2455_v27 = vadd.f32 %v2454_v32, %v2424_v14  ;;  %v4029_v13 = vadd.f32 %v4028_v62, %v4027_v56  ;;  %v2276_v1 = vadd.f32 %v2275_v59, %v5549_v35  ;;  %v2427_v61 = vmul.f32 %v2281_v52, %v2281_v52 }
 0x15f   : > { %v2025_v17 = vadd.f32 %v2024_v8, %v1994_v31  ;;  %v2428_v23 = vmul.f32 %v2284_v47, %v2284_v47 }
 0x160   : > { %v2456_v28 = vadd.f32 %v2455_v27, %v2425_v48  ;;  %v1956_v9 = vadd.f32 %v4029_v13, %v1955_v30  ;;  %v1995_v29 = vmul.f32 %v4029_v13, %v4029_v13  ;;  %v2387_v38 = vadd.f32 %v2386_v26, %v2276_v1 }
 0x161   : > { %v2426_v41 = vmul.f32 %v2276_v1, %v2276_v1  ;;  %v4030_v42 = vpop.f32.mrb[24].mxu1  ;;  %v4284_v39 = vpop.f32.mrb[24].mxu0 }
 0x162   : > { %v2026_v51 = vadd.f32 %v2025_v17, %v1995_v29  ;;  %v2388_v57 = vadd.f32 %v2387_v38, %v2281_v52  ;;  %v2297_v53 = vadd.f32 %v4284_v39, %v5553_v46  ;;  %v4031_v18 = vpop.f32.mrb[25].mxu1  ;;  %v2288_v19 = vpop.f32.mrb[25].mxu0 }
 0x163   : > { %v2457_v60 = vadd.f32 %v2456_v28, %v2426_v41  ;;  %v4032_v32 = vadd.f32 %v4031_v18, %v4030_v42  ;;  %v2289_v37 = vadd.f32 %v2288_v19, %v5557_v16  ;;  %v4033_v56 = vpop.f32.mrb[26].mxu1  ;;  %v4285_v8 = vpop.f32.mrb[26].mxu0 }
 0x164   : > { %v2389_v14 = vadd.f32 %v2388_v57, %v2284_v47  ;;  %v2300_v62 = vadd.f32 %v4285_v8, %v5561_v2  ;;  %v4034_v59 = vpop.f32.mrb[27].mxu1  ;;  %v2291_v30 = vpop.f32.mrb[27].mxu0 }
 0x165   : > { %v2458_v31 = vadd.f32 %v2457_v60, %v2427_v61  ;;  %v1957_v26 = vadd.f32 %v4032_v32, %v1956_v9  ;;  %v1996_v48 = vmul.f32 %v4032_v32, %v4032_v32  ;;  %v2429_v27 = vmul.f32 %v2289_v37, %v2289_v37 }
 0x166   : > { %v2390_v13 = vadd.f32 %v2389_v14, %v2289_v37  ;;  %v4035_v1 = vadd.f32 %v4034_v59, %v4033_v56  ;;  %v2292_v52 = vadd.f32 %v2291_v30, %v5565_v40  ;;  %v2431_v32 = vmul.f32 %v2297_v53, %v2297_v53 }
 0x167   : > { %v2027_v17 = vadd.f32 %v2026_v51, %v1996_v48  ;;  %v2459_v28 = vadd.f32 %v2458_v31, %v2428_v23  ;;  %v2432_v14 = vmul.f32 %v2300_v62, %v2300_v62 }
 0x168   : > { %v1958_v29 = vadd.f32 %v4035_v1, %v1957_v26  ;;  %v1997_v38 = vmul.f32 %v4035_v1, %v4035_v1  ;;  %v2391_v41 = vadd.f32 %v2390_v13, %v2292_v52  ;;  %v2430_v42 = vmul.f32 %v2292_v52, %v2292_v52 }
 0x169   : > { %v2460_v39 = vadd.f32 %v2459_v28, %v2429_v27  ;;  %v4036_v47 = vpop.f32.mrb[28].mxu1  ;;  %v4288_v57 = vpop.f32.mrb[28].mxu0 }
 0x16a   : > { %v2028_v18 = vadd.f32 %v2027_v17, %v1997_v38  ;;  %v2392_v19 = vadd.f32 %v2391_v41, %v2297_v53  ;;  %v2313_v61 = vadd.f32 %v4288_v57, %v5569_v24  ;;  %v4037_v9 = vpop.f32.mrb[29].mxu1  ;;  %v2304_v60 = vpop.f32.mrb[29].mxu0 }
 0x16b   : > { %v2461_v37 = vadd.f32 %v2460_v39, %v2430_v42  ;;  %v4038_v56 = vadd.f32 %v4037_v9, %v4036_v47  ;;  %v2305_v8 = vadd.f32 %v2304_v60, %v5573_v5  ;;  %v4039_v51 = vpop.f32.mrb[30].mxu1  ;;  %v4289_v23 = vpop.f32.mrb[30].mxu0 }
 0x16c   : > { %v2393_v59 = vadd.f32 %v2392_v19, %v2300_v62  ;;  %v2316_v30 = vadd.f32 %v4289_v23, %v5577_v21  ;;  %v4040_v31 = vpop.f32.mrb[31].mxu1  ;;  %v2307_v26 = vpop.f32.mrb[31].mxu0 }
 0x16d   : > { %v2462_v48 = vadd.f32 %v2461_v37, %v2431_v32  ;;  %v1959_v27 = vadd.f32 %v4038_v56, %v1958_v29  ;;  %v1998_v13 = vmul.f32 %v4038_v56, %v4038_v56  ;;  %v2433_v1 = vmul.f32 %v2305_v8, %v2305_v8 }
 0x16e   : > { %v2394_v52 = vadd.f32 %v2393_v59, %v2305_v8  ;;  %v4041_v17 = vadd.f32 %v4040_v31, %v4039_v51  ;;  %v2308_v53 = vadd.f32 %v2307_v26, %v5581_v58  ;;  %v2435_v56 = vmul.f32 %v2313_v61, %v2313_v61 }
 0x16f   : > { %v2029_v28 = vadd.f32 %v2028_v18, %v1998_v13  ;;  %v2463_v38 = vadd.f32 %v2462_v48, %v2432_v14  ;;  %v2436_v59 = vmul.f32 %v2316_v30, %v2316_v30 }
 0x170   : > { %v1960_v41 = vadd.f32 %v4041_v17, %v1959_v27  ;;  %v1999_v42 = vmul.f32 %v4041_v17, %v4041_v17  ;;  %v2395_v39 = vadd.f32 %v2394_v52, %v2308_v53  ;;  %v2434_v47 = vmul.f32 %v2308_v53, %v2308_v53 }
 0x171   : > { %v2464_v57 = vadd.f32 %v2463_v38, %v2433_v1  ;;  %v4042_v62 = vpop.f32.mrb[32].mxu1  ;;  %v4292_v19 = vpop.f32.mrb[32].mxu0 }
 0x172   : > { %v2030_v9 = vadd.f32 %v2029_v28, %v1999_v42  ;;  %v2396_v60 = vadd.f32 %v2395_v39, %v2313_v61  ;;  %v2329_v32 = vadd.f32 %v4292_v19, %v5521_v55  ;;  %v4043_v29 = vpop.f32.mrb[33].mxu1  ;;  %v2320_v37 = vpop.f32.mrb[33].mxu0 }
 0x173   : > { %v2465_v8 = vadd.f32 %v2464_v57, %v2434_v47  ;;  %v4044_v51 = vadd.f32 %v4043_v29, %v4042_v62  ;;  %v2321_v23 = vadd.f32 %v2320_v37, %v5525_v3  ;;  %v4045_v18 = vpop.f32.mrb[34].mxu1  ;;  %v4293_v14 = vpop.f32.mrb[34].mxu0 }
 0x174   : > { %v2397_v31 = vadd.f32 %v2396_v60, %v2316_v30  ;;  %v2332_v26 = vadd.f32 %v4293_v14, %v5529_v0  ;;  %v4046_v48 = vpop.f32.mrb[35].mxu1  ;;  %v2323_v27 = vpop.f32.mrb[35].mxu0 }
 0x175   : > { %v2466_v13 = vadd.f32 %v2465_v8, %v2435_v56  ;;  %v1961_v1 = vadd.f32 %v4044_v51, %v1960_v41  ;;  %v2000_v52 = vmul.f32 %v4044_v51, %v4044_v51  ;;  %v2437_v17 = vmul.f32 %v2321_v23, %v2321_v23 }
 0x176   : > { %v2398_v53 = vadd.f32 %v2397_v31, %v2321_v23  ;;  %v4047_v28 = vadd.f32 %v4046_v48, %v4045_v18  ;;  %v2324_v61 = vadd.f32 %v2323_v27, %v5533_v20  ;;  %v2439_v51 = vmul.f32 %v2329_v32, %v2329_v32 }
 0x177   : > { %v2031_v38 = vadd.f32 %v2030_v9, %v2000_v52  ;;  %v2467_v42 = vadd.f32 %v2466_v13, %v2436_v59  ;;  %v2440_v31 = vmul.f32 %v2332_v26, %v2332_v26 }
 0x178   : > { %v1962_v39 = vadd.f32 %v4047_v28, %v1961_v1  ;;  %v2001_v47 = vmul.f32 %v4047_v28, %v4047_v28  ;;  %v2399_v57 = vadd.f32 %v2398_v53, %v2324_v61  ;;  %v2438_v62 = vmul.f32 %v2324_v61, %v2324_v61 }
 0x179   : > { %v2468_v19 = vadd.f32 %v2467_v42, %v2437_v17  ;;  %v4048_v30 = vpop.f32.mrb[36].mxu1  ;;  %v4296_v60 = vpop.f32.mrb[36].mxu0 }
 0x17a   : > { %v2032_v29 = vadd.f32 %v2031_v38, %v2001_v47  ;;  %v2400_v37 = vadd.f32 %v2399_v57, %v2329_v32  ;;  %v2345_v56 = vadd.f32 %v4296_v60, %v5539_v45  ;;  %v4049_v41 = vpop.f32.mrb[37].mxu1  ;;  %v2336_v8 = vpop.f32.mrb[37].mxu0 }
 0x17b   : > { %v2469_v23 = vadd.f32 %v2468_v19, %v2438_v62  ;;  %v4050_v18 = vadd.f32 %v4049_v41, %v4048_v30  ;;  %v2337_v14 = vadd.f32 %v2336_v8, %v5543_v54  ;;  %v4051_v9 = vpop.f32.mrb[38].mxu1  ;;  %v4297_v59 = vpop.f32.mrb[38].mxu0 }
 0x17c   : > { %v2401_v48 = vadd.f32 %v2400_v37, %v2332_v26  ;;  %v2348_v27 = vadd.f32 %v4297_v59, %v5547_v6  ;;  %v4052_v13 = vpop.f32.mrb[39].mxu1  ;;  %v2339_v1 = vpop.f32.mrb[39].mxu0 }
 0x17d   : > { %v2470_v52 = vadd.f32 %v2469_v23, %v2439_v51  ;;  %v1963_v17 = vadd.f32 %v4050_v18, %v1962_v39  ;;  %v2002_v53 = vmul.f32 %v4050_v18, %v4050_v18  ;;  %v2441_v28 = vmul.f32 %v2337_v14, %v2337_v14 }
 0x17e   : > { %v2402_v61 = vadd.f32 %v2401_v48, %v2337_v14  ;;  %v4053_v38 = vadd.f32 %v4052_v13, %v4051_v9  ;;  %v2340_v32 = vadd.f32 %v2339_v1, %v5551_v50  ;;  %v2443_v18 = vmul.f32 %v2345_v56, %v2345_v56 }
 0x17f   : > { %v2033_v42 = vadd.f32 %v2032_v29, %v2002_v53  ;;  %v2471_v47 = vadd.f32 %v2470_v52, %v2440_v31  ;;  %v2444_v48 = vmul.f32 %v2348_v27, %v2348_v27 }
 0x180   : > { %v1964_v57 = vadd.f32 %v4053_v38, %v1963_v17  ;;  %v2003_v62 = vmul.f32 %v4053_v38, %v4053_v38  ;;  %v2403_v19 = vadd.f32 %v2402_v61, %v2340_v32  ;;  %v2442_v30 = vmul.f32 %v2340_v32, %v2340_v32 }
 0x181   : > { %v2472_v60 = vadd.f32 %v2471_v47, %v2441_v28  ;;  %v4054_v26 = vpop.f32.mrb[40].mxu1  ;;  %v4300_v37 = vpop.f32.mrb[40].mxu0 }
 0x182   : > { %v2034_v41 = vadd.f32 %v2033_v42, %v2003_v62  ;;  %v2404_v8 = vadd.f32 %v2403_v19, %v2345_v56  ;;  %v2361_v51 = vadd.f32 %v4300_v37, %v5555_v44  ;;  %v4055_v39 = vpop.f32.mrb[41].mxu1  ;;  %v2352_v23 = vpop.f32.mrb[41].mxu0 }
 0x183   : > { %v2473_v14 = vadd.f32 %v2472_v60, %v2442_v30  ;;  %v4056_v9 = vadd.f32 %v4055_v39, %v4054_v26  ;;  %v2353_v59 = vadd.f32 %v2352_v23, %v5559_v33  ;;  %v4057_v29 = vpop.f32.mrb[42].mxu1  ;;  %v4301_v31 = vpop.f32.mrb[42].mxu0 }
 0x184   : > { %v2405_v13 = vadd.f32 %v2404_v8, %v2348_v27  ;;  %v2364_v1 = vadd.f32 %v4301_v31, %v5563_v4  ;;  %v4058_v52 = vpop.f32.mrb[43].mxu1  ;;  %v2355_v17 = vpop.f32.mrb[43].mxu0 }
 0x185   : > { %v2474_v53 = vadd.f32 %v2473_v14, %v2443_v18  ;;  %v1965_v28 = vadd.f32 %v4056_v9, %v1964_v57  ;;  %v2004_v61 = vmul.f32 %v4056_v9, %v4056_v9  ;;  %v2445_v38 = vmul.f32 %v2353_v59, %v2353_v59 }
 0x186   : > { %v2406_v32 = vadd.f32 %v2405_v13, %v2353_v59  ;;  %v4059_v42 = vadd.f32 %v4058_v52, %v4057_v29  ;;  %v2356_v56 = vadd.f32 %v2355_v17, %v5567_v43  ;;  %v2447_v9 = vmul.f32 %v2361_v51, %v2361_v51 }
 0x187   : > { %v2035_v47 = vadd.f32 %v2034_v41, %v2004_v61  ;;  %v2475_v62 = vadd.f32 %v2474_v53, %v2444_v48  ;;  %v2448_v13 = vmul.f32 %v2364_v1, %v2364_v1 }
 0x188   : > { %v1966_v19 = vadd.f32 %v4059_v42, %v1965_v28  ;;  %v2005_v30 = vmul.f32 %v4059_v42, %v4059_v42  ;;  %v2407_v60 = vadd.f32 %v2406_v32, %v2356_v56  ;;  %v2446_v26 = vmul.f32 %v2356_v56, %v2356_v56 }
 0x189   : > { %v2476_v37 = vadd.f32 %v2475_v62, %v2445_v38  ;;  %v4060_v27 = vpop.f32.mrb[44].mxu1  ;;  %v4304_v8 = vpop.f32.mrb[44].mxu0 }
 0x18a   : > { %v2036_v39 = vadd.f32 %v2035_v47, %v2005_v30  ;;  %v2408_v23 = vadd.f32 %v2407_v60, %v2361_v51  ;;  %v2377_v18 = vadd.f32 %v4304_v8, %v5571_v36  ;;  %v4061_v57 = vpop.f32.mrb[45].mxu1  ;;  %v2368_v14 = vpop.f32.mrb[45].mxu0 }
 0x18b   : > { %v2477_v59 = vadd.f32 %v2476_v37, %v2446_v26  ;;  %v4062_v29 = vadd.f32 %v4061_v57, %v4060_v27  ;;  %v2369_v31 = vadd.f32 %v2368_v14, %v5575_v12  ;;  %v4063_v41 = vpop.f32.mrb[46].mxu1  ;;  %v4305_v48 = vpop.f32.mrb[46].mxu0 }
 0x18c   : > { %v2409_v52 = vadd.f32 %v2408_v23, %v2364_v1  ;;  %v2380_v17 = vadd.f32 %v4305_v48, %v5579_v11  ;;  %v4064_v53 = vpop.f32.mrb[47].mxu1  ;;  %v2371_v28 = vpop.f32.mrb[47].mxu0 }
 0x18d   : > { %v2478_v61 = vadd.f32 %v2477_v59, %v2447_v9  ;;  %v1967_v38 = vadd.f32 %v4062_v29, %v1966_v19  ;;  %v2006_v32 = vmul.f32 %v4062_v29, %v4062_v29  ;;  %v2449_v42 = vmul.f32 %v2369_v31, %v2369_v31 }
 0x18e   : > { %v2410_v56 = vadd.f32 %v2409_v52, %v2369_v31  ;;  %v4065_v47 = vadd.f32 %v4064_v53, %v4063_v41  ;;  %v2372_v51 = vadd.f32 %v2371_v28, %v5583_v25  ;;  %v2451_v29 = vmul.f32 %v2377_v18, %v2377_v18 }
 0x18f   : > { %v2037_v62 = vadd.f32 %v2036_v39, %v2006_v32  ;;  %v2479_v30 = vadd.f32 %v2478_v61, %v2448_v13 }
 0x190   : > { %v1968_v60 = vadd.f32 %v4065_v47, %v1967_v38  ;;  %v2007_v26 = vmul.f32 %v4065_v47, %v4065_v47  ;;  %v2411_v37 = vadd.f32 %v2410_v56, %v2372_v51  ;;  %v2450_v27 = vmul.f32 %v2372_v51, %v2372_v51 }
 0x191   : > { %v2480_v8 = vadd.f32 %v2479_v30, %v2449_v42  ;;  %v4066_v1 = vpop.f32.mrb[48].mxu1  ;;  %v4324_v23 = vpop.f32.mrb[48].mxu0  ;;  %v2452_v38 = vmul.f32 %v2380_v17, %v2380_v17 }
 0x192   : > { %v2038_v57 = vadd.f32 %v2037_v62, %v2007_v26  ;;  %v2412_v14 = vadd.f32 %v2411_v37, %v2377_v18  ;;  %v2630_v9 = vadd.f32 %v4324_v23, %v5519_v10  ;;  %v4067_v19 = vpop.f32.mrb[49].mxu1  ;;  %v2621_v59 = vpop.f32.mrb[49].mxu0 }
 0x193   : > { %v2481_v31 = vadd.f32 %v2480_v8, %v2450_v27  ;;  %v4068_v41 = vadd.f32 %v4067_v19, %v4066_v1  ;;  %v2622_v48 = vadd.f32 %v2621_v59, %v5523_v7  ;;  %v4069_v39 = vpop.f32.mrb[50].mxu1  ;;  %v4325_v13 = vpop.f32.mrb[50].mxu0 }
 0x194   : > { %v5619_v52 = vadd.f32 %v2412_v14, %v2380_v17  ;;  %v2633_v53 = vadd.f32 %v4325_v13, %v5527_v15  ;;  %v4070_v28 = vpop.f32.mrb[51].mxu1  ;;  %v2624_v61 = vpop.f32.mrb[51].mxu0 }
 0x195   : > { %v2482_v32 = vadd.f32 %v2481_v31, %v2451_v29  ;;  %v1969_v42 = vadd.f32 %v4068_v41, %v1968_v60  ;;  %v2008_v56 = vmul.f32 %v4068_v41, %v4068_v41  ;;  %v4071_v47 = vadd.f32 %v4070_v28, %v4069_v39 }
 0x196   : > { %v2625_v51 = vadd.f32 %v2624_v61, %v5531_v34  ;;  %v2786_v27 = vmul.f32 %v2622_v48, %v2622_v48  ;;  %v2788_v29 = vmul.f32 %v2630_v9, %v2630_v9 }
 0x197   : > { %v5623_v18 = vadd.f32 %v2482_v32, %v2452_v38  ;;  %v2039_v62 = vadd.f32 %v2038_v57, %v2008_v56  ;;  %v1970_v30 = vadd.f32 %v4071_v47, %v1969_v42  ;;  %v2009_v26 = vmul.f32 %v4071_v47, %v4071_v47 }
 0x198   : > { %v2748_v37 = vadd.f32 %v2625_v51, %v2622_v48  ;;  %v2787_v8 = vmul.f32 %v2625_v51, %v2625_v51  ;;  %v2789_v32 = vmul.f32 %v2633_v53, %v2633_v53 }
 0x199   : > { %v4072_v1 = vpop.f32.mrb[52].mxu1  ;;  %v4328_v23 = vpop.f32.mrb[52].mxu0  ;;  %v2040_v14 = vadd.f32 %v2039_v62, %v2009_v26 }
 0x19a   : > { %v2749_v19 = vadd.f32 %v2748_v37, %v2630_v9  ;;  %v2646_v17 = vadd.f32 %v4328_v23, %v5537_v49  ;;  %v4073_v59 = vpop.f32.mrb[53].mxu1  ;;  %v2637_v60 = vpop.f32.mrb[53].mxu0  ;;  %v2818_v31 = vadd.f32 %v2787_v8, %v2786_v27 }
 0x19b   : > { %v4074_v41 = vadd.f32 %v4073_v59, %v4072_v1  ;;  %v2638_v39 = vadd.f32 %v2637_v60, %v5541_v22  ;;  %v4075_v13 = vpop.f32.mrb[54].mxu1  ;;  %v4329_v57 = vpop.f32.mrb[54].mxu0 }
 0x19c   : > { %v2750_v28 = vadd.f32 %v2749_v19, %v2633_v53  ;;  %v2649_v61 = vadd.f32 %v4329_v57, %v5545_v63  ;;  %v4076_v48 = vpop.f32.mrb[55].mxu1  ;;  %v2640_v38 = vpop.f32.mrb[55].mxu0  ;;  %v2819_v42 = vadd.f32 %v2818_v31, %v2788_v29 }
 0x19d   : > { %v1971_v56 = vadd.f32 %v4074_v41, %v1970_v30  ;;  %v2010_v47 = vmul.f32 %v4074_v41, %v4074_v41  ;;  %v2790_v62 = vmul.f32 %v2638_v39, %v2638_v39  ;;  %v4077_v9 = vadd.f32 %v4076_v48, %v4075_v13 }
 0x19e   : > { %v2751_v51 = vadd.f32 %v2750_v28, %v2638_v39  ;;  %v2820_v37 = vadd.f32 %v2819_v42, %v2789_v32  ;;  %v2641_v27 = vadd.f32 %v2640_v38, %v5549_v35  ;;  %v2792_v13 = vmul.f32 %v2646_v17, %v2646_v17 }
 0x19f   : > { %v2041_v26 = vadd.f32 %v2040_v14, %v2010_v47  ;;  %v1972_v1 = vadd.f32 %v4077_v9, %v1971_v56  ;;  %v2011_v23 = vmul.f32 %v4077_v9, %v4077_v9  ;;  %v2793_v56 = vmul.f32 %v2649_v61, %v2649_v61 }
 0x1a0   : > { %v2821_v8 = vadd.f32 %v2820_v37, %v2790_v62  ;;  %v2752_v60 = vadd.f32 %v2751_v51, %v2641_v27  ;;  %v2791_v57 = vmul.f32 %v2641_v27, %v2641_v27 }
 0x1a1   : > { %v4078_v59 = vpop.f32.mrb[56].mxu1  ;;  %v4332_v19 = vpop.f32.mrb[56].mxu0  ;;  %v2042_v30 = vadd.f32 %v2041_v26, %v2011_v23 }
 0x1a2   : > { %v2662_v63 = vadd.f32 %v4332_v19, %v5553_v46  ;;  %v4079_v53 = vpop.f32.mrb[57].mxu1  ;;  %v2653_v29 = vpop.f32.mrb[57].mxu0  ;;  %v2753_v28 = vadd.f32 %v2752_v60, %v2646_v17  ;;  %v2822_v48 = vadd.f32 %v2821_v8, %v2791_v57 }
 0x1a3   : > { %v4080_v31 = vadd.f32 %v4079_v53, %v4078_v59  ;;  %v2654_v41 = vadd.f32 %v2653_v29, %v5557_v16  ;;  %v4081_v14 = vpop.f32.mrb[58].mxu1  ;;  %v4333_v39 = vpop.f32.mrb[58].mxu0 }
 0x1a4   : > { %v2665_v38 = vadd.f32 %v4333_v39, %v5561_v2  ;;  %v4082_v32 = vpop.f32.mrb[59].mxu1  ;;  %v2656_v42 = vpop.f32.mrb[59].mxu0  ;;  %v2823_v37 = vadd.f32 %v2822_v48, %v2792_v13  ;;  %v2754_v9 = vadd.f32 %v2753_v28, %v2649_v61 }
 0x1a5   : > { %v1973_v47 = vadd.f32 %v4080_v31, %v1972_v1  ;;  %v2012_v51 = vmul.f32 %v4080_v31, %v4080_v31  ;;  %v4083_v62 = vadd.f32 %v4082_v32, %v4081_v14  ;;  %v2794_v27 = vmul.f32 %v2654_v41, %v2654_v41 }
 0x1a6   : > { %v2657_v26 = vadd.f32 %v2656_v42, %v5565_v40  ;;  %v2755_v53 = vadd.f32 %v2754_v9, %v2654_v41  ;;  %v2824_v29 = vadd.f32 %v2823_v37, %v2793_v56 }
 0x1a7   : > { %v2043_v23 = vadd.f32 %v2042_v30, %v2012_v51  ;;  %v1974_v59 = vadd.f32 %v4083_v62, %v1973_v47  ;;  %v2013_v19 = vmul.f32 %v4083_v62, %v4083_v62  ;;  %v2796_v30 = vmul.f32 %v2662_v63, %v2662_v63 }
 0x1a8   : > { %v2795_v17 = vmul.f32 %v2657_v26, %v2657_v26  ;;  %v2825_v39 = vadd.f32 %v2824_v29, %v2794_v27  ;;  %v2756_v2 = vadd.f32 %v2755_v53, %v2657_v26  ;;  %v2797_v51 = vmul.f32 %v2665_v38, %v2665_v38 }
 0x1a9   : > { %v2044_v8 = vadd.f32 %v2043_v23, %v2013_v19  ;;  %v4084_v60 = vpop.f32.mrb[60].mxu1  ;;  %v4336_v57 = vpop.f32.mrb[60].mxu0 }
 0x1aa   : > { %v2678_v1 = vadd.f32 %v4336_v57, %v5569_v24  ;;  %v4085_v31 = vpop.f32.mrb[61].mxu1  ;;  %v2669_v14 = vpop.f32.mrb[61].mxu0  ;;  %v2757_v32 = vadd.f32 %v2756_v2, %v2662_v63  ;;  %v2826_v42 = vadd.f32 %v2825_v39, %v2795_v17 }
 0x1ab   : > { %v4086_v13 = vadd.f32 %v4085_v31, %v4084_v60  ;;  %v2670_v61 = vadd.f32 %v2669_v14, %v5573_v5  ;;  %v4087_v28 = vpop.f32.mrb[62].mxu1  ;;  %v4337_v48 = vpop.f32.mrb[62].mxu0 }
 0x1ac   : > { %v2681_v41 = vadd.f32 %v4337_v48, %v5577_v21  ;;  %v4088_v56 = vpop.f32.mrb[63].mxu1  ;;  %v2672_v47 = vpop.f32.mrb[63].mxu0  ;;  %v2827_v27 = vadd.f32 %v2826_v42, %v2796_v30  ;;  %v2758_v26 = vadd.f32 %v2757_v32, %v2665_v38 }
 0x1ad   : > { %v1975_v62 = vadd.f32 %v4086_v13, %v1974_v59  ;;  %v2014_v37 = vmul.f32 %v4086_v13, %v4086_v13  ;;  %v4089_v9 = vadd.f32 %v4088_v56, %v4087_v28  ;;  %v2798_v23 = vmul.f32 %v2670_v61, %v2670_v61 }
 0x1ae   : > { %v2673_v19 = vadd.f32 %v2672_v47, %v5581_v58  ;;  %v2759_v57 = vadd.f32 %v2758_v26, %v2670_v61  ;;  %v2828_v31 = vadd.f32 %v2827_v27, %v2797_v51 }
 0x1af   : > { %v2045_v53 = vadd.f32 %v2044_v8, %v2014_v37  ;;  %v1976_v29 = vadd.f32 %v4089_v9, %v1975_v62  ;;  %v2015_v60 = vmul.f32 %v4089_v9, %v4089_v9  ;;  %v2800_v8 = vmul.f32 %v2678_v1, %v2678_v1 }
 0x1b0   : > { %v2799_v63 = vmul.f32 %v2673_v19, %v2673_v19  ;;  %v2829_v14 = vadd.f32 %v2828_v31, %v2798_v23  ;;  %v2760_v48 = vadd.f32 %v2759_v57, %v2673_v19  ;;  %v2801_v37 = vmul.f32 %v2681_v41, %v2681_v41 }
 0x1b1   : > { %v2046_v2 = vadd.f32 %v2045_v53, %v2015_v60  ;;  %v4090_v17 = vpop.f32.mrb[64].mxu1  ;;  %v4340_v39 = vpop.f32.mrb[64].mxu0  ;;  %v2414_v57 = vrot.slane %v5619_v52, 4 }
 0x1b2   : > { %v2694_v59 = vadd.f32 %v4340_v39, %v5521_v55  ;;  %v4091_v13 = vpop.f32.mrb[65].mxu1  ;;  %v2685_v28 = vpop.f32.mrb[65].mxu0  ;;  %v2761_v56 = vadd.f32 %v2760_v48, %v2678_v1  ;;  %v2830_v47 = vadd.f32 %v2829_v14, %v2799_v63 }
 0x1b3   : > { %v4092_v30 = vadd.f32 %v4091_v13, %v4090_v17  ;;  %v2686_v38 = vadd.f32 %v2685_v28, %v5525_v3  ;;  %v4093_v32 = vpop.f32.mrb[66].mxu1  ;;  %v4341_v42 = vpop.f32.mrb[66].mxu0 }
 0x1b4   : > { %v2697_v61 = vadd.f32 %v4341_v42, %v5529_v0  ;;  %v4094_v51 = vpop.f32.mrb[67].mxu1  ;;  %v2688_v62 = vpop.f32.mrb[67].mxu0  ;;  %v2831_v23 = vadd.f32 %v2830_v47, %v2800_v8  ;;  %v2762_v19 = vadd.f32 %v2761_v56, %v2681_v41  ;;  %v2415_v8 = vadd.f32 %v2414_v57, %v5619_v52 }
 0x1b5   : > { %v1977_v9 = vadd.f32 %v4092_v30, %v1976_v29  ;;  %v2016_v27 = vmul.f32 %v4092_v30, %v4092_v30  ;;  %v4095_v26 = vadd.f32 %v4094_v51, %v4093_v32  ;;  %v2802_v53 = vmul.f32 %v2686_v38, %v2686_v38 }
 0x1b6   : > { %v2689_v60 = vadd.f32 %v2688_v62, %v5533_v20  ;;  %v2763_v1 = vadd.f32 %v2762_v19, %v2686_v38  ;;  %v2832_v63 = vadd.f32 %v2831_v23, %v2801_v37  ;;  %v2484_v56 = vrot.slane %v5623_v18, 4 }
 0x1b7   : > { %v2047_v31 = vadd.f32 %v2046_v2, %v2016_v27  ;;  %v1978_v17 = vadd.f32 %v4095_v26, %v1977_v9  ;;  %v2017_v39 = vmul.f32 %v4095_v26, %v4095_v26  ;;  %v2804_v62 = vmul.f32 %v2694_v59, %v2694_v59 }
 0x1b8   : > { %v2803_v14 = vmul.f32 %v2689_v60, %v2689_v60  ;;  %v2833_v42 = vadd.f32 %v2832_v63, %v2802_v53  ;;  %v2764_v29 = vadd.f32 %v2763_v1, %v2689_v60  ;;  %v2805_v19 = vmul.f32 %v2697_v61, %v2697_v61 }
 0x1b9   : > { %v2048_v48 = vadd.f32 %v2047_v31, %v2017_v39  ;;  %v4096_v13 = vpop.f32.mrb[68].mxu1  ;;  %v4344_v28 = vpop.f32.mrb[68].mxu0  ;;  %v2416_v63 = vrot.slane %v2415_v8, 2 }
 0x1ba   : > { %v2710_v30 = vadd.f32 %v4344_v28, %v5539_v45  ;;  %v4097_v32 = vpop.f32.mrb[69].mxu1  ;;  %v2701_v41 = vpop.f32.mrb[69].mxu0  ;;  %v2765_v37 = vadd.f32 %v2764_v29, %v2694_v59  ;;  %v2834_v9 = vadd.f32 %v2833_v42, %v2803_v14 }
 0x1bb   : > { %v4098_v47 = vadd.f32 %v4097_v32, %v4096_v13  ;;  %v2702_v2 = vadd.f32 %v2701_v41, %v5543_v54  ;;  %v4099_v51 = vpop.f32.mrb[70].mxu1  ;;  %v4345_v38 = vpop.f32.mrb[70].mxu0 }
 0x1bc   : > { %v2713_v27 = vadd.f32 %v4345_v38, %v5547_v6  ;;  %v4100_v26 = vpop.f32.mrb[71].mxu1  ;;  %v2704_v23 = vpop.f32.mrb[71].mxu0  ;;  %v2835_v39 = vadd.f32 %v2834_v9, %v2804_v62  ;;  %v2766_v52 = vadd.f32 %v2765_v37, %v2697_v61  ;;  %v2417_v61 = vadd.f32 %v2416_v63, %v2415_v8 }
 0x1bd   : > { %v1979_v53 = vadd.f32 %v4098_v47, %v1978_v17  ;;  %v2018_v60 = vmul.f32 %v4098_v47, %v4098_v47  ;;  %v4101_v31 = vadd.f32 %v4100_v26, %v4099_v51  ;;  %v2806_v57 = vmul.f32 %v2702_v2, %v2702_v2 }
 0x1be   : > { %v2705_v1 = vadd.f32 %v2704_v23, %v5551_v50  ;;  %v2767_v41 = vadd.f32 %v2766_v52, %v2702_v2  ;;  %v2836_v59 = vadd.f32 %v2835_v39, %v2805_v19  ;;  %v2485_v62 = vadd.f32 %v2484_v56, %v5623_v18 }
 0x1bf   : > { %v2049_v13 = vadd.f32 %v2048_v48, %v2018_v60  ;;  %v1980_v28 = vadd.f32 %v4101_v31, %v1979_v53  ;;  %v2019_v32 = vmul.f32 %v4101_v31, %v4101_v31  ;;  %v2808_v2 = vmul.f32 %v2710_v30, %v2710_v30 }
 0x1c0   : > { %v2807_v14 = vmul.f32 %v2705_v1, %v2705_v1  ;;  %v2837_v6 = vadd.f32 %v2836_v59, %v2806_v57  ;;  %v2768_v54 = vadd.f32 %v2767_v41, %v2705_v1  ;;  %v2809_v39 = vmul.f32 %v2713_v27, %v2713_v27 }
 0x1c1   : > { %v2050_v42 = vadd.f32 %v2049_v13, %v2019_v32  ;;  %v4102_v29 = vpop.f32.mrb[72].mxu1  ;;  %v4348_v38 = vpop.f32.mrb[72].mxu0  ;;  %v2486_v56 = vrot.slane %v2485_v62, 2 }
 0x1c2   : > { %v2726_v17 = vadd.f32 %v4348_v38, %v5555_v44  ;;  %v4103_v47 = vpop.f32.mrb[73].mxu1  ;;  %v2717_v51 = vpop.f32.mrb[73].mxu0  ;;  %v2769_v23 = vadd.f32 %v2768_v54, %v2710_v30  ;;  %v2838_v19 = vadd.f32 %v2837_v6, %v2807_v14 }
 0x1c3   : > { %v4104_v37 = vadd.f32 %v4103_v47, %v4102_v29  ;;  %v2718_v48 = vadd.f32 %v2717_v51, %v5559_v33  ;;  %v4105_v9 = vpop.f32.mrb[74].mxu1  ;;  %v4349_v26 = vpop.f32.mrb[74].mxu0 }
 0x1c4   : > { %v2729_v53 = vadd.f32 %v4349_v26, %v5563_v4  ;;  %v4106_v60 = vpop.f32.mrb[75].mxu1  ;;  %v2720_v31 = vpop.f32.mrb[75].mxu0  ;;  %v2839_v13 = vadd.f32 %v2838_v19, %v2808_v2  ;;  %v2770_v8 = vadd.f32 %v2769_v23, %v2713_v27  ;;  %v2418_v27 = vrot.slane %v2417_v61, 1 }
 0x1c5   : > { %v1981_v52 = vadd.f32 %v4104_v37, %v1980_v28  ;;  %v2020_v57 = vmul.f32 %v4104_v37, %v4104_v37  ;;  %v4107_v1 = vadd.f32 %v4106_v60, %v4105_v9  ;;  %v2810_v63 = vmul.f32 %v2718_v48, %v2718_v48 }
 0x1c6   : > { %v2721_v18 = vadd.f32 %v2720_v31, %v5567_v43  ;;  %v2771_v29 = vadd.f32 %v2770_v8, %v2718_v48  ;;  %v2840_v54 = vadd.f32 %v2839_v13, %v2809_v39  ;;  %v5654_v26 = vadd.f32 %v2486_v56, %v2485_v62 }
 0x1c7   : > { %v2051_v32 = vadd.f32 %v2050_v42, %v2020_v57  ;;  %v1982_v41 = vadd.f32 %v4107_v1, %v1981_v52  ;;  %v2021_v59 = vmul.f32 %v4107_v1, %v4107_v1  ;;  %v2812_v48 = vmul.f32 %v2726_v17, %v2726_v17 }
 0x1c8   : > { %v2811_v6 = vmul.f32 %v2721_v18, %v2721_v18  ;;  %v2841_v47 = vadd.f32 %v2840_v54, %v2810_v63  ;;  %v2772_v51 = vadd.f32 %v2771_v29, %v2721_v18  ;;  %v2813_v1 = vmul.f32 %v2729_v53, %v2729_v53 }
 0x1c9   : > { %v2052_v30 = vadd.f32 %v2051_v32, %v2021_v59  ;;  %v4108_v14 = vpop.f32.mrb[76].mxu1  ;;  %v4352_v38 = vpop.f32.mrb[76].mxu0 }
 0x1ca   : > { %v2742_v28 = vadd.f32 %v4352_v38, %v5571_v36  ;;  %v4109_v37 = vpop.f32.mrb[77].mxu1  ;;  %v2733_v9 = vpop.f32.mrb[77].mxu0  ;;  %v2773_v60 = vadd.f32 %v2772_v51, %v2726_v17  ;;  %v2842_v31 = vadd.f32 %v2841_v47, %v2811_v6 }
 0x1cb   : > { %v4110_v2 = vadd.f32 %v4109_v37, %v4108_v14  ;;  %v2734_v42 = vadd.f32 %v2733_v9, %v5575_v12  ;;  %v4111_v23 = vpop.f32.mrb[78].mxu1  ;;  %v4353_v19 = vpop.f32.mrb[78].mxu0  ;;  %v5660_v14 = vadd.f32 %v2418_v27, %v2417_v61 }
 0x1cc   : > { %v2745_v39 = vadd.f32 %v4353_v19, %v5579_v11  ;;  %v4112_v52 = vpop.f32.mrb[79].mxu1  ;;  %v2736_v57 = vpop.f32.mrb[79].mxu0  ;;  %v2843_v18 = vadd.f32 %v2842_v31, %v2812_v48  ;;  %v2774_v62 = vadd.f32 %v2773_v60, %v2729_v53  ;;  %v2816_v47 = vmul.f32 %v2742_v28, %v2742_v28 }
 0x1cd   : > { %v1983_v13 = vadd.f32 %v4110_v2, %v1982_v41  ;;  %v2022_v8 = vmul.f32 %v4110_v2, %v4110_v2  ;;  %v4113_v63 = vadd.f32 %v4112_v52, %v4111_v23  ;;  %v2814_v56 = vmul.f32 %v2734_v42, %v2734_v42 }
 0x1ce   : > { %v2737_v32 = vadd.f32 %v2736_v57, %v5583_v25  ;;  %v2775_v17 = vadd.f32 %v2774_v62, %v2734_v42  ;;  %v2844_v6 = vadd.f32 %v2843_v18, %v2813_v1  ;;  %v2488_v41 = vrot.slane %v5654_v26, 1 }
 0x1cf   : > { %v2053_v59 = vadd.f32 %v2052_v30, %v2022_v8  ;;  %v1984_v29 = vadd.f32 %v4113_v63, %v1983_v13  ;;  %v2023_v54 = vmul.f32 %v4113_v63, %v4113_v63  ;;  %v2817_v1 = vmul.f32 %v2745_v39, %v2745_v39 }
 0x1d0   : > { %v2815_v38 = vmul.f32 %v2737_v32, %v2737_v32  ;;  %v2845_v2 = vadd.f32 %v2844_v6, %v2814_v56  ;;  %v2776_v23 = vadd.f32 %v2775_v17, %v2737_v32 }
 0x1d1   : > { %v1985_v51 = vrot.slane %v1984_v29, 4  ;;  %v2054_v37 = vadd.f32 %v2053_v59, %v2023_v54  ;;  %v4372_v53 = vpop.f32.mrb[80].mxu1  ;;  %v4420_v9 = vpop.f32.mrb[80].mxu0 }
 0x1d2   : > { %v2995_v30 = vadd.f32 %v4372_v53, %v5519_v10  ;;  %v3360_v19 = vadd.f32 %v4420_v9, %v5519_v10  ;;  %v2986_v61 = vpop.f32.mrb[81].mxu1  ;;  %v3351_v27 = vpop.f32.mrb[81].mxu0  ;;  %v2777_v13 = vadd.f32 %v2776_v23, %v2742_v28  ;;  %v2846_v8 = vadd.f32 %v2845_v2, %v2815_v38 }
 0x1d3   : > { %v1986_v42 = vadd.f32 %v1985_v51, %v1984_v29  ;;  %v2055_v48 = vrot.slane %v2054_v37, 4  ;;  %v2987_v60 = vadd.f32 %v2986_v61, %v5523_v7  ;;  %v3352_v31 = vadd.f32 %v3351_v27, %v5523_v7  ;;  %v4373_v52 = vpop.f32.mrb[82].mxu1  ;;  %v4421_v57 = vpop.f32.mrb[82].mxu0 }
 0x1d4   : > { %v3153_v63 = vmul.f32 %v2995_v30, %v2995_v30  ;;  %v2989_v18 = vpop.f32.mrb[83].mxu1  ;;  %v3354_v62 = vpop.f32.mrb[83].mxu0  ;;  %v3518_v32 = vmul.f32 %v3360_v19, %v3360_v19  ;;  %v2778_v54 = vadd.f32 %v2777_v13, %v2745_v39  ;;  %v2847_v17 = vadd.f32 %v2846_v8, %v2816_v47 }
 0x1d5   : > { %v1987_v56 = vrot.slane %v1986_v42, 2  ;;  %v2056_v10 = vadd.f32 %v2055_v48, %v2054_v37  ;;  %v3151_v59 = vmul.f32 %v2987_v60, %v2987_v60  ;;  %v2998_v29 = vadd.f32 %v4373_v52, %v5527_v15 }
 0x1d6   : > { %v3363_v6 = vadd.f32 %v4421_v57, %v5527_v15  ;;  %v2990_v28 = vadd.f32 %v2989_v18, %v5531_v34  ;;  %v3355_v38 = vadd.f32 %v3354_v62, %v5531_v34  ;;  %v2779_v53 = vrot.slane %v2778_v54, 4 }
 0x1d7   : > { %v1988_v7 = vadd.f32 %v1987_v56, %v1986_v42  ;;  %v2057_v51 = vrot.slane %v2056_v10, 2  ;;  %v2848_v9 = vadd.f32 %v2847_v17, %v2817_v1  ;;  %v3516_v37 = vmul.f32 %v3352_v31, %v3352_v31 }
 0x1d8   : > { %v3154_v2 = vmul.f32 %v2998_v29, %v2998_v29  ;;  %v3113_v47 = vadd.f32 %v2990_v28, %v2987_v60  ;;  %v3152_v61 = vmul.f32 %v2990_v28, %v2990_v28  ;;  %v2780_v42 = vadd.f32 %v2779_v53, %v2778_v54 }
 0x1d9   : > { %v1989_v23 = vrot.slane %v1988_v7, 1  ;;  %v2058_v39 = vadd.f32 %v2057_v51, %v2056_v10  ;;  %v4376_v27 = vpop.f32.mrb[84].mxu1  ;;  %v4424_v15 = vpop.f32.mrb[84].mxu0  ;;  %v2849_v48 = vrot.slane %v2848_v9, 4  ;;  %v3478_v52 = vadd.f32 %v3355_v38, %v3352_v31 }
 0x1da   : > { %v3517_v57 = vmul.f32 %v3355_v38, %v3355_v38  ;;  %v3002_v34 = vpop.f32.mrb[85].mxu1  ;;  %v3367_v13 = vpop.f32.mrb[85].mxu0  ;;  %v3114_v18 = vadd.f32 %v3113_v47, %v2995_v30  ;;  %v3183_v62 = vadd.f32 %v3152_v61, %v3151_v59  ;;  %v2781_v10 = vrot.slane %v2780_v42, 2 }
 0x1db   : > { %v1990_v1 = vadd.f32 %v1989_v23, %v1988_v7  ;;  %v2059_v8 = vrot.slane %v2058_v39, 1  ;;  %v4377_v56 = vpop.f32.mrb[86].mxu1  ;;  %v4425_v60 = vpop.f32.mrb[86].mxu0  ;;  %v2850_v17 = vadd.f32 %v2849_v48, %v2848_v9  ;;  %v3479_v51 = vadd.f32 %v3478_v52, %v3360_v19 }
 0x1dc   : > { %v3548_v28 = vadd.f32 %v3517_v57, %v3516_v37  ;;  %v3005_v54 = vpop.f32.mrb[87].mxu1  ;;  %v3370_v53 = vpop.f32.mrb[87].mxu0  ;;  %v3184_v38 = vadd.f32 %v3183_v62, %v3153_v63  ;;  %v3011_v7 = vadd.f32 %v4376_v27, %v5537_v49  ;;  %v3376_v30 = vadd.f32 %v4424_v15, %v5537_v49 }
 0x1dd   : > { %1991 = vst [vmem:[%s903_s26] sm:$0xff] %v1990_v1  ;;  %v2060_v31 = vadd.f32 %v2059_v8, %v2058_v39  ;;  %v2782_v59 = vadd.f32 %v2781_v10, %v2780_v42  ;;  %v2851_v23 = vrot.slane %v2850_v17, 2  ;;  %v3003_v61 = vadd.f32 %v3002_v34, %v5541_v22  ;;  %v5825_v42 = vld [vmem:[#allocation4_spill] sm:$0xff] }
 0x1de   : > { %v3549_v47 = vadd.f32 %v3548_v28, %v3518_v32  ;;  %v2489_v9 = vadd.f32 %v2488_v41, %v5654_v26  ;;  %v3519_v19 = vmul.f32 %v3363_v6, %v3363_v6  ;;  %v3115_v37 = vadd.f32 %v3114_v18, %v2998_v29 }
 0x1df   : > { %2061 = vst [vmem:[%s907_s11] sm:$0xff] %v2060_v31  ;;  %v3185_v48 = vadd.f32 %v3184_v38, %v3154_v2  ;;  %v2783_v52 = vrot.slane %v2782_v59, 1  ;;  %v2852_v39 = vadd.f32 %v2851_v23, %v2850_v17  ;;  %v3155_v63 = vmul.f32 %v3003_v61, %v3003_v61 }
 0x1e0   : > { %v3368_v27 = vadd.f32 %v3367_v13, %v5541_v22  ;;  %v3116_v57 = vadd.f32 %v3115_v37, %v3003_v61  ;;  %v3480_v49 = vadd.f32 %v3479_v51, %v3363_v6  ;;  %v3550_v15 = vadd.f32 %v3549_v47, %v3519_v19 }
 0x1e1   : > { %v3014_v32 = vadd.f32 %v4377_v56, %v5825_v42  ;;  %v4380_v1 = vpop.f32.mrb[88].mxu1  ;;  %v4428_v34 = vpop.f32.mrb[88].mxu0  ;;  %v2784_v8 = vadd.f32 %v2783_v52, %v2782_v59  ;;  %v2853_v62 = vrot.slane %v2852_v39, 1  ;;  %v3186_v10 = vadd.f32 %v3185_v48, %v3155_v63 }
 0x1e2   : > { %v3520_v26 = vmul.f32 %v3368_v27, %v3368_v27  ;;  %v3018_v41 = vpop.f32.mrb[89].mxu1  ;;  %v3383_v28 = vpop.f32.mrb[89].mxu0  ;;  %v3157_v29 = vmul.f32 %v3011_v7, %v3011_v7  ;;  %v3481_v2 = vadd.f32 %v3480_v49, %v3368_v27  ;;  %v3379_v18 = vadd.f32 %v4425_v60, %v5825_v42 }
 0x1e3   : > { %v3006_v17 = vadd.f32 %v3005_v54, %v5549_v35  ;;  %v4381_v22 = vpop.f32.mrb[90].mxu1  ;;  %v4429_v13 = vpop.f32.mrb[90].mxu0  ;;  %v5695_v6 = vadd.f32 %v2784_v8, %v5660_v14  ;;  %v2854_v56 = vadd.f32 %v2853_v62, %v2852_v39  ;;  %v3371_v31 = vadd.f32 %v3370_v53, %v5549_v35 }
 0x1e4   : > { %v3551_v51 = vadd.f32 %v3550_v15, %v3520_v26  ;;  %v3021_v38 = vpop.f32.mrb[91].mxu1  ;;  %v3386_v59 = vpop.f32.mrb[91].mxu0  ;;  %v3522_v23 = vmul.f32 %v3376_v30, %v3376_v30  ;;  %v3027_v19 = vadd.f32 %v4380_v1, %v5553_v46  ;;  %v3392_v48 = vadd.f32 %v4428_v34, %v5553_v46  ;;  %v5826_v1 = vld [vmem:[#allocation6_spill] sm:$0xff] }
 0x1e5   : > { %v3117_v47 = vadd.f32 %v3116_v57, %v3006_v17  ;;  %v3156_v61 = vmul.f32 %v3006_v17, %v3006_v17  ;;  %v5699_v37 = vadd.f32 %v2854_v56, %v2489_v9  ;;  %v3482_v60 = vadd.f32 %v3481_v2, %v3371_v31 }
 0x1e6   : > { %v3521_v54 = vmul.f32 %v3371_v31, %v3371_v31  ;;  %v3158_v52 = vmul.f32 %v3014_v32, %v3014_v32  ;;  %v3019_v39 = vadd.f32 %v3018_v41, %v5557_v16  ;;  %v3523_v27 = vmul.f32 %v3379_v18, %v3379_v18 }
 0x1e7   : > { %v3118_v14 = vadd.f32 %v3117_v47, %v3011_v7  ;;  %v3187_v63 = vadd.f32 %v3186_v10, %v3156_v61  ;;  %v3483_v35 = vadd.f32 %v3482_v60, %v3376_v30  ;;  %v3384_v49 = vadd.f32 %v3383_v28, %v5557_v16 }
 0x1e8   : > { %v3552_v53 = vadd.f32 %v3551_v51, %v3521_v54  ;;  %v3159_v42 = vmul.f32 %v3019_v39, %v3019_v39  ;;  %v3030_v9 = vadd.f32 %v4381_v22, %v5826_v1  ;;  %v3395_v7 = vadd.f32 %v4429_v13, %v5826_v1 }
 0x1e9   : > { %v3188_v57 = vadd.f32 %v3187_v63, %v3157_v29  ;;  %v3119_v15 = vadd.f32 %v3118_v14, %v3014_v32  ;;  %v4384_v8 = vpop.f32.mrb[92].mxu1  ;;  %v4432_v62 = vpop.f32.mrb[92].mxu0  ;;  %v3484_v2 = vadd.f32 %v3483_v35, %v3379_v18  ;;  %v3524_v46 = vmul.f32 %v3384_v49, %v3384_v49 }
 0x1ea   : > { %v3553_v26 = vadd.f32 %v3552_v53, %v3522_v23  ;;  %v3034_v34 = vpop.f32.mrb[93].mxu1  ;;  %v3399_v10 = vpop.f32.mrb[93].mxu0  ;;  %v3161_v41 = vmul.f32 %v3027_v19, %v3027_v19  ;;  %v3022_v56 = vadd.f32 %v3021_v38, %v5565_v40  ;;  %v3526_v32 = vmul.f32 %v3392_v48, %v3392_v48 }
 0x1eb   : > { %v3120_v17 = vadd.f32 %v3119_v15, %v3019_v39  ;;  %v3189_v30 = vadd.f32 %v3188_v57, %v3158_v52  ;;  %v4385_v16 = vpop.f32.mrb[94].mxu1  ;;  %v4433_v28 = vpop.f32.mrb[94].mxu0  ;;  %v3485_v29 = vadd.f32 %v3484_v2, %v3384_v49  ;;  %v3387_v22 = vadd.f32 %v3386_v59, %v5565_v40 }
 0x1ec   : > { %v3554_v51 = vadd.f32 %v3553_v26, %v3523_v27  ;;  %v3037_v31 = vpop.f32.mrb[95].mxu1  ;;  %v3402_v23 = vpop.f32.mrb[95].mxu0  ;;  %v3160_v61 = vmul.f32 %v3022_v56, %v3022_v56  ;;  %v3043_v13 = vadd.f32 %v4384_v8, %v5569_v24  ;;  %v3408_v52 = vadd.f32 %v4432_v62, %v5569_v24 }
 0x1ed   : > { %v3190_v18 = vadd.f32 %v3189_v30, %v3159_v42  ;;  %v3121_v47 = vadd.f32 %v3120_v17, %v3022_v56  ;;  %v3486_v54 = vadd.f32 %v3485_v29, %v3387_v22  ;;  %v3525_v14 = vmul.f32 %v3387_v22, %v3387_v22 }
 0x1ee   : > { %v3555_v60 = vadd.f32 %v3554_v51, %v3524_v46  ;;  %v3162_v38 = vmul.f32 %v3030_v9, %v3030_v9  ;;  %v3035_v35 = vadd.f32 %v3034_v34, %v5573_v5  ;;  %v3527_v27 = vmul.f32 %v3395_v7, %v3395_v7 }
 0x1ef   : > { %v3122_v63 = vadd.f32 %v3121_v47, %v3027_v19  ;;  %v3191_v39 = vadd.f32 %v3190_v18, %v3160_v61  ;;  %v3487_v53 = vadd.f32 %v3486_v54, %v3392_v48  ;;  %v3400_v59 = vadd.f32 %v3399_v10, %v5573_v5 }
 0x1f0   : > { %v3556_v40 = vadd.f32 %v3555_v60, %v3525_v14  ;;  %v3163_v15 = vmul.f32 %v3035_v35, %v3035_v35  ;;  %v3046_v42 = vadd.f32 %v4385_v16, %v5577_v21  ;;  %v3411_v19 = vadd.f32 %v4433_v28, %v5577_v21 }
 0x1f1   : > { %v3192_v49 = vadd.f32 %v3191_v39, %v3161_v41  ;;  %v3123_v57 = vadd.f32 %v3122_v63, %v3030_v9  ;;  %v4388_v1 = vpop.f32.mrb[96].mxu1  ;;  %v4436_v8 = vpop.f32.mrb[96].mxu0  ;;  %v3488_v2 = vadd.f32 %v3487_v53, %v3395_v7  ;;  %v3528_v24 = vmul.f32 %v3400_v59, %v3400_v59 }
 0x1f2   : > { %v3557_v26 = vadd.f32 %v3556_v40, %v3526_v32  ;;  %v3050_v62 = vpop.f32.mrb[97].mxu1  ;;  %v3415_v46 = vpop.f32.mrb[97].mxu0  ;;  %v3165_v34 = vmul.f32 %v3043_v13, %v3043_v13  ;;  %v3038_v30 = vadd.f32 %v3037_v31, %v5581_v58  ;;  %v3530_v9 = vmul.f32 %v3408_v52, %v3408_v52 }
 0x1f3   : > { %v3124_v17 = vadd.f32 %v3123_v57, %v3035_v35  ;;  %v3193_v48 = vadd.f32 %v3192_v49, %v3162_v38  ;;  %v4389_v5 = vpop.f32.mrb[98].mxu1  ;;  %v4437_v10 = vpop.f32.mrb[98].mxu0  ;;  %v3489_v41 = vadd.f32 %v3488_v2, %v3400_v59  ;;  %v3403_v16 = vadd.f32 %v3402_v23, %v5581_v58 }
 0x1f4   : > { %v3558_v56 = vadd.f32 %v3557_v26, %v3527_v27  ;;  %v3053_v29 = vpop.f32.mrb[99].mxu1  ;;  %v3418_v32 = vpop.f32.mrb[99].mxu0  ;;  %v3164_v22 = vmul.f32 %v3038_v30, %v3038_v30  ;;  %v3059_v21 = vadd.f32 %v4388_v1, %v5521_v55  ;;  %v3424_v61 = vadd.f32 %v4436_v8, %v5521_v55 }
 0x1f5   : > { %v3194_v7 = vadd.f32 %v3193_v48, %v3163_v15  ;;  %v3125_v51 = vadd.f32 %v3124_v17, %v3038_v30  ;;  %v3490_v18 = vadd.f32 %v3489_v41, %v3403_v16  ;;  %v3529_v47 = vmul.f32 %v3403_v16, %v3403_v16 }
 0x1f6   : > { %v3559_v28 = vadd.f32 %v3558_v56, %v3528_v24  ;;  %v3166_v31 = vmul.f32 %v3046_v42, %v3046_v42  ;;  %v3051_v14 = vadd.f32 %v3050_v62, %v5525_v3  ;;  %v3531_v38 = vmul.f32 %v3411_v19, %v3411_v19 }
 0x1f7   : > { %v3126_v60 = vadd.f32 %v3125_v51, %v3043_v13  ;;  %v3195_v54 = vadd.f32 %v3194_v7, %v3164_v22  ;;  %v3491_v63 = vadd.f32 %v3490_v18, %v3408_v52  ;;  %v3416_v23 = vadd.f32 %v3415_v46, %v5525_v3  ;;  %v5827_v51 = vld [vmem:[#allocation3_spill] sm:$0xff] }
 0x1f8   : > { %v3560_v58 = vadd.f32 %v3559_v28, %v3529_v47  ;;  %v3167_v27 = vmul.f32 %v3051_v14, %v3051_v14  ;;  %v3062_v53 = vadd.f32 %v4389_v5, %v5529_v0  ;;  %v3427_v13 = vadd.f32 %v4437_v10, %v5529_v0 }
 0x1f9   : > { %v3196_v39 = vadd.f32 %v3195_v54, %v3165_v34  ;;  %v3127_v35 = vadd.f32 %v3126_v60, %v3046_v42  ;;  %v4392_v40 = vpop.f32.mrb[100].mxu1  ;;  %v4440_v59 = vpop.f32.mrb[100].mxu0  ;;  %v3492_v57 = vadd.f32 %v3491_v63, %v3411_v19  ;;  %v3532_v55 = vmul.f32 %v3416_v23, %v3416_v23  ;;  %v5828_v54 = vld [vmem:[#allocation5_spill] sm:$0xff] }
 0x1fa   : > { %v3561_v49 = vadd.f32 %v3560_v58, %v3530_v9  ;;  %v3066_v15 = vpop.f32.mrb[101].mxu1  ;;  %v3431_v1 = vpop.f32.mrb[101].mxu0  ;;  %v3169_v8 = vmul.f32 %v3059_v21, %v3059_v21  ;;  %v3054_v2 = vadd.f32 %v3053_v29, %v5533_v20  ;;  %v3534_v42 = vmul.f32 %v3424_v61, %v3424_v61 }
 0x1fb   : > { %v3128_v26 = vadd.f32 %v3127_v35, %v3051_v14  ;;  %v3197_v52 = vadd.f32 %v3196_v39, %v3166_v31  ;;  %v4393_v3 = vpop.f32.mrb[102].mxu1  ;;  %v4441_v24 = vpop.f32.mrb[102].mxu0  ;;  %v3493_v62 = vadd.f32 %v3492_v57, %v3416_v23  ;;  %v3419_v34 = vadd.f32 %v3418_v32, %v5533_v20 }
 0x1fc   : > { %v3562_v46 = vadd.f32 %v3561_v49, %v3531_v38  ;;  %v3069_v17 = vpop.f32.mrb[103].mxu1  ;;  %v3434_v48 = vpop.f32.mrb[103].mxu0  ;;  %v3168_v5 = vmul.f32 %v3054_v2, %v3054_v2  ;;  %v3075_v0 = vadd.f32 %v4392_v40, %v5539_v45  ;;  %v3440_v56 = vadd.f32 %v4440_v59, %v5539_v45 }
 0x1fd   : > { %v3198_v19 = vadd.f32 %v3197_v52, %v3167_v27  ;;  %v3129_v30 = vadd.f32 %v3128_v26, %v3054_v2  ;;  %v3494_v9 = vadd.f32 %v3493_v62, %v3419_v34  ;;  %v3533_v41 = vmul.f32 %v3419_v34, %v3419_v34 }
 0x1fe   : > { %v3563_v10 = vadd.f32 %v3562_v46, %v3532_v55  ;;  %v3170_v16 = vmul.f32 %v3062_v53, %v3062_v53  ;;  %v3067_v22 = vadd.f32 %v3066_v15, %v5827_v51  ;;  %v3535_v28 = vmul.f32 %v3427_v13, %v3427_v13 }
 0x1ff   : > { %v3130_v29 = vadd.f32 %v3129_v30, %v3059_v21  ;;  %v3199_v7 = vadd.f32 %v3198_v19, %v3168_v5  ;;  %v3495_v18 = vadd.f32 %v3494_v9, %v3424_v61  ;;  %v3432_v32 = vadd.f32 %v3431_v1, %v5827_v51 }
 0x200   : > { %v3564_v20 = vadd.f32 %v3563_v10, %v3533_v41  ;;  %v3171_v60 = vmul.f32 %v3067_v22, %v3067_v22  ;;  %v3078_v14 = vadd.f32 %v4393_v3, %v5828_v54  ;;  %v3443_v21 = vadd.f32 %v4441_v24, %v5828_v54 }
 0x201   : > { %v3200_v47 = vadd.f32 %v3199_v7, %v3169_v8  ;;  %v3131_v31 = vadd.f32 %v3130_v29, %v3062_v53  ;;  %v4396_v38 = vpop.f32.mrb[104].mxu1  ;;  %v4444_v63 = vpop.f32.mrb[104].mxu0  ;;  %v3496_v23 = vadd.f32 %v3495_v18, %v3427_v13  ;;  %v3536_v45 = vmul.f32 %v3432_v32, %v3432_v32 }
 0x202   : > { %v3565_v58 = vadd.f32 %v3564_v20, %v3534_v42  ;;  %v3082_v39 = vpop.f32.mrb[105].mxu1  ;;  %v3447_v35 = vpop.f32.mrb[105].mxu0  ;;  %v3173_v27 = vmul.f32 %v3075_v0, %v3075_v0  ;;  %v3070_v59 = vadd.f32 %v3069_v17, %v5551_v50  ;;  %v3538_v53 = vmul.f32 %v3440_v56, %v3440_v56 }
 0x203   : > { %v3132_v40 = vadd.f32 %v3131_v31, %v3067_v22  ;;  %v3201_v61 = vadd.f32 %v3200_v47, %v3170_v16  ;;  %v4397_v49 = vpop.f32.mrb[106].mxu1  ;;  %v4445_v57 = vpop.f32.mrb[106].mxu0  ;;  %v3497_v55 = vadd.f32 %v3496_v23, %v3432_v32  ;;  %v3435_v1 = vadd.f32 %v3434_v48, %v5551_v50 }
 0x204   : > { %v3566_v15 = vadd.f32 %v3565_v58, %v3535_v28  ;;  %v3085_v8 = vpop.f32.mrb[107].mxu1  ;;  %v3450_v26 = vpop.f32.mrb[107].mxu0  ;;  %v3172_v2 = vmul.f32 %v3070_v59, %v3070_v59  ;;  %v3091_v3 = vadd.f32 %v4396_v38, %v5555_v44  ;;  %v3456_v46 = vadd.f32 %v4444_v63, %v5555_v44 }
 0x205   : > { %v3202_v13 = vadd.f32 %v3201_v61, %v3171_v60  ;;  %v3133_v52 = vadd.f32 %v3132_v40, %v3070_v59  ;;  %v3498_v42 = vadd.f32 %v3497_v55, %v3435_v1  ;;  %v3537_v62 = vmul.f32 %v3435_v1, %v3435_v1 }
 0x206   : > { %v3567_v24 = vadd.f32 %v3566_v15, %v3536_v45  ;;  %v3174_v34 = vmul.f32 %v3078_v14, %v3078_v14  ;;  %v3083_v30 = vadd.f32 %v3082_v39, %v5559_v33  ;;  %v3539_v5 = vmul.f32 %v3443_v21, %v3443_v21 }
 0x207   : > { %v3134_v17 = vadd.f32 %v3133_v52, %v3075_v0  ;;  %v3203_v19 = vadd.f32 %v3202_v13, %v3172_v2  ;;  %v3499_v10 = vadd.f32 %v3498_v42, %v3440_v56  ;;  %v3448_v48 = vadd.f32 %v3447_v35, %v5559_v33 }
 0x208   : > { %v3568_v50 = vadd.f32 %v3567_v24, %v3537_v62  ;;  %v3175_v16 = vmul.f32 %v3083_v30, %v3083_v30  ;;  %v3094_v29 = vadd.f32 %v4397_v49, %v5563_v4  ;;  %v3459_v0 = vadd.f32 %v4445_v57, %v5563_v4 }
 0x209   : > { %v3204_v9 = vadd.f32 %v3203_v19, %v3173_v27  ;;  %v3135_v41 = vadd.f32 %v3134_v17, %v3078_v14  ;;  %v4400_v7 = vpop.f32.mrb[108].mxu1  ;;  %v4448_v51 = vpop.f32.mrb[108].mxu0  ;;  %v3500_v28 = vadd.f32 %v3499_v10, %v3443_v21  ;;  %v3540_v44 = vmul.f32 %v3448_v48, %v3448_v48 }
 0x20a   : > { %v3569_v22 = vadd.f32 %v3568_v50, %v3538_v53  ;;  %v3098_v18 = vpop.f32.mrb[109].mxu1  ;;  %v3463_v20 = vpop.f32.mrb[109].mxu0  ;;  %v3177_v32 = vmul.f32 %v3091_v3, %v3091_v3  ;;  %v3086_v31 = vadd.f32 %v3085_v8, %v5567_v43  ;;  %v3542_v54 = vmul.f32 %v3456_v46, %v3456_v46 }
 0x20b   : > { %v3136_v47 = vadd.f32 %v3135_v41, %v3083_v30  ;;  %v3205_v56 = vadd.f32 %v3204_v9, %v3174_v34  ;;  %v4401_v33 = vpop.f32.mrb[110].mxu1  ;;  %v4449_v60 = vpop.f32.mrb[110].mxu0  ;;  %v3501_v14 = vadd.f32 %v3500_v28, %v3448_v48  ;;  %v3451_v63 = vadd.f32 %v3450_v26, %v5567_v43 }
 0x20c   : > { %v3570_v38 = vadd.f32 %v3569_v22, %v3539_v5  ;;  %v3101_v58 = vpop.f32.mrb[111].mxu1  ;;  %v3466_v23 = vpop.f32.mrb[111].mxu0  ;;  %v3176_v39 = vmul.f32 %v3086_v31, %v3086_v31  ;;  %v3107_v4 = vadd.f32 %v4400_v7, %v5571_v36  ;;  %v3472_v61 = vadd.f32 %v4448_v51, %v5571_v36 }
 0x20d   : > { %v3206_v45 = vadd.f32 %v3205_v56, %v3175_v16  ;;  %v3137_v21 = vadd.f32 %v3136_v47, %v3086_v31  ;;  %v3502_v27 = vadd.f32 %v3501_v14, %v3451_v63  ;;  %v3541_v40 = vmul.f32 %v3451_v63, %v3451_v63 }
 0x20e   : > { %v3571_v35 = vadd.f32 %v3570_v38, %v3540_v44  ;;  %v3178_v59 = vmul.f32 %v3094_v29, %v3094_v29  ;;  %v3099_v53 = vadd.f32 %v3098_v18, %v5575_v12  ;;  %v3543_v55 = vmul.f32 %v3459_v0, %v3459_v0 }
 0x20f   : > { %v3138_v49 = vadd.f32 %v3137_v21, %v3091_v3  ;;  %v3207_v57 = vadd.f32 %v3206_v45, %v3176_v39  ;;  %v3503_v15 = vadd.f32 %v3502_v27, %v3456_v46  ;;  %v3464_v1 = vadd.f32 %v3463_v20, %v5575_v12 }
 0x210   : > { %v3572_v43 = vadd.f32 %v3571_v35, %v3541_v40  ;;  %v3179_v13 = vmul.f32 %v3099_v53, %v3099_v53  ;;  %v3110_v52 = vadd.f32 %v4401_v33, %v5579_v11  ;;  %v3475_v36 = vadd.f32 %v4449_v60, %v5579_v11 }
 0x211   : > { %v3208_v8 = vadd.f32 %v3207_v57, %v3177_v32  ;;  %v3139_v26 = vadd.f32 %v3138_v49, %v3094_v29  ;;  %v3504_v24 = vadd.f32 %v3503_v15, %v3459_v0  ;;  %v3544_v42 = vmul.f32 %v3464_v1, %v3464_v1 }
 0x212   : > { %v3573_v2 = vadd.f32 %v3572_v43, %v3542_v54  ;;  %v3102_v34 = vadd.f32 %v3101_v58, %v5583_v25  ;;  %v3467_v46 = vadd.f32 %v3466_v23, %v5583_v25  ;;  %v3181_v9 = vmul.f32 %v3107_v4, %v3107_v4 }
 0x213   : > { %v3140_v62 = vadd.f32 %v3139_v26, %v3099_v53  ;;  %v3209_v3 = vadd.f32 %v3208_v8, %v3178_v59  ;;  %v3505_v17 = vadd.f32 %v3504_v24, %v3464_v1  ;;  %v3546_v29 = vmul.f32 %v3472_v61, %v3472_v61 }
 0x214   : > { %v3574_v19 = vadd.f32 %v3573_v2, %v3543_v55  ;;  %v3180_v5 = vmul.f32 %v3102_v34, %v3102_v34  ;;  %v3545_v48 = vmul.f32 %v3467_v46, %v3467_v46  ;;  %v3182_v51 = vmul.f32 %v3110_v52, %v3110_v52 }
 0x215   : > { %v3210_v30 = vadd.f32 %v3209_v3, %v3179_v13  ;;  %v3141_v12 = vadd.f32 %v3140_v62, %v3102_v34  ;;  %v3506_v50 = vadd.f32 %v3505_v17, %v3467_v46  ;;  %v3547_v44 = vmul.f32 %v3475_v36, %v3475_v36 }
 0x216   : > { %v3575_v10 = vadd.f32 %v3574_v19, %v3544_v42 }
 0x217   : > { %v3142_v41 = vadd.f32 %v3141_v12, %v3107_v4  ;;  %v3211_v16 = vadd.f32 %v3210_v30, %v3180_v5  ;;  %v3507_v7 = vadd.f32 %v3506_v50, %v3472_v61 }
 0x218   : > { %v3576_v11 = vadd.f32 %v3575_v10, %v3545_v48 }
 0x219   : > { %v3143_v22 = vadd.f32 %v3142_v41, %v3110_v52  ;;  %v3212_v28 = vadd.f32 %v3211_v16, %v3181_v9  ;;  %v3508_v0 = vadd.f32 %v3507_v7, %v3475_v36 }
 0x21a   : > { %v3577_v18 = vadd.f32 %v3576_v11, %v3546_v29 }
 0x21b   : > { %v3144_v20 = vrot.slane %v3143_v22, 4  ;;  %v3213_v25 = vadd.f32 %v3212_v28, %v3182_v51  ;;  %v3509_v32 = vrot.slane %v3508_v0, 4 }
 0x21c   : > { %v3578_v47 = vadd.f32 %v3577_v18, %v3547_v44 }
 0x21d   : > { %v3145_v56 = vadd.f32 %v3144_v20, %v3143_v22  ;;  %v3214_v31 = vrot.slane %v3213_v25, 4  ;;  %v3510_v33 = vadd.f32 %v3509_v32, %v3508_v0 }
 0x21e   : > { %v3579_v60 = vrot.slane %v3578_v47, 4 }
 0x21f   : > { %v3146_v54 = vrot.slane %v3145_v56, 2  ;;  %v3215_v14 = vadd.f32 %v3214_v31, %v3213_v25  ;;  %v3511_v38 = vrot.slane %v3510_v33, 2 }
 0x220   : > { %v3580_v63 = vadd.f32 %v3579_v60, %v3578_v47 }
 0x221   : > { %v3147_v58 = vadd.f32 %v3146_v54, %v3145_v56  ;;  %v3216_v23 = vrot.slane %v3215_v14, 2  ;;  %v3512_v45 = vadd.f32 %v3511_v38, %v3510_v33 }
 0x222   : > { %v3581_v21 = vrot.slane %v3580_v63, 2 }
 0x223   : > { %v3148_v39 = vrot.slane %v3147_v58, 1  ;;  %v3217_v4 = vadd.f32 %v3216_v23, %v3215_v14  ;;  %v3513_v35 = vrot.slane %v3512_v45, 1 }
 0x224   : > { %v3582_v27 = vadd.f32 %v3581_v21, %v3580_v63 }
 0x225   : > { %v3149_v40 = vadd.f32 %v3148_v39, %v3147_v58  ;;  %v3218_v61 = vrot.slane %v3217_v4, 1  ;;  %v3514_v53 = vadd.f32 %v3513_v35, %v3512_v45 }
 0x226   : > { %v3583_v59 = vrot.slane %v3582_v27, 1 }
 0x227   : > { %v3150_v49 = vadd.f32 %v3149_v40, %v5695_v6  ;;  %v3219_v57 = vadd.f32 %v3218_v61, %v3217_v4 }
 0x228   : > { %v3584_v43 = vadd.f32 %v3583_v59, %v3582_v27 }
 0x229   : > { %v3220_v55 = vadd.f32 %v3219_v57, %v5699_v37  ;;  %v3515_v15 = vadd.f32 %v3514_v53, %v3150_v49 }
 0x22b   : > { %v3585_v1 = vadd.f32 %v3584_v43, %v3220_v55  ;;  %3586 = vst [vmem:[%s895_s16] sm:$0xff] %v3515_v15 }
 0x22d   : > { %3587 = vst [vmem:[%s899_s18] sm:$0xff] %v3585_v1 }
 0x22e PF: > { %p16_p10 = scmp.ge.s32.totalorder %s4758_s9, 4   ;;  %s5829_s27 = smov %s4688_s28 }
 0x22f   : > { %s5830_s28 = smov %s4767_s12  ;;  %s5831_s29 = smov %s4758_s9 }
 0x230   :  { %18 = sbr.rel (!%p16_p10) target bundleno = 2 (0x2), region = 158 }

// kernel: double_oct_forward.5
= control target key start
LH: loop header
LB: loop body
LE: loop exit
PB: predicated region body
PF: predicated region fallthrough
CT: control target
= control target key end

     0   :  { %s6952_s13 = smov 0   ;;  %s6954_s14 = smov 0   ;;  %s8535_s0 = inlined_call_operand.vmem [shape: bf16[4,512,128], index: 0, kind: input, shape index: {}]   ;;  %s8536_s1 = inlined_call_operand.vmem [shape: bf16[512,128], index: 1, kind: input, shape index: {}]   ;;  %s8537_s2 = inlined_call_operand.vmem [shape: bf16[128,128], index: 2, kind: input, shape index: {}]   ;;  %s8538_s3 = inlined_call_operand.vmem [shape: bf16[128,128], index: 3, kind: input, shape index: {}]   ;;  %s8539_s4 = inlined_call_operand.vmem [shape: bf16[256,128], index: 4, kind: input, shape index: {}]   ;;  %s8540_s5 = inlined_call_operand.vmem [shape: f32[1,128], index: 5, kind: input, shape index: {}]   ;;  %s8541_s6 = inlined_call_operand.vmem [shape: f32[1,128], index: 6, kind: input, shape index: {}]   ;;  %s8542_s7 = inlined_call_operand.vmem [shape: f32[1,128], index: 7, kind: input, shape index: {}]   ;;  %s8543_s8 = inlined_call_operand.vmem [shape: f32[1,128], index: 8, kind: input, shape index: {}]   ;;  %s8544_s9 = inlined_call_operand.vmem [shape: bf16[4,512,128], index: 9, kind: output, shape index: {0}]   ;;  %s8545_s10 = inlined_call_operand.vmem [shape: bf16[512,128], index: 10, kind: output, shape index: {1}]  }
   0x1   :  { %s6956_s15 = smov 0  }
   0x2 LB: > { %s6968_s16 = sadd.s32 4294967295, %s6895_s15   ;;  %s6971_s17 = sadd.s32 1, %s6895_s15   ;;  %s6895_s15 = sphi %s6956_s15, %s8585_s15   ;;  %s6891_s14 = sphi %s6954_s14, %s8584_s14   ;;  %s6887_s13 = sphi %s6952_s13, %s8583_s13  }
   0x3   : > { %s25_s18 = ssub.s32 %s6895_s15, %s6971_s17  ;;  %s28_s19 = sadd.s32 1, %s6891_s14 }
   0x4   : > { %p26_p0 = scmp.eq.s32.totalorder %s25_s18, 0  ;;  %p35_p1 = scmp.ne.s32.totalorder %s6891_s14, %s6887_s13 }
   0x5   : > { %p36_p2 = scmp.eq.s32.totalorder %s6895_s15, 0  ;;  %p238_p3 = scmp.eq.s32.totalorder %s6968_s16, 1 }
   0x6   : > { %s6981_s20 = scalar_select %p26_p0, %s6891_s14, %s28_s19  }
   0x7   : > { %p37_p4 = por %p36_p2, %p35_p1  ;;  %p6983_p5 = por %p238_p3, %p35_p1 }
   0x8   : > { %p5053_p6 = scmp.ge.s32.totalorder %s6895_s15, 2 }
   0xa   : > { %307 = sbr.rel (%p5053_p6) target bundleno = 53 (0x35), region = 44 }
  0x11   : > { %310 = sbr.rel (!%p37_p4) target bundleno = 53 (0x35), region = 48  ;;  %s312_s22 = sand.u32 (%p37_p4), 1, %s6891_s14  }
  0x12   : > { %s5537_s23 = sshll.u32 (%p37_p4), %s6895_s15, 7  ;;  %s5054_s24 = sshll.u32 (%p37_p4), %s312_s22, 9 }
  0x13   : > { %s6993_s27 = scalar_lea.vmem (%p37_p4), %s8535_s0, %s5537_s23  ;;  %s6998_s28 = scalar_lea.vmem (%p37_p4), [#allocation2], %s5054_s24 }
  0x14   : > { %v333_v0 = vld [vmem:[%s6993_s27] sm:$0xff] (%p37_p4)   ;;  %v337_v1 = vld [vmem:[%s6993_s27 + $0x8] sm:$0xff] (%p37_p4)   ;;  %v341_v2 = vld [vmem:[%s6993_s27 + $0x10] sm:$0xff] (%p37_p4)  }
  0x15   : > { %334 = vst [vmem:[%s6998_s28] sm:$0xff] (%p37_p4), %v333_v0   ;;  %338 = vst [vmem:[%s6998_s28 + $0x8] sm:$0xff] (%p37_p4), %v337_v1   ;;  %v345_v3 = vld [vmem:[%s6993_s27 + $0x18] sm:$0xff] (%p37_p4)   ;;  %v349_v4 = vld [vmem:[%s6993_s27 + $0x20] sm:$0xff] (%p37_p4)  }
  0x16   : > { %342 = vst [vmem:[%s6998_s28 + $0x10] sm:$0xff] (%p37_p4), %v341_v2   ;;  %v353_v5 = vld [vmem:[%s6993_s27 + $0x28] sm:$0xff] (%p37_p4)   ;;  %346 = vst [vmem:[%s6998_s28 + $0x18] sm:$0xff] (%p37_p4), %v345_v3   ;;  %v357_v6 = vld [vmem:[%s6993_s27 + $0x30] sm:$0xff] (%p37_p4)  }
  0x17   : > { %350 = vst [vmem:[%s6998_s28 + $0x20] sm:$0xff] (%p37_p4), %v349_v4   ;;  %354 = vst [vmem:[%s6998_s28 + $0x28] sm:$0xff] (%p37_p4), %v353_v5   ;;  %v361_v7 = vld [vmem:[%s6993_s27 + $0x38] sm:$0xff] (%p37_p4)   ;;  %v365_v8 = vld [vmem:[%s6993_s27 + $0x40] sm:$0xff] (%p37_p4)  }
  0x18   : > { %358 = vst [vmem:[%s6998_s28 + $0x30] sm:$0xff] %v357_v6   ;;  %362 = vst [vmem:[%s6998_s28 + $0x38] sm:$0xff] %v361_v7   ;;  %v369_v9 = vld [vmem:[%s6993_s27 + $0x48] sm:$0xff]   ;;  %v373_v10 = vld [vmem:[%s6993_s27 + $0x50] sm:$0xff]  }
  0x19   : > { %366 = vst [vmem:[%s6998_s28 + $0x40] sm:$0xff] %v365_v8   ;;  %v377_v11 = vld [vmem:[%s6993_s27 + $0x58] sm:$0xff]   ;;  %370 = vst [vmem:[%s6998_s28 + $0x48] sm:$0xff] %v369_v9   ;;  %v381_v12 = vld [vmem:[%s6993_s27 + $0x60] sm:$0xff]  }
  0x1a   : > { %374 = vst [vmem:[%s6998_s28 + $0x50] sm:$0xff] %v373_v10   ;;  %378 = vst [vmem:[%s6998_s28 + $0x58] sm:$0xff] %v377_v11   ;;  %v385_v13 = vld [vmem:[%s6993_s27 + $0x68] sm:$0xff]   ;;  %v389_v14 = vld [vmem:[%s6993_s27 + $0x70] sm:$0xff]  }
  0x1b   : > { %382 = vst [vmem:[%s6998_s28 + $0x60] sm:$0xff] %v381_v12   ;;  %386 = vst [vmem:[%s6998_s28 + $0x68] sm:$0xff] %v385_v13   ;;  %v393_v15 = vld [vmem:[%s6993_s27 + $0x78] sm:$0xff]   ;;  %v397_v16 = vld [vmem:[%s6993_s27 + $0x100] sm:$0xff]  }
  0x1c   : > { %390 = vst [vmem:[%s6998_s28 + $0x70] sm:$0xff] %v389_v14   ;;  %v401_v17 = vld [vmem:[%s6993_s27 + $0x108] sm:$0xff]   ;;  %394 = vst [vmem:[%s6998_s28 + $0x78] sm:$0xff] %v393_v15   ;;  %v405_v18 = vld [vmem:[%s6993_s27 + $0x110] sm:$0xff]  }
  0x1d   : > { %398 = vst [vmem:[%s6998_s28 + $0x80] sm:$0xff] %v397_v16   ;;  %402 = vst [vmem:[%s6998_s28 + $0x88] sm:$0xff] %v401_v17   ;;  %v409_v19 = vld [vmem:[%s6993_s27 + $0x118] sm:$0xff]   ;;  %v413_v20 = vld [vmem:[%s6993_s27 + $0x120] sm:$0xff]  }
  0x1e   : > { %406 = vst [vmem:[%s6998_s28 + $0x90] sm:$0xff] %v405_v18   ;;  %410 = vst [vmem:[%s6998_s28 + $0x98] sm:$0xff] %v409_v19   ;;  %v417_v21 = vld [vmem:[%s6993_s27 + $0x128] sm:$0xff]   ;;  %v421_v22 = vld [vmem:[%s6993_s27 + $0x130] sm:$0xff]  }
  0x1f   : > { %414 = vst [vmem:[%s6998_s28 + $0xa0] sm:$0xff] %v413_v20   ;;  %v425_v23 = vld [vmem:[%s6993_s27 + $0x138] sm:$0xff]   ;;  %418 = vst [vmem:[%s6998_s28 + $0xa8] sm:$0xff] %v417_v21   ;;  %v429_v24 = vld [vmem:[%s6993_s27 + $0x140] sm:$0xff]  }
  0x20   : > { %422 = vst [vmem:[%s6998_s28 + $0xb0] sm:$0xff] %v421_v22   ;;  %426 = vst [vmem:[%s6998_s28 + $0xb8] sm:$0xff] %v425_v23   ;;  %v433_v25 = vld [vmem:[%s6993_s27 + $0x148] sm:$0xff]   ;;  %v437_v26 = vld [vmem:[%s6993_s27 + $0x150] sm:$0xff]  }
  0x21   : > { %430 = vst [vmem:[%s6998_s28 + $0xc0] sm:$0xff] %v429_v24   ;;  %434 = vst [vmem:[%s6998_s28 + $0xc8] sm:$0xff] %v433_v25   ;;  %v441_v27 = vld [vmem:[%s6993_s27 + $0x158] sm:$0xff]   ;;  %v445_v28 = vld [vmem:[%s6993_s27 + $0x160] sm:$0xff]  }
  0x22   : > { %438 = vst [vmem:[%s6998_s28 + $0xd0] sm:$0xff] %v437_v26   ;;  %v449_v29 = vld [vmem:[%s6993_s27 + $0x168] sm:$0xff]   ;;  %442 = vst [vmem:[%s6998_s28 + $0xd8] sm:$0xff] %v441_v27   ;;  %v453_v30 = vld [vmem:[%s6993_s27 + $0x170] sm:$0xff]  }
  0x23   : > { %446 = vst [vmem:[%s6998_s28 + $0xe0] sm:$0xff] %v445_v28   ;;  %450 = vst [vmem:[%s6998_s28 + $0xe8] sm:$0xff] %v449_v29   ;;  %v457_v31 = vld [vmem:[%s6993_s27 + $0x178] sm:$0xff]   ;;  %v461_v32 = vld [vmem:[%s6993_s27 + $0x200] sm:$0xff]  }
  0x24   : > { %454 = vst [vmem:[%s6998_s28 + $0xf0] sm:$0xff] %v453_v30   ;;  %458 = vst [vmem:[%s6998_s28 + $0xf8] sm:$0xff] %v457_v31   ;;  %v465_v33 = vld [vmem:[%s6993_s27 + $0x208] sm:$0xff]   ;;  %v469_v34 = vld [vmem:[%s6993_s27 + $0x210] sm:$0xff]  }
  0x25   : > { %462 = vst [vmem:[%s6998_s28 + $0x100] sm:$0xff] %v461_v32   ;;  %v473_v35 = vld [vmem:[%s6993_s27 + $0x218] sm:$0xff]   ;;  %466 = vst [vmem:[%s6998_s28 + $0x108] sm:$0xff] %v465_v33   ;;  %v477_v36 = vld [vmem:[%s6993_s27 + $0x220] sm:$0xff]  }
  0x26   : > { %470 = vst [vmem:[%s6998_s28 + $0x110] sm:$0xff] %v469_v34   ;;  %474 = vst [vmem:[%s6998_s28 + $0x118] sm:$0xff] %v473_v35   ;;  %v481_v37 = vld [vmem:[%s6993_s27 + $0x228] sm:$0xff]   ;;  %v485_v38 = vld [vmem:[%s6993_s27 + $0x230] sm:$0xff]  }
  0x27   : > { %478 = vst [vmem:[%s6998_s28 + $0x120] sm:$0xff] %v477_v36   ;;  %482 = vst [vmem:[%s6998_s28 + $0x128] sm:$0xff] %v481_v37   ;;  %v489_v39 = vld [vmem:[%s6993_s27 + $0x238] sm:$0xff]   ;;  %v493_v40 = vld [vmem:[%s6993_s27 + $0x240] sm:$0xff]  }
  0x28   : > { %486 = vst [vmem:[%s6998_s28 + $0x130] sm:$0xff] %v485_v38   ;;  %v497_v41 = vld [vmem:[%s6993_s27 + $0x248] sm:$0xff]   ;;  %490 = vst [vmem:[%s6998_s28 + $0x138] sm:$0xff] %v489_v39   ;;  %v501_v42 = vld [vmem:[%s6993_s27 + $0x250] sm:$0xff]  }
  0x29   : > { %494 = vst [vmem:[%s6998_s28 + $0x140] sm:$0xff] %v493_v40   ;;  %498 = vst [vmem:[%s6998_s28 + $0x148] sm:$0xff] %v497_v41   ;;  %v505_v43 = vld [vmem:[%s6993_s27 + $0x258] sm:$0xff]   ;;  %v509_v44 = vld [vmem:[%s6993_s27 + $0x260] sm:$0xff]  }
  0x2a   : > { %502 = vst [vmem:[%s6998_s28 + $0x150] sm:$0xff] %v501_v42   ;;  %506 = vst [vmem:[%s6998_s28 + $0x158] sm:$0xff] %v505_v43   ;;  %v513_v45 = vld [vmem:[%s6993_s27 + $0x268] sm:$0xff]   ;;  %v517_v46 = vld [vmem:[%s6993_s27 + $0x270] sm:$0xff]  }
  0x2b   : > { %510 = vst [vmem:[%s6998_s28 + $0x160] sm:$0xff] %v509_v44   ;;  %v521_v47 = vld [vmem:[%s6993_s27 + $0x278] sm:$0xff]   ;;  %514 = vst [vmem:[%s6998_s28 + $0x168] sm:$0xff] %v513_v45   ;;  %v525_v48 = vld [vmem:[%s6993_s27 + $0x300] sm:$0xff]  }
  0x2c   : > { %518 = vst [vmem:[%s6998_s28 + $0x170] sm:$0xff] %v517_v46   ;;  %522 = vst [vmem:[%s6998_s28 + $0x178] sm:$0xff] %v521_v47   ;;  %v529_v49 = vld [vmem:[%s6993_s27 + $0x308] sm:$0xff]   ;;  %v533_v50 = vld [vmem:[%s6993_s27 + $0x310] sm:$0xff]  }
  0x2d   : > { %526 = vst [vmem:[%s6998_s28 + $0x180] sm:$0xff] %v525_v48   ;;  %530 = vst [vmem:[%s6998_s28 + $0x188] sm:$0xff] %v529_v49   ;;  %v537_v51 = vld [vmem:[%s6993_s27 + $0x318] sm:$0xff]   ;;  %v541_v52 = vld [vmem:[%s6993_s27 + $0x320] sm:$0xff]  }
  0x2e   : > { %534 = vst [vmem:[%s6998_s28 + $0x190] sm:$0xff] %v533_v50   ;;  %v545_v53 = vld [vmem:[%s6993_s27 + $0x328] sm:$0xff]   ;;  %538 = vst [vmem:[%s6998_s28 + $0x198] sm:$0xff] %v537_v51   ;;  %v549_v54 = vld [vmem:[%s6993_s27 + $0x330] sm:$0xff]  }
  0x2f   : > { %542 = vst [vmem:[%s6998_s28 + $0x1a0] sm:$0xff] %v541_v52   ;;  %546 = vst [vmem:[%s6998_s28 + $0x1a8] sm:$0xff] %v545_v53   ;;  %v553_v55 = vld [vmem:[%s6993_s27 + $0x338] sm:$0xff]   ;;  %v557_v56 = vld [vmem:[%s6993_s27 + $0x340] sm:$0xff]  }
  0x30   : > { %550 = vst [vmem:[%s6998_s28 + $0x1b0] sm:$0xff] %v549_v54   ;;  %554 = vst [vmem:[%s6998_s28 + $0x1b8] sm:$0xff] %v553_v55   ;;  %v561_v57 = vld [vmem:[%s6993_s27 + $0x348] sm:$0xff]   ;;  %v565_v58 = vld [vmem:[%s6993_s27 + $0x350] sm:$0xff]  }
  0x31   : > { %558 = vst [vmem:[%s6998_s28 + $0x1c0] sm:$0xff] %v557_v56   ;;  %v569_v59 = vld [vmem:[%s6993_s27 + $0x358] sm:$0xff]   ;;  %562 = vst [vmem:[%s6998_s28 + $0x1c8] sm:$0xff] %v561_v57   ;;  %v573_v60 = vld [vmem:[%s6993_s27 + $0x360] sm:$0xff]  }
  0x32   : > { %566 = vst [vmem:[%s6998_s28 + $0x1d0] sm:$0xff] %v565_v58   ;;  %570 = vst [vmem:[%s6998_s28 + $0x1d8] sm:$0xff] %v569_v59   ;;  %v577_v61 = vld [vmem:[%s6993_s27 + $0x368] sm:$0xff]   ;;  %v581_v62 = vld [vmem:[%s6993_s27 + $0x370] sm:$0xff]  }
  0x33   : > { %574 = vst [vmem:[%s6998_s28 + $0x1e0] sm:$0xff] %v573_v60   ;;  %578 = vst [vmem:[%s6998_s28 + $0x1e8] sm:$0xff] %v577_v61   ;;  %v585_v63 = vld [vmem:[%s6993_s27 + $0x378] sm:$0xff]  }
  0x34   : > { %582 = vst [vmem:[%s6998_s28 + $0x1f0] sm:$0xff] %v581_v62   ;;  %586 = vst [vmem:[%s6998_s28 + $0x1f8] sm:$0xff] %v585_v63  }
  0x35 PF: > { %p5057_p7 = scmp.ge.s32.totalorder %s6895_s15, 1  ;;  %p875_p8 = scmp.lt.s32.totalorder %s6895_s15, 3 }
  0x37   : > { %p876_p9 = pnand %p5057_p7, %p875_p8 }
  0x39   : > { %879 = sbr.rel (%p876_p9) target bundleno = 569 (0x239), region = 93 }
  0x40   : > { %v6689_v0 = vld [vmem:[%s8538_s3] sm:$0xff]   ;;  %s5060_s11 = sshll.u32 %s6968_s16, 5  ;;  %v6690_v1 = vld [vmem:[%s8538_s3 + $0x8] sm:$0xff]   ;;  %v6691_v2 = vld [vmem:[%s8538_s3 + $0x10] sm:$0xff]   ;;  %s882_s24 = sand.u32 1, %s6887_s13  }
  0x41   : > { %p930_p10 = scmp.lt.s32.totalorder %s5060_s11, 63  ;;  %6409 = vmatprep.subr.bf16.mxu0 %v6689_v0  ;;  %6649 = vmatprep.subr.bf16.mxu1 %v6689_v0  ;;  %v6692_v3 = vld [vmem:[%s8538_s3 + $0x18] sm:$0xff]   ;;  %v6693_v6 = vld [vmem:[%s8538_s3 + $0x20] sm:$0xff]   ;;  %v6694_v7 = vld [vmem:[%s8538_s3 + $0x28] sm:$0xff]   ;;  %s7242_s28 = sshll.u32 %s882_s24, 9 }
  0x42   : > { %6410 = vmatpush3.bf16.msra.mxu0 %v6689_v0  ;;  %6657 = vmatpush3.bf16.msra.mxu1 %v6689_v0  ;;  %v6695_v8 = vld [vmem:[%s8538_s3 + $0x30] sm:$0xff]   ;;  %v6696_v9 = vld [vmem:[%s8538_s3 + $0x38] sm:$0xff]   ;;  %v6701_v10 = vld [vmem:[%s8539_s4 + $0x40] sm:$0xff]   ;;  %s7279_s27 = scalar_lea.vmem [#allocation2], %s7242_s28  ;;  %s7861_s12 = scalar_lea.vmem [#allocation3], %s7242_s28 }
  0x43   : > { %s8587_s11 = smov (!%p930_p10, %s5060_s11), 63  ;;  %6411 = vmatprep.subr.bf16.mxu0 %v6690_v1  ;;  %6650 = vmatprep.subr.bf16.mxu1 %v6690_v1  ;;  %v7179_v13 = vld [vmem:[%s8537_s2] sm:$0xff]   ;;  %v6704_v15 = vld [vmem:[%s8539_s4 + $0x48] sm:$0xff]   ;;  %v6711_v20 = vld [vmem:[%s8539_s4 + $0x50] sm:$0xff]   ;;  %s5698_s23 = sshll.u32 (%p6983_p5), %s6968_s16, 7 }
  0x44   : > { %s5061_s22 = sshll.u32 %s8587_s11, 2  ;;  %v6703_v14 = vld [vmem:[%s8539_s4] sm:$0xff]   ;;  %v7190_v16 = vld [vmem:[%s8537_s2 + $0x8] sm:$0xff]   ;;  %v7216_v23 = vld [vmem:[%s8537_s2 + $0x10] sm:$0xff]   ;;  %s8398_s13 = scalar_lea.vmem (%p6983_p5), %s8544_s9, %s5698_s23 }
  0x45   : > { %s7145_s25 = scalar_lea.vmem %s8536_s1, %s5061_s22  ;;  %v6706_v19 = vld [vmem:[%s8539_s4 + $0x8] sm:$0xff]   ;;  %v6713_v24 = vld [vmem:[%s8539_s4 + $0x10] sm:$0xff]   ;;  %v6714_v25 = vld [vmem:[%s8539_s4 + $0x58] sm:$0xff]   ;;  %s7854_s30 = scalar_lea.vmem %s8545_s10, %s5061_s22 }
  0x46   : > { %6412 = vmatpush3.bf16.msra.mxu0 %v6690_v1  ;;  %6658 = vmatpush3.bf16.msra.mxu1 %v6690_v1  ;;  %v7151_v4 = vld [vmem:[%s7145_s25] sm:$0xff]   ;;  %v7171_v11 = vld [vmem:[%s7145_s25 + $0x8] sm:$0xff]   ;;  %v7194_v17 = vld [vmem:[%s7145_s25 + $0x10] sm:$0xff]  }
  0x47   : > { %6413 = vmatprep.subr.bf16.mxu0 %v6691_v2  ;;  %6651 = vmatprep.subr.bf16.mxu1 %v6691_v2  ;;  %v6698_v5 = vld [vmem:[%s7145_s25 + $0x40] sm:$0xff]   ;;  %v7174_v12 = vld [vmem:[%s7145_s25 + $0x48] sm:$0xff]   ;;  %v7197_v18 = vld [vmem:[%s7145_s25 + $0x50] sm:$0xff]  }
  0x48   : > { %6425 = vmatprep.mubr.bf16.mxu0 %v7151_v4  ;;  %6441 = vmatprep.mubr.bf16.mxu1 %v6698_v5  ;;  %v7210_v21 = vld [vmem:[%s7145_s25 + $0x18] sm:$0xff]   ;;  %v7235_v27 = vld [vmem:[%s7145_s25 + $0x20] sm:$0xff]   ;;  %v7250_v31 = vld [vmem:[%s7145_s25 + $0x28] sm:$0xff]  }
  0x49   : > { %v6710_v22 = vld [vmem:[%s7145_s25 + $0x58] sm:$0xff]   ;;  %v6718_v28 = vld [vmem:[%s7145_s25 + $0x60] sm:$0xff]   ;;  %v6720_v32 = vld [vmem:[%s7145_s25 + $0x68] sm:$0xff]  }
  0x4a   : > { %6414 = vmatpush3.bf16.msra.mxu0 %v6691_v2  ;;  %6659 = vmatpush3.bf16.msra.mxu1 %v6691_v2  ;;  %v7230_v26 = vld [vmem:[%s8537_s2 + $0x18] sm:$0xff]   ;;  %v6721_v30 = vld [vmem:[%s8539_s4 + $0x60] sm:$0xff]   ;;  %v6724_v35 = vld [vmem:[%s8539_s4 + $0x68] sm:$0xff]  }
  0x4b   : > { %6415 = vmatprep.subr.bf16.mxu0 %v6692_v3  ;;  %6652 = vmatprep.subr.bf16.mxu1 %v6692_v3  ;;  %v6716_v29 = vld [vmem:[%s8539_s4 + $0x18] sm:$0xff]   ;;  %v7256_v33 = vld [vmem:[%s8537_s2 + $0x20] sm:$0xff]   ;;  %v7268_v36 = vld [vmem:[%s8537_s2 + $0x28] sm:$0xff]  }
  0x4c   : > { %v6723_v34 = vld [vmem:[%s8539_s4 + $0x20] sm:$0xff]   ;;  %v7272_v37 = vld [vmem:[%s7145_s25 + $0x30] sm:$0xff]   ;;  %v7298_v47 = vld [vmem:[%s7279_s27 + $0x8] sm:$0xff]  }
  0x4d   : > { %v7275_v38 = vld [vmem:[%s7145_s25 + $0x70] sm:$0xff]   ;;  %v7282_v39 = vld [vmem:[%s7279_s27] sm:$0xff]   ;;  %v7301_v48 = vld [vmem:[%s7279_s27 + $0x88] sm:$0xff]   ;;  %v1429_v60 = vunpack.c.l.bf16 %v7298_v47  ;;  %v1430_v61 = vunpack.c.h.bf16 %v7298_v47 }
  0x4e   : > { %6416 = vmatpush3.bf16.msra.mxu0 %v6692_v3  ;;  %6660 = vmatpush3.bf16.msra.mxu1 %v6692_v3  ;;  %v7285_v40 = vld [vmem:[%s7279_s27 + $0x80] sm:$0xff]   ;;  %v1427_v43 = vunpack.c.l.bf16 %v7282_v39  ;;  %v1428_v44 = vunpack.c.h.bf16 %v7282_v39  ;;  %v7307_v51 = vld [vmem:[%s7279_s27 + $0x108] sm:$0xff]   ;;  %v6731_v58 = vld [vmem:[%s8539_s4 + $0x70] sm:$0xff]   ;;  %v1461_v62 = vunpack.c.l.bf16 %v7301_v48  ;;  %v1462_v63 = vunpack.c.h.bf16 %v7301_v48 }
  0x4f   : > { %6417 = vmatprep.subr.bf16.mxu0 %v6693_v6  ;;  %6653 = vmatprep.subr.bf16.mxu1 %v6693_v6  ;;  %v7288_v41 = vld [vmem:[%s7279_s27 + $0x100] sm:$0xff]   ;;  %v1459_v45 = vunpack.c.l.bf16 %v7285_v40  ;;  %v1460_v46 = vunpack.c.h.bf16 %v7285_v40  ;;  %v6726_v52 = vld [vmem:[%s8539_s4 + $0x28] sm:$0xff]   ;;  %v7325_v59 = vld [vmem:[%s8537_s2 + $0x30] sm:$0xff]   ;;  %v1525_v3 = vunpack.c.l.bf16 %v7307_v51  ;;  %v1526_v5 = vunpack.c.h.bf16 %v7307_v51 }
  0x50   : > { %v7291_v42 = vld [vmem:[%s7279_s27 + $0x180] sm:$0xff]   ;;  %v1523_v49 = vunpack.c.l.bf16 %v7288_v41  ;;  %v1524_v50 = vunpack.c.h.bf16 %v7288_v41  ;;  %v7316_v57 = vld [vmem:[%s7279_s27 + $0x188] sm:$0xff]   ;;  %v7332_v0 = vld [vmem:[%s7279_s27 + $0x10] sm:$0xff]  }
  0x51   : > { %v1491_v53 = vadd.f32 %v1459_v45, %v1427_v43  ;;  %v1492_v54 = vadd.f32 %v1460_v46, %v1428_v44  ;;  %v1587_v55 = vunpack.c.l.bf16 %v7291_v42  ;;  %v1588_v56 = vunpack.c.h.bf16 %v7291_v42  ;;  %v7367_v45 = vld [vmem:[%s7279_s27 + $0x98] sm:$0xff]  }
  0x52   : > { %6418 = vmatpush3.bf16.msra.mxu0 %v6693_v6  ;;  %6661 = vmatpush3.bf16.msra.mxu1 %v6693_v6  ;;  %v7339_v6 = vld [vmem:[%s7279_s27 + $0x90] sm:$0xff]  }
  0x53   : > { %6419 = vmatprep.subr.bf16.mxu0 %v6694_v7  ;;  %6654 = vmatprep.subr.bf16.mxu1 %v6694_v7  ;;  %v1555_v1 = vadd.f32 %v1523_v49, %v1491_v53  ;;  %v1556_v2 = vadd.f32 %v1524_v50, %v1492_v54  ;;  %v1464_v44 = vunpack.c.h.bf16 %v7339_v6  ;;  %v7372_v50 = vld [vmem:[%s7279_s27 + $0x18] sm:$0xff]   ;;  %v7378_v53 = vld [vmem:[%s7279_s27 + $0x190] sm:$0xff]  }
  0x54   : > { %v6736_v54 = vld [vmem:[%s8539_s4 + $0x38] sm:$0xff]  }
  0x56   : > { %6420 = vmatpush3.bf16.msra.mxu0 %v6694_v7  ;;  %6662 = vmatpush3.bf16.msra.mxu1 %v6694_v7  ;;  %v7342_v7 = vld [vmem:[%s7145_s25 + $0x38] sm:$0xff]  }
  0x57   : > { %6421 = vmatprep.subr.bf16.mxu0 %v6695_v8  ;;  %6655 = vmatprep.subr.bf16.mxu1 %v6695_v8 }
  0x5a   : > { %6422 = vmatpush3.bf16.msra.mxu0 %v6695_v8  ;;  %6663 = vmatpush3.bf16.msra.mxu1 %v6695_v8  ;;  %v7345_v8 = vld [vmem:[%s7145_s25 + $0x78] sm:$0xff]  }
  0x5b   : > { %6423 = vmatprep.subr.bf16.mxu0 %v6696_v9  ;;  %6656 = vmatprep.subr.bf16.mxu1 %v6696_v9 }
  0x5e   : > { %6424 = vmatpush3.bf16.msra.mxu0 %v6696_v9  ;;  %6664 = vmatpush3.bf16.msra.mxu1 %v6696_v9  ;;  %v1493_v9 = vadd.f32 %v1461_v62, %v1429_v60  ;;  %v1433_v60 = vunpack.c.l.bf16 %v7372_v50 }
  0x5f   : > { %6201 = vmatprep.subr.bf16.mxu1 %v6701_v10  ;;  %6457 = vmatprep.subr.bf16.mxu0 %v7179_v13  ;;  %v1494_v10 = vadd.f32 %v1462_v63, %v1430_v61  ;;  %v1434_v63 = vunpack.c.h.bf16 %v7372_v50 }
  0x61   : > { %6426 = vmatmul.mubr.bf16.vlgmr.msra.gmra.mrb[0].mxu0 %v7171_v11  ;;  %6442 = vmatmul.mubr.bf16.vlgmr.msra.gmra.mrb[0].mxu1 %v7174_v12 }
  0x62   : > { %6202 = vmatpush3.bf16.msra.mxu1 %v6703_v14  ;;  %6458 = vmatpush3.bf16.msra.mxu0 %v7179_v13  ;;  %v1589_v14 = vunpack.c.l.bf16 %v7316_v57 }
  0x63   : > { %6203 = vmatprep.subr.bf16.mxu1 %v6704_v15  ;;  %6459 = vmatprep.subr.bf16.mxu0 %v7190_v16  ;;  %v1590_v15 = vunpack.c.h.bf16 %v7316_v57 }
  0x64   : > { %6429 = vmatprep.mubr.bf16.mxu0 %v7194_v17  ;;  %6445 = vmatprep.mubr.bf16.mxu1 %v7197_v18 }
  0x66   : > { %6204 = vmatpush3.bf16.msra.mxu1 %v6706_v19  ;;  %6460 = vmatpush3.bf16.msra.mxu0 %v7190_v16  ;;  %v6733_v19 = vld [vmem:[%s8539_s4 + $0x30] sm:$0xff]  }
  0x67   : > { %6205 = vmatprep.subr.bf16.mxu1 %v6711_v20  ;;  %6461 = vmatprep.subr.bf16.mxu0 %v7216_v23  ;;  %v1619_v20 = vadd.f32 %v1587_v55, %v1555_v1  ;;  %v1465_v1 = vunpack.c.l.bf16 %v7367_v45 }
  0x69   : > { %6430 = vmatmul.mubr.bf16.gmra.mrb[4].mxu0 %v7210_v21  ;;  %6446 = vmatmul.mubr.bf16.gmra.mrb[4].mxu1 %v6710_v22  ;;  %v1620_v22 = vadd.f32 %v1588_v56, %v1556_v2  ;;  %v1466_v2 = vunpack.c.h.bf16 %v7367_v45 }
  0x6a   : > { %6206 = vmatpush3.bf16.msra.mxu1 %v6713_v24  ;;  %6462 = vmatpush3.bf16.msra.mxu0 %v7216_v23  ;;  %v1431_v24 = vunpack.c.l.bf16 %v7332_v0 }
  0x6b   : > { %6207 = vmatprep.subr.bf16.mxu1 %v6714_v25  ;;  %6463 = vmatprep.subr.bf16.mxu0 %v7230_v26  ;;  %v6734_v25 = vld [vmem:[%s8539_s4 + $0x78] sm:$0xff]   ;;  %v1652_v43 = vmul.f32 0.25, %v1620_v22  ;;  %v7401_v22 = vld [vmem:[%s7279_s27 + $0xa0] sm:$0xff]  }
  0x6c   : > { %6433 = vmatprep.mubr.bf16.mxu0 %v7235_v27  ;;  %6449 = vmatprep.mubr.bf16.mxu1 %v6718_v28  ;;  %v7361_v28 = vld [vmem:[%s8537_s2 + $0x38] sm:$0xff]  }
  0x6e   : > { %6208 = vmatpush3.bf16.msra.mxu1 %v6716_v29  ;;  %6464 = vmatpush3.bf16.msra.mxu0 %v7230_v26  ;;  %v1557_v29 = vadd.f32 %v1525_v3, %v1493_v9  ;;  %v1591_v9 = vunpack.c.l.bf16 %v7378_v53 }
  0x6f   : > { %6209 = vmatprep.subr.bf16.mxu1 %v6721_v30  ;;  %6465 = vmatprep.subr.bf16.mxu0 %v7256_v33  ;;  %v1558_v30 = vadd.f32 %v1526_v5, %v1494_v10  ;;  %v1592_v10 = vunpack.c.h.bf16 %v7378_v53 }
  0x70   : > { %v1621_v46 = vadd.f32 %v1589_v14, %v1557_v29 }
  0x71   : > { %6434 = vmatmul.mubr.bf16.gmra.mrb[8].mxu0 %v7250_v31  ;;  %6450 = vmatmul.mubr.bf16.gmra.mrb[8].mxu1 %v6720_v32  ;;  %v1432_v32 = vunpack.c.h.bf16 %v7332_v0  ;;  %v1622_v49 = vadd.f32 %v1590_v15, %v1558_v30  ;;  %v1304_v30 = vld [vmem:[%s7279_s27 + $0x20] sm:$0xff]  }
  0x72   : > { %6210 = vmatpush3.bf16.msra.mxu1 %v6723_v34  ;;  %6466 = vmatpush3.bf16.msra.mxu0 %v7256_v33  ;;  %v1463_v34 = vunpack.c.l.bf16 %v7339_v6  ;;  %v1653_v61 = vmul.f32 0.25, %v1621_v46 }
  0x73   : > { %6211 = vmatprep.subr.bf16.mxu1 %v6724_v35  ;;  %6467 = vmatprep.subr.bf16.mxu0 %v7268_v36  ;;  %v1651_v35 = vmul.f32 0.25, %v1619_v20  ;;  %v1654_v62 = vmul.f32 0.25, %v1622_v49  ;;  %v1497_v20 = vadd.f32 %v1465_v1, %v1433_v60  ;;  %v1467_v49 = vunpack.c.l.bf16 %v7401_v22 }
  0x74   : > { %6437 = vmatprep.mubr.bf16.mxu0 %v7272_v37  ;;  %6453 = vmatprep.mubr.bf16.mxu1 %v7275_v38  ;;  %v1495_v56 = vadd.f32 %v1463_v34, %v1431_v24  ;;  %v1498_v24 = vadd.f32 %v1466_v2, %v1434_v63  ;;  %v1435_v34 = vunpack.c.l.bf16 %v1304_v30  ;;  %v7425_v63 = vld [vmem:[%s7279_s27 + $0xa8] sm:$0xff]  }
  0x75   : > { %v1683_v55 = vpack.c.bf16 %v1652_v43, %v1651_v35  ;;  %v1436_v35 = vunpack.c.h.bf16 %v1304_v30 }
  0x76   : > { %6212 = vmatpush3.bf16.msra.mxu1 %v6726_v52  ;;  %6468 = vmatpush3.bf16.msra.mxu0 %v7268_v36  ;;  %v7375_v52 = vld [vmem:[%s7279_s27 + $0x110] sm:$0xff]  }
  0x77   : > { %6213 = vmatprep.subr.bf16.mxu1 %v6731_v58  ;;  %6469 = vmatprep.subr.bf16.mxu0 %v7325_v59  ;;  %v1496_v58 = vadd.f32 %v1464_v44, %v1432_v32  ;;  %v1527_v3 = vunpack.c.l.bf16 %v7375_v52  ;;  %v1528_v5 = vunpack.c.h.bf16 %v7375_v52  ;;  %v7405_v32 = vld [vmem:[%s7279_s27 + $0x198] sm:$0xff]  }
  0x79   : > { %6438 = vmatmul.mubr.bf16.gmra.mrb[12].mxu0 %v7342_v7  ;;  %6454 = vmatmul.mubr.bf16.gmra.mrb[12].mxu1 %v7345_v8  ;;  %v1559_v14 = vadd.f32 %v1527_v3, %v1495_v56  ;;  %v1560_v15 = vadd.f32 %v1528_v5, %v1496_v58  ;;  %v1594_v56 = vunpack.c.h.bf16 %v7405_v32  ;;  %v1306_v3 = vld [vmem:[%s7279_s27 + $0x28] sm:$0xff]   ;;  %v7431_v5 = vld [vmem:[%s7279_s27 + $0x1a0] sm:$0xff]  }
  0x7a   : > { %6214 = vmatpush3.bf16.msra.mxu1 %v6733_v19  ;;  %6470 = vmatpush3.bf16.msra.mxu0 %v7325_v59  ;;  %v7396_v19 = vld [vmem:[%s7279_s27 + $0x118] sm:$0xff]   ;;  %8559 = vst [vmem:[#allocation4_spill] sm:$0xff] %v7431_v5 }
  0x7b   : > { %6215 = vmatprep.subr.bf16.mxu1 %v6734_v25  ;;  %6471 = vmatprep.subr.bf16.mxu0 %v7361_v28  ;;  %v1623_v25 = vadd.f32 %v1591_v9, %v1559_v14  ;;  %v1624_v29 = vadd.f32 %v1592_v10, %v1560_v15  ;;  %v1529_v43 = vunpack.c.l.bf16 %v7396_v19  ;;  %v1437_v9 = vunpack.c.l.bf16 %v1306_v3 }
  0x7c   : > { %1859 = vmatprep.mubr.bf16.mxu1 %v1683_v55  ;;  %6473 = vmatprep.mubr.bf16.mxu0 %v7282_v39  ;;  %v1684_v39 = vpack.c.bf16 %v1654_v62, %v1653_v61  ;;  %v1593_v55 = vunpack.c.l.bf16 %v7405_v32  ;;  %v7421_v61 = vld [vmem:[%s7279_s27 + $0x120] sm:$0xff]   ;;  %v1499_v62 = vadd.f32 %v1467_v49, %v1435_v34  ;;  %v1438_v10 = vunpack.c.h.bf16 %v1306_v3 }
  0x7d   : > { %v1655_v44 = vmul.f32 0.25, %v1623_v25  ;;  %v1656_v46 = vmul.f32 0.25, %v1624_v29  ;;  %v1531_v14 = vunpack.c.l.bf16 %v7421_v61  ;;  %v1469_v15 = vunpack.c.l.bf16 %v7425_v63  ;;  %v1308_v29 = vld [vmem:[%s7279_s27 + $0x30] sm:$0xff]  }
  0x7e   : > { %6216 = vmatpush3.bf16.msra.mxu1 %v6736_v54  ;;  %6472 = vmatpush3.bf16.msra.mxu0 %v7361_v28  ;;  %v1530_v54 = vunpack.c.h.bf16 %v7396_v19 }
  0x7f   : > { %6505 = vmatprep.subr.bf16.mxu0 %v7179_v13  ;;  %6553 = vmatprep.subr.bf16.mxu1 %v7179_v13  ;;  %v1563_v34 = vadd.f32 %v1531_v14, %v1499_v62  ;;  %v1310_v14 = vld [vmem:[%s7279_s27 + $0x38] sm:$0xff]  }
  0x80   : > { %v1562_v58 = vadd.f32 %v1530_v54, %v1498_v24  ;;  %v1532_v24 = vunpack.c.h.bf16 %v7421_v61 }
  0x81   : > { %1860 = vmatmul.mubr.bf16.vlgmr.msra.gmra.mrb[16].mxu1 %v7151_v4  ;;  %6474 = vmatmul.mubr.bf16.vlgmr.msra.gmra.mrb[16].mxu0 %v7298_v47  ;;  %v1468_v4 = vunpack.c.h.bf16 %v7401_v22  ;;  %v1561_v47 = vadd.f32 %v1529_v43, %v1497_v20  ;;  %v7446_v43 = vld [vmem:[%s7279_s27 + $0x128] sm:$0xff]  }
  0x82   : > { %6506 = vmatpush3.bf16.msra.mxu0 %v7179_v13  ;;  %6554 = vmatpush3.bf16.msra.mxu1 %v7179_v13  ;;  %v1626_v1 = vadd.f32 %v1594_v56, %v1562_v58  ;;  %8560 = vst [vmem:[#allocation5_spill] sm:$0xff] %v7446_v43  ;;  %v1534_v56 = vunpack.c.h.bf16 %v7446_v43  ;;  %v1439_v58 = vunpack.c.l.bf16 %v1308_v29 }
  0x83   : > { %1867 = vmatprep.mubr.bf16.mxu1 %v1684_v39  ;;  %6477 = vmatprep.mubr.bf16.mxu0 %v7332_v0  ;;  %v1625_v60 = vadd.f32 %v1593_v55, %v1561_v47  ;;  %v1685_v0 = vpack.c.bf16 %v1656_v46, %v1655_v44  ;;  %v1500_v2 = vadd.f32 %v1468_v4, %v1436_v35  ;;  %v1470_v39 = vunpack.c.h.bf16 %v7425_v63  ;;  %v7451_v46 = vld [vmem:[%s7279_s27 + $0xb0] sm:$0xff]   ;;  %v7454_v47 = vld [vmem:[%s7279_s27 + $0x1a8] sm:$0xff]  }
  0x84   : > { %6507 = vmatprep.subr.bf16.mxu0 %v7190_v16  ;;  %6555 = vmatprep.subr.bf16.mxu1 %v7190_v16  ;;  %v1658_v25 = vmul.f32 0.25, %v1626_v1  ;;  %v1595_v35 = vunpack.c.l.bf16 %v7431_v5  ;;  %8561 = vst [vmem:[#allocation6_spill] sm:$0xff] %v7454_v47  ;;  %v1533_v55 = vunpack.c.l.bf16 %v7446_v43  ;;  %v1472_v62 = vunpack.c.h.bf16 %v7451_v46 }
  0x85   : > { %v1657_v20 = vmul.f32 0.25, %v1625_v60  ;;  %v1502_v44 = vadd.f32 %v1470_v39, %v1438_v10  ;;  %v1440_v60 = vunpack.c.h.bf16 %v1308_v29  ;;  %v1598_v10 = vunpack.c.h.bf16 %v7454_v47 }
  0x86   : > { %6508 = vmatpush3.bf16.msra.mxu0 %v7190_v16  ;;  %6556 = vmatpush3.bf16.msra.mxu1 %v7190_v16  ;;  %v1627_v54 = vadd.f32 %v1595_v35, %v1563_v34 }
  0x87   : > { %6509 = vmatprep.subr.bf16.mxu0 %v7216_v23  ;;  %6557 = vmatprep.subr.bf16.mxu1 %v7216_v23  ;;  %v1686_v49 = vpack.c.bf16 %v1658_v25, %v1657_v20  ;;  %v7469_v20 = vld [vmem:[%s7279_s27 + $0x40] sm:$0xff]   ;;  %v7479_v25 = vld [vmem:[%s7279_s27 + $0xb8] sm:$0xff]  }
  0x89   : > { %1868 = vmatmul.mubr.bf16.gmra.mrb[20].mxu1 %v7171_v11  ;;  %6478 = vmatmul.mubr.bf16.gmra.mrb[20].mxu0 %v7372_v50  ;;  %v1596_v11 = vunpack.c.h.bf16 %v7431_v5  ;;  %v1564_v50 = vadd.f32 %v1532_v24, %v1500_v2  ;;  %v1566_v2 = vadd.f32 %v1534_v56, %v1502_v44  ;;  %v7473_v24 = vld [vmem:[%s7279_s27 + $0x130] sm:$0xff]   ;;  %v1441_v44 = vunpack.c.l.bf16 %v1310_v14 }
  0x8a   : > { %1875 = vmatprep.mubr.bf16.mxu1 %v1685_v0  ;;  %6481 = vmatprep.mubr.bf16.mxu0 %v1304_v30  ;;  %v1501_v30 = vadd.f32 %v1469_v15, %v1437_v9  ;;  %v1471_v0 = vunpack.c.l.bf16 %v7451_v46  ;;  %v1597_v9 = vunpack.c.l.bf16 %v7454_v47  ;;  %v1659_v15 = vmul.f32 0.25, %v1627_v54  ;;  %8562 = vst [vmem:[#allocation7_spill] sm:$0xff] %v7473_v24 }
  0x8b   : > { %6510 = vmatpush3.bf16.msra.mxu0 %v7216_v23  ;;  %6558 = vmatpush3.bf16.msra.mxu1 %v7216_v23  ;;  %v1628_v4 = vadd.f32 %v1596_v11, %v1564_v50  ;;  %v1630_v34 = vadd.f32 %v1598_v10, %v1566_v2  ;;  %v1535_v11 = vunpack.c.l.bf16 %v7473_v24  ;;  %v1536_v50 = vunpack.c.h.bf16 %v7473_v24  ;;  %v7503_v2 = vld [vmem:[%s7279_s27 + $0x50] sm:$0xff]   ;;  %v7568_v24 = vld [vmem:[%s7279_s27 + $0x1c8] sm:$0xff]  }
  0x8c   : > { %6511 = vmatprep.subr.bf16.mxu0 %v7230_v26  ;;  %6559 = vmatprep.subr.bf16.mxu1 %v7230_v26  ;;  %v1565_v1 = vadd.f32 %v1533_v55, %v1501_v30  ;;  %v7485_v30 = vld [vmem:[%s7279_s27 + $0x1b0] sm:$0xff]   ;;  %v1442_v54 = vunpack.c.h.bf16 %v1310_v14  ;;  %8569 = vst [vmem:[#allocation14_spill] sm:$0xff] %v7568_v24 }
  0x8d   : > { %v1660_v39 = vmul.f32 0.25, %v1628_v4  ;;  %8563 = vst [vmem:[#allocation8_spill] sm:$0xff] %v7485_v30  ;;  %v1474_v4 = vunpack.c.h.bf16 %v7479_v25  ;;  %v1662_v56 = vmul.f32 0.25, %v1630_v34  ;;  %v7515_v34 = vld [vmem:[%s7279_s27 + $0x1b8] sm:$0xff]  }
  0x8e   : > { %8565 = vst [vmem:[#allocation10_spill] sm:$0xff] %v7515_v34 }
  0x8f   : > { %6512 = vmatpush3.bf16.msra.mxu0 %v7230_v26  ;;  %6560 = vmatpush3.bf16.msra.mxu1 %v7230_v26  ;;  %v1687_v35 = vpack.c.bf16 %v1660_v39, %v1659_v15  ;;  %v1506_v10 = vadd.f32 %v1474_v4, %v1442_v54  ;;  %v1601_v4 = vunpack.c.l.bf16 %v7515_v34 }
  0x90   : > { %6513 = vmatprep.subr.bf16.mxu0 %v7256_v33  ;;  %6561 = vmatprep.subr.bf16.mxu1 %v7256_v33 }
  0x91   : > { %1876 = vmatmul.mubr.bf16.gmra.mrb[24].mxu1 %v7194_v17  ;;  %6482 = vmatmul.mubr.bf16.gmra.mrb[24].mxu0 %v1306_v3  ;;  %v1503_v17 = vadd.f32 %v1471_v0, %v1439_v58  ;;  %v1504_v3 = vadd.f32 %v1472_v62, %v1440_v60  ;;  %v7495_v58 = vld [vmem:[%s7279_s27 + $0x48] sm:$0xff]   ;;  %v1599_v62 = vunpack.c.l.bf16 %v7485_v30 }
  0x92   : > { %1883 = vmatprep.mubr.bf16.mxu1 %v1686_v49  ;;  %6485 = vmatprep.mubr.bf16.mxu0 %v1308_v29  ;;  %v1629_v29 = vadd.f32 %v1597_v9, %v1565_v1  ;;  %v1473_v49 = vunpack.c.l.bf16 %v7479_v25  ;;  %v1600_v1 = vunpack.c.h.bf16 %v7485_v30 }
  0x93   : > { %6514 = vmatpush3.bf16.msra.mxu0 %v7256_v33  ;;  %6562 = vmatpush3.bf16.msra.mxu1 %v7256_v33  ;;  %v1567_v60 = vadd.f32 %v1535_v11, %v1503_v17  ;;  %v1568_v0 = vadd.f32 %v1536_v50, %v1504_v3  ;;  %v1444_v11 = vunpack.c.h.bf16 %v7469_v20 }
  0x94   : > { %6515 = vmatprep.subr.bf16.mxu0 %v7268_v36  ;;  %6563 = vmatprep.subr.bf16.mxu1 %v7268_v36  ;;  %v1661_v55 = vmul.f32 0.25, %v1629_v29  ;;  %v1505_v9 = vadd.f32 %v1473_v49, %v1441_v44 }
  0x95   : > { %v1631_v3 = vadd.f32 %v1599_v62, %v1567_v60  ;;  %v1632_v29 = vadd.f32 %v1600_v1, %v1568_v0  ;;  %v7533_v0 = vld [vmem:[%s7279_s27 + $0x60] sm:$0xff]  }
  0x96   : > { %v1688_v17 = vpack.c.bf16 %v1662_v56, %v1661_v55  ;;  %v1602_v55 = vunpack.c.h.bf16 %v7515_v34  ;;  %v7536_v62 = vld [vmem:[%s7279_s27 + $0x140] sm:$0xff]  }
  0x97   : > { %6516 = vmatpush3.bf16.msra.mxu0 %v7268_v36  ;;  %6564 = vmatpush3.bf16.msra.mxu1 %v7268_v36  ;;  %v1663_v56 = vmul.f32 0.25, %v1631_v3  ;;  %v1664_v60 = vmul.f32 0.25, %v1632_v29  ;;  %8566 = vst [vmem:[#allocation11_spill] sm:$0xff] %v7536_v62  ;;  %v1540_v34 = vunpack.c.h.bf16 %v7536_v62  ;;  %v1445_v3 = vunpack.c.l.bf16 %v7495_v58 }
  0x98   : > { %6517 = vmatprep.subr.bf16.mxu0 %v7325_v59  ;;  %6565 = vmatprep.subr.bf16.mxu1 %v7325_v59 }
  0x99   : > { %1884 = vmatmul.mubr.bf16.gmra.mrb[28].mxu1 %v7210_v21  ;;  %6486 = vmatmul.mubr.bf16.gmra.mrb[28].mxu0 %v1310_v14  ;;  %v7500_v21 = vld [vmem:[%s7279_s27 + $0x138] sm:$0xff]   ;;  %v7510_v14 = vld [vmem:[%s7279_s27 + $0xc0] sm:$0xff]  }
  0x9a   : > { %1891 = vmatprep.mubr.bf16.mxu1 %v1687_v35  ;;  %6489 = vmatprep.mubr.bf16.mxu0 %v7469_v20  ;;  %8564 = vst [vmem:[#allocation9_spill] sm:$0xff] %v7500_v21  ;;  %v1537_v15 = vunpack.c.l.bf16 %v7500_v21  ;;  %v1538_v39 = vunpack.c.h.bf16 %v7500_v21  ;;  %v1443_v35 = vunpack.c.l.bf16 %v7469_v20  ;;  %v1475_v50 = vunpack.c.l.bf16 %v7510_v14  ;;  %v7530_v20 = vld [vmem:[%s7279_s27 + $0x58] sm:$0xff]   ;;  %v7544_v21 = vld [vmem:[%s7279_s27 + $0x1c0] sm:$0xff]  }
  0x9b   : > { %6518 = vmatpush3.bf16.msra.mxu0 %v7325_v59  ;;  %6566 = vmatpush3.bf16.msra.mxu1 %v7325_v59  ;;  %v1476_v44 = vunpack.c.h.bf16 %v7510_v14  ;;  %8567 = vst [vmem:[#allocation12_spill] sm:$0xff] %v7544_v21 }
  0x9c   : > { %6519 = vmatprep.subr.bf16.mxu0 %v7361_v28  ;;  %6567 = vmatprep.subr.bf16.mxu1 %v7361_v28  ;;  %v1569_v49 = vadd.f32 %v1537_v15, %v1505_v9  ;;  %v1570_v54 = vadd.f32 %v1538_v39, %v1506_v10  ;;  %v7539_v9 = vld [vmem:[%s7279_s27 + $0xc8] sm:$0xff]   ;;  %v1689_v39 = vpack.c.bf16 %v1664_v60, %v1663_v56  ;;  %v1604_v56 = vunpack.c.h.bf16 %v7544_v21 }
  0x9d   : > { %v1508_v1 = vadd.f32 %v1476_v44, %v1444_v11  ;;  %v1477_v29 = vunpack.c.l.bf16 %v7539_v9  ;;  %v1478_v11 = vunpack.c.h.bf16 %v7539_v9  ;;  %v7562_v60 = vld [vmem:[%s7279_s27 + $0x148] sm:$0xff]  }
  0x9e   : > { %v1633_v10 = vadd.f32 %v1601_v4, %v1569_v49  ;;  %v1634_v15 = vadd.f32 %v1602_v55, %v1570_v54  ;;  %v7554_v49 = vld [vmem:[%s7279_s27 + $0x68] sm:$0xff]   ;;  %v7557_v54 = vld [vmem:[%s7279_s27 + $0x70] sm:$0xff]   ;;  %8568 = vst [vmem:[#allocation13_spill] sm:$0xff] %v7562_v60  ;;  %v1541_v47 = vunpack.c.l.bf16 %v7562_v60 }
  0x9f   : > { %6520 = vmatpush3.bf16.msra.mxu0 %v7361_v28  ;;  %6568 = vmatpush3.bf16.msra.mxu1 %v7361_v28  ;;  %v1572_v55 = vadd.f32 %v1540_v34, %v1508_v1  ;;  %v1542_v34 = vunpack.c.h.bf16 %v7562_v60  ;;  %v7589_v60 = vld [vmem:[%s7279_s27 + $0xd8] sm:$0xff]  }
  0xa0   : > { %6601 = vmatprep.subr.bf16.mxu0 %v7179_v13  ;;  %v1666_v44 = vmul.f32 0.25, %v1634_v15 }
  0xa1   : > { %1892 = vmatmul.mubr.bf16.gmra.mrb[32].mxu1 %v7235_v27  ;;  %6490 = vmatmul.mubr.bf16.gmra.mrb[32].mxu0 %v7495_v58  ;;  %v1507_v27 = vadd.f32 %v1475_v50, %v1443_v35  ;;  %v1446_v35 = vunpack.c.h.bf16 %v7495_v58  ;;  %v1665_v50 = vmul.f32 0.25, %v1633_v10  ;;  %v1603_v58 = vunpack.c.l.bf16 %v7544_v21  ;;  %v7565_v10 = vld [vmem:[%s7279_s27 + $0xd0] sm:$0xff]  }
  0xa2   : > { %1899 = vmatprep.mubr.bf16.mxu1 %v1688_v17  ;;  %6493 = vmatprep.mubr.bf16.mxu0 %v7503_v2  ;;  %v1539_v17 = vunpack.c.l.bf16 %v7536_v62  ;;  %v1636_v30 = vadd.f32 %v1604_v56, %v1572_v55  ;;  %v1479_v1 = vunpack.c.l.bf16 %v7565_v10  ;;  %v7585_v55 = vld [vmem:[%s7279_s27 + $0x150] sm:$0xff]  }
  0xa3   : > { %v1510_v62 = vadd.f32 %v1478_v11, %v1446_v35  ;;  %v1690_v15 = vpack.c.bf16 %v1666_v44, %v1665_v50  ;;  %v1606_v35 = vunpack.c.h.bf16 %v7568_v24  ;;  %v7582_v11 = vld [vmem:[%s7279_s27 + $0x78] sm:$0xff]   ;;  %v1543_v56 = vunpack.c.l.bf16 %v7585_v55 }
  0xa4   : > { %v1571_v4 = vadd.f32 %v1539_v17, %v1507_v27  ;;  %v1447_v27 = vunpack.c.l.bf16 %v7503_v2  ;;  %v1448_v17 = vunpack.c.h.bf16 %v7503_v2  ;;  %v1668_v44 = vmul.f32 0.25, %v1636_v30 }
  0xa5   : > { %v1544_v5 = vunpack.c.h.bf16 %v7585_v55  ;;  %v1449_v30 = vunpack.c.l.bf16 %v7530_v20 }
  0xa9   : > { %1900 = vmatmul.mubr.bf16.gmra.mrb[36].mxu1 %v7250_v31  ;;  %6494 = vmatmul.mubr.bf16.gmra.mrb[36].mxu0 %v7530_v20  ;;  %v1509_v31 = vadd.f32 %v1477_v29, %v1445_v3  ;;  %v1480_v3 = vunpack.c.h.bf16 %v7565_v10  ;;  %v1605_v29 = vunpack.c.l.bf16 %v7568_v24 }
  0xaa   : > { %1907 = vmatprep.mubr.bf16.mxu1 %v1689_v39  ;;  %6497 = vmatprep.mubr.bf16.mxu0 %v7533_v0  ;;  %v1635_v39 = vadd.f32 %v1603_v58, %v1571_v4  ;;  %v1574_v4 = vadd.f32 %v1542_v34, %v1510_v62  ;;  %v1511_v58 = vadd.f32 %v1479_v1, %v1447_v27  ;;  %v1481_v62 = vunpack.c.l.bf16 %v7589_v60 }
  0xab   : > { %v1573_v2 = vadd.f32 %v1541_v47, %v1509_v31  ;;  %v1450_v47 = vunpack.c.h.bf16 %v7530_v20  ;;  %v1482_v31 = vunpack.c.h.bf16 %v7589_v60 }
  0xac   : > { %v1667_v50 = vmul.f32 0.25, %v1635_v39  ;;  %v1638_v43 = vadd.f32 %v1606_v35, %v1574_v4  ;;  %v1575_v20 = vadd.f32 %v1543_v56, %v1511_v58  ;;  %v6865_v58 = vld [vmem:[%s7145_s25 + $0x40] sm:$0xff]  }
  0xad   : > { %v1637_v24 = vadd.f32 %v1605_v29, %v1573_v2  ;;  %v1513_v29 = vadd.f32 %v1481_v62, %v1449_v30  ;;  %v1514_v35 = vadd.f32 %v1482_v31, %v1450_v47 }
  0xae   : > { %v1691_v21 = vpack.c.bf16 %v1668_v44, %v1667_v50  ;;  %v1670_v1 = vmul.f32 0.25, %v1638_v43  ;;  %v1451_v43 = vunpack.c.l.bf16 %v7533_v0 }
  0xaf   : > { %v1669_v27 = vmul.f32 0.25, %v1637_v24 }
  0xb1   : > { %1908 = vmatmul.mubr.bf16.gmra.mrb[40].mxu1 %v7272_v37  ;;  %6498 = vmatmul.mubr.bf16.gmra.mrb[40].mxu0 %v7554_v49  ;;  %v1512_v37 = vadd.f32 %v1480_v3, %v1448_v17  ;;  %v7605_v3 = vld [vmem:[%s7279_s27 + $0x158] sm:$0xff]   ;;  %v1692_v44 = vpack.c.bf16 %v1670_v1, %v1669_v27 }
  0xb2   : > { %1915 = vmatprep.mubr.bf16.mxu1 %v1690_v15  ;;  %6501 = vmatprep.mubr.bf16.mxu0 %v7557_v54  ;;  %v7592_v15 = vld [vmem:[%s7279_s27 + $0x1d0] sm:$0xff]   ;;  %v1545_v50 = vunpack.c.l.bf16 %v7605_v3 }
  0xb3   : > { %8570 = vst [vmem:[#allocation15_spill] sm:$0xff] %v7592_v15  ;;  %v1607_v39 = vunpack.c.l.bf16 %v7592_v15  ;;  %v1608_v34 = vunpack.c.h.bf16 %v7592_v15  ;;  %v1576_v17 = vadd.f32 %v1544_v5, %v1512_v37  ;;  %v7612_v15 = vld [vmem:[%s7279_s27 + $0x1d8] sm:$0xff]   ;;  %v1452_v5 = vunpack.c.h.bf16 %v7533_v0  ;;  %v7627_v0 = vld [vmem:[%s7279_s27 + $0x160] sm:$0xff]  }
  0xb4   : > { %v1577_v37 = vadd.f32 %v1545_v50, %v1513_v29  ;;  %v1609_v56 = vunpack.c.l.bf16 %v7612_v15  ;;  %v1610_v31 = vunpack.c.h.bf16 %v7612_v15  ;;  %v1548_v29 = vunpack.c.h.bf16 %v7627_v0 }
  0xb5   : > { %v1639_v2 = vadd.f32 %v1607_v39, %v1575_v20  ;;  %v1640_v4 = vadd.f32 %v1608_v34, %v1576_v17  ;;  %v7630_v34 = vld [vmem:[%s7279_s27 + $0xe8] sm:$0xff]   ;;  %v7634_v20 = vld [vmem:[%s7279_s27 + $0x1e0] sm:$0xff]   ;;  %v1547_v17 = vunpack.c.l.bf16 %v7627_v0  ;;  %v1454_v50 = vunpack.c.h.bf16 %v7554_v49 }
  0xb6   : > { %v1641_v27 = vadd.f32 %v1609_v56, %v1577_v37 }
  0xb7   : > { %v1671_v30 = vmul.f32 0.25, %v1639_v2  ;;  %v1672_v47 = vmul.f32 0.25, %v1640_v4  ;;  %v1612_v2 = vunpack.c.h.bf16 %v7634_v20 }
  0xb8   : > { %v1673_v4 = vmul.f32 0.25, %v1641_v27 }
  0xb9   : > { %1916 = vmatmul.mubr.bf16.gmra.mrb[44].mxu1 %v7342_v7  ;;  %6502 = vmatmul.mubr.bf16.gmra.mrb[44].mxu0 %v7582_v11  ;;  %v7608_v7 = vld [vmem:[%s7279_s27 + $0xe0] sm:$0xff]  }
  0xba   : > { %1923 = vmatprep.mubr.bf16.mxu1 %v1691_v21  ;;  %6521 = vmatprep.mubr.bf16.mxu0 %v7285_v40  ;;  %v1546_v40 = vunpack.c.h.bf16 %v7605_v3  ;;  %v1483_v24 = vunpack.c.l.bf16 %v7608_v7  ;;  %v1484_v21 = vunpack.c.h.bf16 %v7608_v7 }
  0xbc   : > { %v1578_v62 = vadd.f32 %v1546_v40, %v1514_v35  ;;  %v1515_v39 = vadd.f32 %v1483_v24, %v1451_v43  ;;  %v1485_v35 = vunpack.c.l.bf16 %v7630_v34 }
  0xbe   : > { %v1642_v1 = vadd.f32 %v1610_v31, %v1578_v62  ;;  %v1579_v43 = vadd.f32 %v1547_v17, %v1515_v39  ;;  %v1456_v62 = vunpack.c.h.bf16 %v7557_v54 }
  0xc0   : > { %v1674_v40 = vmul.f32 0.25, %v1642_v1 }
  0xc1   : > { %1924 = vmatmul.mubr.bf16.gmra.mrb[48].mxu1 %v6865_v58  ;;  %6522 = vmatmul.mubr.bf16.vlgmr.msra.gmra.mrb[48].mxu0 %v7301_v48  ;;  %v1516_v48 = vadd.f32 %v1484_v21, %v1452_v5 }
  0xc2   : > { %6602 = vmatpush3.bf16.msra.mxu0 %v7179_v13  ;;  %1931 = vmatprep.mubr.bf16.mxu1 %v1692_v44  ;;  %v1693_v13 = vpack.c.bf16 %v1672_v47, %v1671_v30  ;;  %v1486_v44 = vunpack.c.h.bf16 %v7630_v34  ;;  %v1694_v58 = vpack.c.bf16 %v1674_v40, %v1673_v4  ;;  %v6866_v40 = vld [vmem:[%s7145_s25 + $0x58] sm:$0xff]  }
  0xc3   : > { %6525 = vmatprep.mubr.bf16.mxu0 %v7339_v6  ;;  %6603 = vmatprep.subr.bf16.mxu0 %v7190_v16  ;;  %v1453_v6 = vunpack.c.l.bf16 %v7554_v49  ;;  %v1580_v24 = vadd.f32 %v1548_v29, %v1516_v48  ;;  %v7649_v49 = vld [vmem:[%s7279_s27 + $0x168] sm:$0xff]  }
  0xc4   : > { %v1549_v21 = vunpack.c.l.bf16 %v7649_v49  ;;  %v1550_v30 = vunpack.c.h.bf16 %v7649_v49 }
  0xc5   : > { %v1517_v5 = vadd.f32 %v1485_v35, %v1453_v6  ;;  %v1644_v56 = vadd.f32 %v1612_v2, %v1580_v24  ;;  %v1458_v2 = vunpack.c.h.bf16 %v7582_v11 }
  0xc6   : > { %6604 = vmatpush3.bf16.msra.mxu0 %v7190_v16  ;;  %v1611_v16 = vunpack.c.l.bf16 %v7634_v20 }
  0xc7   : > { %6605 = vmatprep.subr.bf16.mxu0 %v7216_v23  ;;  %v1676_v27 = vmul.f32 0.25, %v1644_v56 }
  0xc8   : > { %v1643_v37 = vadd.f32 %v1611_v16, %v1579_v43  ;;  %v1457_v16 = vunpack.c.l.bf16 %v7582_v11  ;;  %v7694_v11 = vld [vmem:[%s7279_s27 + $0x178] sm:$0xff]  }
  0xc9   : > { %1932 = vmatmul.mubr.bf16.gmra.mrb[52].mxu1 %v7174_v12  ;;  %6526 = vmatmul.mubr.bf16.gmra.mrb[52].mxu0 %v7367_v45  ;;  %v1518_v12 = vadd.f32 %v1486_v44, %v1454_v50  ;;  %v7654_v45 = vld [vmem:[%s7279_s27 + $0xf0] sm:$0xff]  }
  0xca   : > { %1939 = vmatprep.mubr.bf16.mxu1 %v1693_v13  ;;  %6529 = vmatprep.mubr.bf16.mxu0 %v7401_v22  ;;  %v7658_v22 = vld [vmem:[%s7279_s27 + $0x1e8] sm:$0xff]   ;;  %v1487_v47 = vunpack.c.l.bf16 %v7654_v45  ;;  %v1488_v31 = vunpack.c.h.bf16 %v7654_v45  ;;  %v1675_v48 = vmul.f32 0.25, %v1643_v37  ;;  %v1581_v13 = vadd.f32 %v1549_v21, %v1517_v5 }
  0xcb   : > { %6606 = vmatpush3.bf16.msra.mxu0 %v7216_v23  ;;  %v1455_v23 = vunpack.c.l.bf16 %v7557_v54  ;;  %v1613_v39 = vunpack.c.l.bf16 %v7658_v22  ;;  %v1582_v1 = vadd.f32 %v1550_v30, %v1518_v12  ;;  %v7673_v54 = vld [vmem:[%s7279_s27 + $0x170] sm:$0xff]  }
  0xcc   : > { %6607 = vmatprep.subr.bf16.mxu0 %v7230_v26  ;;  %v1551_v29 = vunpack.c.l.bf16 %v7673_v54  ;;  %v1695_v6 = vpack.c.bf16 %v1676_v27, %v1675_v48  ;;  %v1552_v44 = vunpack.c.h.bf16 %v7673_v54 }
  0xcd   : > { %v1519_v17 = vadd.f32 %v1487_v47, %v1455_v23  ;;  %v1645_v35 = vadd.f32 %v1613_v39, %v1581_v13  ;;  %v7698_v23 = vld [vmem:[%s7279_s27 + $0x1f8] sm:$0xff]   ;;  %v1554_v47 = vunpack.c.h.bf16 %v7694_v11 }
  0xcf   : > { %6608 = vmatpush3.bf16.msra.mxu0 %v7230_v26  ;;  %v1614_v26 = vunpack.c.h.bf16 %v7658_v22  ;;  %v1583_v43 = vadd.f32 %v1551_v29, %v1519_v17 }
  0xd0   : > { %6609 = vmatprep.subr.bf16.mxu0 %v7256_v33 }
  0xd1   : > { %1940 = vmatmul.mubr.bf16.gmra.mrb[56].mxu1 %v7197_v18  ;;  %6530 = vmatmul.mubr.bf16.gmra.mrb[56].mxu0 %v7425_v63  ;;  %v1520_v18 = vadd.f32 %v1488_v31, %v1456_v62  ;;  %v5118_v63 = vld [vmem:[%s7279_s27 + $0xf8] sm:$0xff]   ;;  %v1646_v50 = vadd.f32 %v1614_v26, %v1582_v1  ;;  %v6867_v62 = vld [vmem:[%s7145_s25 + $0x60] sm:$0xff]   ;;  %v1618_v31 = vunpack.c.h.bf16 %v7698_v23 }
  0xd2   : > { %1947 = vmatprep.mubr.bf16.mxu1 %v1694_v58  ;;  %6533 = vmatprep.mubr.bf16.mxu0 %v7451_v46  ;;  %v7680_v46 = vld [vmem:[%s7279_s27 + $0x1f0] sm:$0xff]   ;;  %v1490_v4 = vunpack.c.h.bf16 %v5118_v63 }
  0xd3   : > { %6610 = vmatpush3.bf16.msra.mxu0 %v7256_v33  ;;  %v1489_v33 = vunpack.c.l.bf16 %v5118_v63  ;;  %v1615_v24 = vunpack.c.l.bf16 %v7680_v46  ;;  %v1678_v5 = vmul.f32 0.25, %v1646_v50  ;;  %v1584_v12 = vadd.f32 %v1552_v44, %v1520_v18  ;;  %v6868_v18 = vld [vmem:[%s7145_s25 + $0x68] sm:$0xff]  }
  0xd4   : > { %6611 = vmatprep.subr.bf16.mxu0 %v7268_v36  ;;  %v1616_v21 = vunpack.c.h.bf16 %v7680_v46 }
  0xd5   : > { %v1521_v58 = vadd.f32 %v1489_v33, %v1457_v16  ;;  %v1647_v37 = vadd.f32 %v1615_v24, %v1583_v43 }
  0xd6   : > { %v1648_v30 = vadd.f32 %v1616_v21, %v1584_v12 }
  0xd7   : > { %6612 = vmatpush3.bf16.msra.mxu0 %v7268_v36  ;;  %v1677_v36 = vmul.f32 0.25, %v1645_v35  ;;  %v1679_v39 = vmul.f32 0.25, %v1647_v37 }
  0xd8   : > { %6613 = vmatprep.subr.bf16.mxu0 %v7325_v59  ;;  %v1680_v26 = vmul.f32 0.25, %v1648_v30 }
  0xd9   : > { %1948 = vmatmul.mubr.bf16.gmra.mrb[60].mxu1 %v6866_v40  ;;  %6534 = vmatmul.mubr.bf16.gmra.mrb[60].mxu0 %v7479_v25  ;;  %v1522_v25 = vadd.f32 %v1490_v4, %v1458_v2  ;;  %v1696_v56 = vpack.c.bf16 %v1678_v5, %v1677_v36 }
  0xda   : > { %1955 = vmatprep.mubr.bf16.mxu1 %v1695_v6  ;;  %6537 = vmatprep.mubr.bf16.mxu0 %v7510_v14  ;;  %v1553_v14 = vunpack.c.l.bf16 %v7694_v11  ;;  %v1697_v13 = vpack.c.bf16 %v1680_v26, %v1679_v39 }
  0xdb   : > { %6614 = vmatpush3.bf16.msra.mxu0 %v7325_v59  ;;  %v1617_v59 = vunpack.c.l.bf16 %v7698_v23  ;;  %v1586_v27 = vadd.f32 %v1554_v47, %v1522_v25  ;;  %v7820_v47 = vld [vmem:[%s8542_s7] ss:$0 sm:$0xff] }
  0xdc   : > { %6615 = vmatprep.subr.bf16.mxu0 %v7361_v28  ;;  %v1585_v48 = vadd.f32 %v1553_v14, %v1521_v58 }
  0xdd   : > { %v1650_v17 = vadd.f32 %v1618_v31, %v1586_v27 }
  0xde   : > { %v1649_v1 = vadd.f32 %v1617_v59, %v1585_v48  ;;  %v7825_v59 = vld [vmem:[%s8541_s6] ss:$0 sm:$0xff] }
  0xdf   : > { %6616 = vmatpush3.bf16.msra.mxu0 %v7361_v28 }
  0xe0   : > { %v1681_v28 = vmul.f32 0.25, %v1649_v1 }
  0xe1   : > { %1956 = vmatmul.mubr.bf16.gmra.mrb[64].mxu1 %v6867_v62  ;;  %6538 = vmatmul.mubr.bf16.gmra.mrb[64].mxu0 %v7539_v9  ;;  %v1682_v9 = vmul.f32 0.25, %v1650_v17 }
  0xe2   : > { %1963 = vmatprep.mubr.bf16.mxu1 %v1696_v56  ;;  %6541 = vmatprep.mubr.bf16.mxu0 %v7565_v10  ;;  %v7814_v56 = vld [vmem:[%s8540_s5] ss:$0 sm:$0xff] }
  0xe3   : > { %v1698_v29 = vpack.c.bf16 %v1682_v9, %v1681_v28 }
  0xe9   : > { %1964 = vmatmul.mubr.bf16.gmra.mrb[68].mxu1 %v6868_v18  ;;  %6542 = vmatmul.mubr.bf16.gmra.mrb[68].mxu0 %v7589_v60  ;;  %v8582_v60 = vld [vmem:[#allocation15_spill] sm:$0xff] }
  0xea   : > { %1971 = vmatprep.mubr.bf16.mxu1 %v1697_v13  ;;  %6545 = vmatprep.mubr.bf16.mxu0 %v7608_v7  ;;  %v7832_v13 = vld [vmem:[%s8543_s8] ss:$0 sm:$0xff] }
  0xf1   : > { %1972 = vmatmul.mubr.bf16.gmra.mrb[72].mxu1 %v7275_v38  ;;  %6546 = vmatmul.mubr.bf16.gmra.mrb[72].mxu0 %v7630_v34  ;;  %v8571_v38 = vld [vmem:[#allocation4_spill] sm:$0xff] }
  0xf2   : > { %1979 = vmatprep.mubr.bf16.mxu1 %v1698_v29  ;;  %6549 = vmatprep.mubr.bf16.mxu0 %v7654_v45 }
  0xf9   : > { %1980 = vmatmul.mubr.bf16.gmra.mrb[76].mxu1 %v7345_v8  ;;  %6550 = vmatmul.mubr.bf16.gmra.mrb[76].mxu0 %v5118_v63  ;;  %v8572_v8 = vld [vmem:[#allocation5_spill] sm:$0xff] }
  0xfa   : > { %6569 = vmatprep.mubr.bf16.mxu1 %v7288_v41  ;;  %6617 = vmatprep.mubr.bf16.mxu0 %v7291_v42  ;;  %v8573_v41 = vld [vmem:[#allocation6_spill] sm:$0xff]  ;;  %v8574_v42 = vld [vmem:[#allocation7_spill] sm:$0xff] }
 0x101   : > { %6570 = vmatmul.mubr.bf16.vlgmr.msra.gmra.mrb[80].mxu1 %v7307_v51  ;;  %6618 = vmatmul.mubr.bf16.vlgmr.msra.gmra.mrb[80].mxu0 %v7316_v57  ;;  %v8575_v51 = vld [vmem:[#allocation8_spill] sm:$0xff]  ;;  %v8576_v57 = vld [vmem:[#allocation9_spill] sm:$0xff] }
 0x102   : > { %6573 = vmatprep.mubr.bf16.mxu1 %v7375_v52  ;;  %6621 = vmatprep.mubr.bf16.mxu0 %v7378_v53  ;;  %v8577_v52 = vld [vmem:[#allocation10_spill] sm:$0xff]  ;;  %v8578_v53 = vld [vmem:[#allocation11_spill] sm:$0xff] }
 0x109   : > { %6574 = vmatmul.mubr.bf16.gmra.mrb[84].mxu1 %v7396_v19  ;;  %6622 = vmatmul.mubr.bf16.gmra.mrb[84].mxu0 %v7405_v32  ;;  %v8579_v19 = vld [vmem:[#allocation12_spill] sm:$0xff]  ;;  %v8580_v32 = vld [vmem:[#allocation13_spill] sm:$0xff] }
 0x10a   : > { %6577 = vmatprep.mubr.bf16.mxu1 %v7421_v61  ;;  %6625 = vmatprep.mubr.bf16.mxu0 %v8571_v38  ;;  %v8581_v61 = vld [vmem:[#allocation14_spill] sm:$0xff] }
 0x111   : > { %6578 = vmatmul.mubr.bf16.gmra.mrb[88].mxu1 %v8572_v8  ;;  %6626 = vmatmul.mubr.bf16.gmra.mrb[88].mxu0 %v8573_v41 }
 0x112   : > { %6581 = vmatprep.mubr.bf16.mxu1 %v8574_v42  ;;  %6629 = vmatprep.mubr.bf16.mxu0 %v8575_v51 }
 0x119   : > { %6582 = vmatmul.mubr.bf16.gmra.mrb[92].mxu1 %v8576_v57  ;;  %6630 = vmatmul.mubr.bf16.gmra.mrb[92].mxu0 %v8577_v52 }
 0x11a   : > { %6585 = vmatprep.mubr.bf16.mxu1 %v8578_v53  ;;  %6633 = vmatprep.mubr.bf16.mxu0 %v8579_v19 }
 0x121   : > { %6586 = vmatmul.mubr.bf16.gmra.mrb[96].mxu1 %v8580_v32  ;;  %6634 = vmatmul.mubr.bf16.gmra.mrb[96].mxu0 %v8581_v61 }
 0x122   : > { %6589 = vmatprep.mubr.bf16.mxu1 %v7585_v55  ;;  %6637 = vmatprep.mubr.bf16.mxu0 %v8582_v60 }
 0x129   : > { %6590 = vmatmul.mubr.bf16.gmra.mrb[100].mxu1 %v7605_v3  ;;  %6638 = vmatmul.mubr.bf16.gmra.mrb[100].mxu0 %v7612_v15 }
 0x12a   : > { %6593 = vmatprep.mubr.bf16.mxu1 %v7627_v0  ;;  %6641 = vmatprep.mubr.bf16.mxu0 %v7634_v20 }
 0x131   : > { %6594 = vmatmul.mubr.bf16.gmra.mrb[104].mxu1 %v7649_v49  ;;  %6642 = vmatmul.mubr.bf16.gmra.mrb[104].mxu0 %v7658_v22 }
 0x132   : > { %6597 = vmatprep.mubr.bf16.mxu1 %v7673_v54  ;;  %6645 = vmatprep.mubr.bf16.mxu0 %v7680_v46 }
 0x134   : > { %v7745_v10 = vpop.f32.mrb[0].mxu0  ;;  %v7747_v55 = vpop.f32.mrb[0].mxu1 }
 0x135   : > { %v7749_v7 = vpop.f32.mrb[1].mxu0  ;;  %v7751_v3 = vpop.f32.mrb[1].mxu1 }
 0x136   : > { %v7753_v15 = vpop.f32.mrb[2].mxu0  ;;  %v7755_v0 = vpop.f32.mrb[2].mxu1 }
 0x137   : > { %v7757_v34 = vpop.f32.mrb[3].mxu0  ;;  %v7759_v20 = vpop.f32.mrb[3].mxu1 }
 0x139   : > { %6598 = vmatmul.mubr.bf16.gmra.mrb[108].mxu1 %v7694_v11  ;;  %6646 = vmatmul.mubr.bf16.gmra.mrb[108].mxu0 %v7698_v23 }
 0x13c   : > { %v7763_v49 = vpop.f32.mrb[4].mxu0  ;;  %v7765_v45 = vpop.f32.mrb[4].mxu1 }
 0x13d   : > { %v7767_v22 = vpop.f32.mrb[5].mxu0  ;;  %v7769_v54 = vpop.f32.mrb[5].mxu1 }
 0x13e   : > { %v7771_v63 = vpop.f32.mrb[6].mxu0  ;;  %v7773_v6 = vpop.f32.mrb[6].mxu1 }
 0x13f   : > { %v7775_v35 = vpop.f32.mrb[7].mxu0  ;;  %v7777_v50 = vpop.f32.mrb[7].mxu1 }
 0x144   : > { %v7779_v46 = vpop.f32.mrb[8].mxu0  ;;  %v7781_v44 = vpop.f32.mrb[8].mxu1 }
 0x145   : > { %v7783_v16 = vpop.f32.mrb[9].mxu0  ;;  %v7785_v33 = vpop.f32.mrb[9].mxu1 }
 0x146   : > { %v7787_v2 = vpop.f32.mrb[10].mxu0  ;;  %v7789_v4 = vpop.f32.mrb[10].mxu1 }
 0x147   : > { %v7791_v40 = vpop.f32.mrb[11].mxu0  ;;  %v7793_v43 = vpop.f32.mrb[11].mxu1 }
 0x14c   : > { %v7795_v24 = vpop.f32.mrb[12].mxu0  ;;  %v7797_v36 = vpop.f32.mrb[12].mxu1 }
 0x14d   : > { %v7799_v5 = vpop.f32.mrb[13].mxu0  ;;  %v7801_v12 = vpop.f32.mrb[13].mxu1 }
 0x14e   : > { %v7803_v21 = vpop.f32.mrb[14].mxu0  ;;  %v7805_v11 = vpop.f32.mrb[14].mxu1 }
 0x14f   : > { %v7807_v58 = vpop.f32.mrb[15].mxu0  ;;  %v7809_v25 = vpop.f32.mrb[15].mxu1 }
 0x154   : > { %v6217_v37 = vpop.f32.mrb[16].mxu1  ;;  %v6475_v30 = vpop.f32.mrb[16].mxu0 }
 0x155   : > { %v2463_v23 = vadd.f32 %v6475_v30, %v7745_v10  ;;  %v6218_v14 = vpop.f32.mrb[17].mxu1  ;;  %v2454_v62 = vpop.f32.mrb[17].mxu0 }
 0x156   : > { %v6219_v31 = vadd.f32 %v6218_v14, %v6217_v37  ;;  %v2455_v39 = vadd.f32 %v2454_v62, %v7749_v7  ;;  %v6220_v26 = vpop.f32.mrb[18].mxu1  ;;  %v6476_v48 = vpop.f32.mrb[18].mxu0 }
 0x157   : > { %v2589_v27 = vmul.f32 %v7814_v56, %v2463_v23  ;;  %v2466_v1 = vadd.f32 %v6476_v48, %v7753_v15  ;;  %v6221_v17 = vpop.f32.mrb[19].mxu1  ;;  %v2457_v18 = vpop.f32.mrb[19].mxu0 }
 0x158   : > { %v1995_v28 = vmul.f32 %v6219_v31, %v7820_v47  ;;  %v2587_v9 = vmul.f32 %v7814_v56, %v2455_v39  ;;  %v6222_v29 = vadd.f32 %v6221_v17, %v6220_v26  ;;  %v2458_v38 = vadd.f32 %v2457_v18, %v7757_v34 }
 0x159   : > { %v2627_v8 = vadd.f32 %v7825_v59, %v2589_v27  ;;  %v2590_v41 = vmul.f32 %v7814_v56, %v2466_v1 }
 0x15a   : > { %v2034_v42 = vadd.f32 %v7832_v13, %v1995_v28  ;;  %v2625_v51 = vadd.f32 %v7825_v59, %v2587_v9  ;;  %v1996_v57 = vmul.f32 %v6222_v29, %v7820_v47  ;;  %v2588_v52 = vmul.f32 %v7814_v56, %v2458_v38 }
 0x15b   : > { %v2628_v53 = vadd.f32 %v7825_v59, %v2590_v41  ;;  %v2659_v19 = vmax.f32 %v2627_v8, 0.0 }
 0x15c   : > { %v2035_v32 = vadd.f32 %v7832_v13, %v1996_v57  ;;  %v2626_v61 = vadd.f32 %v7825_v59, %v2588_v52  ;;  %v6223_v60 = vpop.f32.mrb[20].mxu1  ;;  %v6479_v37 = vpop.f32.mrb[20].mxu0  ;;  %v2066_v30 = vmax.f32 %v2034_v42, 0.0  ;;  %v2657_v23 = vmax.f32 %v2625_v51, 0.0 }
 0x15d   : > { %v2660_v14 = vmax.f32 %v2628_v53, 0.0  ;;  %v2479_v62 = vadd.f32 %v6479_v37, %v7763_v49  ;;  %v6224_v31 = vpop.f32.mrb[21].mxu1  ;;  %v2470_v39 = vpop.f32.mrb[21].mxu0 }
 0x15e   : > { %v2067_v26 = vmax.f32 %v2035_v32, 0.0  ;;  %v2658_v48 = vmax.f32 %v2626_v61, 0.0  ;;  %v6225_v27 = vadd.f32 %v6224_v31, %v6223_v60  ;;  %v2471_v1 = vadd.f32 %v2470_v39, %v7767_v22  ;;  %v6226_v17 = vpop.f32.mrb[22].mxu1  ;;  %v6480_v18 = vpop.f32.mrb[22].mxu0 }
 0x15f   : > { %v5787_v28 = vpack.c.bf16 %v2660_v14, %v2659_v19  ;;  %v2593_v9 = vmul.f32 %v7814_v56, %v2479_v62  ;;  %v2482_v29 = vadd.f32 %v6480_v18, %v7771_v63  ;;  %v6227_v38 = vpop.f32.mrb[23].mxu1  ;;  %v2473_v8 = vpop.f32.mrb[23].mxu0 }
 0x160   : > { %v5702_v41 = vpack.c.bf16 %v2067_v26, %v2066_v30  ;;  %v5782_v42 = vpack.c.bf16 %v2658_v48, %v2657_v23  ;;  %v1997_v51 = vmul.f32 %v6225_v27, %v7820_v47  ;;  %v2591_v57 = vmul.f32 %v7814_v56, %v2471_v1 }
 0x161   : > { %6114 = vst [vmem:[%s7861_s12 + $0x8] sm:$0xff] %v5787_v28   ;;  %v2631_v52 = vadd.f32 %v7825_v59, %v2593_v9  ;;  %v2594_v53 = vmul.f32 %v7814_v56, %v2482_v29  ;;  %v6228_v19 = vadd.f32 %v6227_v38, %v6226_v17  ;;  %v2474_v32 = vadd.f32 %v2473_v8, %v7775_v35 }
 0x162   : > { %5703 = vst [vmem:[%s7854_s30] sm:$0xff] %v5702_v41   ;;  %5783 = vst [vmem:[%s7861_s12] sm:$0xff] %v5782_v42   ;;  %v2036_v61 = vadd.f32 %v7832_v13, %v1997_v51  ;;  %v2629_v60 = vadd.f32 %v7825_v59, %v2591_v57 }
 0x163   : > { %v2632_v37 = vadd.f32 %v7825_v59, %v2594_v53  ;;  %v1998_v30 = vmul.f32 %v6228_v19, %v7820_v47  ;;  %v2592_v23 = vmul.f32 %v7814_v56, %v2474_v32  ;;  %v2663_v14 = vmax.f32 %v2631_v52, 0.0 }
 0x164   : > { %v6229_v62 = vpop.f32.mrb[24].mxu1  ;;  %v6483_v31 = vpop.f32.mrb[24].mxu0  ;;  %v2068_v18 = vmax.f32 %v2036_v61, 0.0  ;;  %v2661_v28 = vmax.f32 %v2629_v60, 0.0 }
 0x165   : > { %v2664_v39 = vmax.f32 %v2632_v37, 0.0  ;;  %v2037_v26 = vadd.f32 %v7832_v13, %v1998_v30  ;;  %v2630_v48 = vadd.f32 %v7825_v59, %v2592_v23  ;;  %v2495_v27 = vadd.f32 %v6483_v31, %v7779_v46  ;;  %v6230_v1 = vpop.f32.mrb[25].mxu1  ;;  %v2486_v17 = vpop.f32.mrb[25].mxu0 }
 0x166   : > { %v6231_v9 = vadd.f32 %v6230_v1, %v6229_v62  ;;  %v2487_v29 = vadd.f32 %v2486_v17, %v7783_v16  ;;  %v6232_v38 = vpop.f32.mrb[26].mxu1  ;;  %v6484_v8 = vpop.f32.mrb[26].mxu0 }
 0x167   : > { %v5797_v41 = vpack.c.bf16 %v2664_v39, %v2663_v14  ;;  %v2069_v42 = vmax.f32 %v2037_v26, 0.0  ;;  %v2662_v51 = vmax.f32 %v2630_v48, 0.0  ;;  %v2597_v57 = vmul.f32 %v7814_v56, %v2495_v27  ;;  %v6233_v52 = vpop.f32.mrb[27].mxu1  ;;  %v2489_v53 = vpop.f32.mrb[27].mxu0 }
 0x168   : > { %v1999_v19 = vmul.f32 %v6231_v9, %v7820_v47  ;;  %v2595_v32 = vmul.f32 %v7814_v56, %v2487_v29  ;;  %v2498_v61 = vadd.f32 %v6484_v8, %v7787_v2  ;;  %v6234_v60 = vadd.f32 %v6233_v52, %v6232_v38 }
 0x169   : > { %6116 = vst [vmem:[%s7861_s12 + $0x18] sm:$0xff] %v5797_v41   ;;  %v5707_v37 = vpack.c.bf16 %v2069_v42, %v2068_v18  ;;  %v5792_v30 = vpack.c.bf16 %v2662_v51, %v2661_v28  ;;  %v2635_v23 = vadd.f32 %v7825_v59, %v2597_v57  ;;  %v2490_v14 = vadd.f32 %v2489_v53, %v7791_v40 }
 0x16a   : > { %v2038_v62 = vadd.f32 %v7832_v13, %v1999_v19  ;;  %v2598_v31 = vmul.f32 %v7814_v56, %v2498_v61  ;;  %v2000_v39 = vmul.f32 %v6234_v60, %v7820_v47  ;;  %v2633_v26 = vadd.f32 %v7825_v59, %v2595_v32 }
 0x16b   : > { %6099 = vst [vmem:[%s7854_s30 + $0x8] sm:$0xff] %v5707_v37   ;;  %6115 = vst [vmem:[%s7861_s12 + $0x10] sm:$0xff] %v5792_v30   ;;  %v2596_v48 = vmul.f32 %v7814_v56, %v2490_v14  ;;  %v2667_v28 = vmax.f32 %v2635_v23, 0.0 }
 0x16c   : > { %v2636_v27 = vadd.f32 %v7825_v59, %v2598_v31  ;;  %v2039_v1 = vadd.f32 %v7832_v13, %v2000_v39  ;;  %v6235_v17 = vpop.f32.mrb[28].mxu1  ;;  %v6487_v18 = vpop.f32.mrb[28].mxu0  ;;  %v2070_v9 = vmax.f32 %v2038_v62, 0.0  ;;  %v2665_v32 = vmax.f32 %v2633_v26, 0.0 }
 0x16d   : > { %v2634_v29 = vadd.f32 %v7825_v59, %v2596_v48  ;;  %v2511_v38 = vadd.f32 %v6487_v18, %v7795_v24  ;;  %v6236_v8 = vpop.f32.mrb[29].mxu1  ;;  %v2502_v41 = vpop.f32.mrb[29].mxu0 }
 0x16e   : > { %v2668_v42 = vmax.f32 %v2636_v27, 0.0  ;;  %v2071_v51 = vmax.f32 %v2039_v1, 0.0  ;;  %v6237_v57 = vadd.f32 %v6236_v8, %v6235_v17  ;;  %v2503_v52 = vadd.f32 %v2502_v41, %v7799_v5  ;;  %v6238_v53 = vpop.f32.mrb[30].mxu1  ;;  %v6488_v19 = vpop.f32.mrb[30].mxu0 }
 0x16f   : > { %v2666_v61 = vmax.f32 %v2634_v29, 0.0  ;;  %v2601_v60 = vmul.f32 %v7814_v56, %v2511_v38  ;;  %v2514_v37 = vadd.f32 %v6488_v19, %v7803_v21  ;;  %v6239_v30 = vpop.f32.mrb[31].mxu1  ;;  %v2505_v23 = vpop.f32.mrb[31].mxu0 }
 0x170   : > { %v5807_v14 = vpack.c.bf16 %v2668_v42, %v2667_v28  ;;  %v5712_v62 = vpack.c.bf16 %v2071_v51, %v2070_v9  ;;  %v2001_v31 = vmul.f32 %v6237_v57, %v7820_v47  ;;  %v2599_v39 = vmul.f32 %v7814_v56, %v2503_v52 }
 0x171   : > { %v5802_v48 = vpack.c.bf16 %v2666_v61, %v2665_v32  ;;  %v2639_v27 = vadd.f32 %v7825_v59, %v2601_v60  ;;  %v2602_v1 = vmul.f32 %v7814_v56, %v2514_v37  ;;  %v6240_v26 = vadd.f32 %v6239_v30, %v6238_v53 }
 0x172   : > { %6118 = vst [vmem:[%s7861_s12 + $0x28] sm:$0xff] %v5807_v14   ;;  %6100 = vst [vmem:[%s7854_s30 + $0x10] sm:$0xff] %v5712_v62   ;;  %v2040_v17 = vadd.f32 %v7832_v13, %v2001_v31  ;;  %v2637_v18 = vadd.f32 %v7825_v59, %v2599_v39  ;;  %v2506_v29 = vadd.f32 %v2505_v23, %v7807_v58 }
 0x173   : > { %6117 = vst [vmem:[%s7861_s12 + $0x20] sm:$0xff] %v5802_v48   ;;  %v2640_v28 = vadd.f32 %v7825_v59, %v2602_v1  ;;  %v2002_v9 = vmul.f32 %v6240_v26, %v7820_v47  ;;  %v2671_v38 = vmax.f32 %v2639_v27, 0.0 }
 0x174   : > { %v2600_v8 = vmul.f32 %v7814_v56, %v2506_v29  ;;  %v6241_v41 = vpop.f32.mrb[32].mxu1  ;;  %v6491_v42 = vpop.f32.mrb[32].mxu0  ;;  %v2072_v51 = vmax.f32 %v2040_v17, 0.0  ;;  %v2669_v61 = vmax.f32 %v2637_v18, 0.0 }
 0x175   : > { %v2672_v57 = vmax.f32 %v2640_v28, 0.0  ;;  %v2041_v52 = vadd.f32 %v7832_v13, %v2002_v9  ;;  %v2527_v53 = vadd.f32 %v6491_v42, %v7747_v55  ;;  %v6242_v19 = vpop.f32.mrb[33].mxu1  ;;  %v2518_v32 = vpop.f32.mrb[33].mxu0 }
 0x176   : > { %v2638_v60 = vadd.f32 %v7825_v59, %v2600_v8  ;;  %v6243_v37 = vadd.f32 %v6242_v19, %v6241_v41  ;;  %v2519_v30 = vadd.f32 %v2518_v32, %v7751_v3  ;;  %v6244_v23 = vpop.f32.mrb[34].mxu1  ;;  %v6492_v14 = vpop.f32.mrb[34].mxu0 }
 0x177   : > { %v5817_v62 = vpack.c.bf16 %v2672_v57, %v2671_v38  ;;  %v2073_v31 = vmax.f32 %v2041_v52, 0.0  ;;  %v2605_v39 = vmul.f32 %v7814_v56, %v2527_v53  ;;  %v2530_v48 = vadd.f32 %v6492_v14, %v7755_v0  ;;  %v6245_v27 = vpop.f32.mrb[35].mxu1  ;;  %v2521_v1 = vpop.f32.mrb[35].mxu0 }
 0x178   : > { %v2670_v26 = vmax.f32 %v2638_v60, 0.0  ;;  %v2003_v17 = vmul.f32 %v6243_v37, %v7820_v47  ;;  %v2603_v18 = vmul.f32 %v7814_v56, %v2519_v30  ;;  %v6246_v29 = vadd.f32 %v6245_v27, %v6244_v23 }
 0x179   : > { %6120 = vst [vmem:[%s7861_s12 + $0x38] sm:$0xff] %v5817_v62   ;;  %v5717_v28 = vpack.c.bf16 %v2073_v31, %v2072_v51  ;;  %v2643_v9 = vadd.f32 %v7825_v59, %v2605_v39  ;;  %v2606_v38 = vmul.f32 %v7814_v56, %v2530_v48  ;;  %v2522_v8 = vadd.f32 %v2521_v1, %v7759_v20 }
 0x17a   : > { %v5812_v41 = vpack.c.bf16 %v2670_v26, %v2669_v61  ;;  %v2042_v42 = vadd.f32 %v7832_v13, %v2003_v17  ;;  %v2641_v57 = vadd.f32 %v7825_v59, %v2603_v18  ;;  %v2004_v52 = vmul.f32 %v6246_v29, %v7820_v47 }
 0x17b   : > { %6101 = vst [vmem:[%s7854_s30 + $0x18] sm:$0xff] %v5717_v28   ;;  %v2644_v53 = vadd.f32 %v7825_v59, %v2606_v38  ;;  %v2604_v19 = vmul.f32 %v7814_v56, %v2522_v8  ;;  %v2675_v51 = vmax.f32 %v2643_v9, 0.0 }
 0x17c   : > { %6119 = vst [vmem:[%s7861_s12 + $0x30] sm:$0xff] %v5812_v41   ;;  %v2043_v32 = vadd.f32 %v7832_v13, %v2004_v52  ;;  %v6247_v60 = vpop.f32.mrb[36].mxu1  ;;  %v6495_v37 = vpop.f32.mrb[36].mxu0  ;;  %v2074_v30 = vmax.f32 %v2042_v42, 0.0  ;;  %v2673_v39 = vmax.f32 %v2641_v57, 0.0 }
 0x17d   : > { %v2676_v23 = vmax.f32 %v2644_v53, 0.0  ;;  %v2642_v61 = vadd.f32 %v7825_v59, %v2604_v19  ;;  %v2543_v14 = vadd.f32 %v6495_v37, %v7765_v45  ;;  %v6248_v62 = vpop.f32.mrb[37].mxu1  ;;  %v2534_v31 = vpop.f32.mrb[37].mxu0 }
 0x17e   : > { %v2075_v48 = vmax.f32 %v2043_v32, 0.0  ;;  %v6249_v27 = vadd.f32 %v6248_v62, %v6247_v60  ;;  %v2535_v1 = vadd.f32 %v2534_v31, %v7769_v54  ;;  %v6250_v26 = vpop.f32.mrb[38].mxu1  ;;  %v6496_v17 = vpop.f32.mrb[38].mxu0 }
 0x17f   : > { %v5827_v18 = vpack.c.bf16 %v2676_v23, %v2675_v51  ;;  %v2674_v29 = vmax.f32 %v2642_v61, 0.0  ;;  %v2609_v28 = vmul.f32 %v7814_v56, %v2543_v14  ;;  %v2546_v9 = vadd.f32 %v6496_v17, %v7773_v6  ;;  %v6251_v38 = vpop.f32.mrb[39].mxu1  ;;  %v2537_v8 = vpop.f32.mrb[39].mxu0 }
 0x180   : > { %v5722_v41 = vpack.c.bf16 %v2075_v48, %v2074_v30  ;;  %v2005_v42 = vmul.f32 %v6249_v27, %v7820_v47  ;;  %v2607_v57 = vmul.f32 %v7814_v56, %v2535_v1  ;;  %v6252_v52 = vadd.f32 %v6251_v38, %v6250_v26 }
 0x181   : > { %6122 = vst [vmem:[%s7861_s12 + $0x48] sm:$0xff] %v5827_v18   ;;  %v5822_v53 = vpack.c.bf16 %v2674_v29, %v2673_v39  ;;  %v2647_v19 = vadd.f32 %v7825_v59, %v2609_v28  ;;  %v2610_v51 = vmul.f32 %v7814_v56, %v2546_v9  ;;  %v2538_v32 = vadd.f32 %v2537_v8, %v7777_v50 }
 0x182   : > { %6102 = vst [vmem:[%s7854_s30 + $0x20] sm:$0xff] %v5722_v41   ;;  %v2044_v60 = vadd.f32 %v7832_v13, %v2005_v42  ;;  %v2645_v37 = vadd.f32 %v7825_v59, %v2607_v57  ;;  %v2006_v30 = vmul.f32 %v6252_v52, %v7820_v47 }
 0x183   : > { %6121 = vst [vmem:[%s7861_s12 + $0x40] sm:$0xff] %v5822_v53   ;;  %v2648_v23 = vadd.f32 %v7825_v59, %v2610_v51  ;;  %v2608_v61 = vmul.f32 %v7814_v56, %v2538_v32  ;;  %v2679_v14 = vmax.f32 %v2647_v19, 0.0 }
 0x184   : > { %v2045_v62 = vadd.f32 %v7832_v13, %v2006_v30  ;;  %v6253_v31 = vpop.f32.mrb[40].mxu1  ;;  %v6499_v39 = vpop.f32.mrb[40].mxu0  ;;  %v2076_v48 = vmax.f32 %v2044_v60, 0.0  ;;  %v2677_v29 = vmax.f32 %v2645_v37, 0.0 }
 0x185   : > { %v2680_v27 = vmax.f32 %v2648_v23, 0.0  ;;  %v2646_v1 = vadd.f32 %v7825_v59, %v2608_v61  ;;  %v2559_v26 = vadd.f32 %v6499_v39, %v7781_v44  ;;  %v6254_v17 = vpop.f32.mrb[41].mxu1  ;;  %v2550_v18 = vpop.f32.mrb[41].mxu0 }
 0x186   : > { %v2077_v28 = vmax.f32 %v2045_v62, 0.0  ;;  %v6255_v9 = vadd.f32 %v6254_v17, %v6253_v31  ;;  %v2551_v38 = vadd.f32 %v2550_v18, %v7785_v33  ;;  %v6256_v8 = vpop.f32.mrb[42].mxu1  ;;  %v6500_v41 = vpop.f32.mrb[42].mxu0 }
 0x187   : > { %v5837_v42 = vpack.c.bf16 %v2680_v27, %v2679_v14  ;;  %v2678_v57 = vmax.f32 %v2646_v1, 0.0  ;;  %v2613_v52 = vmul.f32 %v7814_v56, %v2559_v26  ;;  %v2562_v53 = vadd.f32 %v6500_v41, %v7789_v4  ;;  %v6257_v19 = vpop.f32.mrb[43].mxu1  ;;  %v2553_v51 = vpop.f32.mrb[43].mxu0 }
 0x188   : > { %v5727_v32 = vpack.c.bf16 %v2077_v28, %v2076_v48  ;;  %v2007_v60 = vmul.f32 %v6255_v9, %v7820_v47  ;;  %v2611_v37 = vmul.f32 %v7814_v56, %v2551_v38  ;;  %v6258_v30 = vadd.f32 %v6257_v19, %v6256_v8 }
 0x189   : > { %6124 = vst [vmem:[%s7861_s12 + $0x58] sm:$0xff] %v5837_v42   ;;  %v5832_v23 = vpack.c.bf16 %v2678_v57, %v2677_v29  ;;  %v2651_v61 = vadd.f32 %v7825_v59, %v2613_v52  ;;  %v2614_v14 = vmul.f32 %v7814_v56, %v2562_v53  ;;  %v2554_v62 = vadd.f32 %v2553_v51, %v7793_v43 }
 0x18a   : > { %6103 = vst [vmem:[%s7854_s30 + $0x28] sm:$0xff] %v5727_v32   ;;  %v2046_v31 = vadd.f32 %v7832_v13, %v2007_v60  ;;  %v2649_v39 = vadd.f32 %v7825_v59, %v2611_v37  ;;  %v2008_v48 = vmul.f32 %v6258_v30, %v7820_v47 }
 0x18b   : > { %6123 = vst [vmem:[%s7861_s12 + $0x50] sm:$0xff] %v5832_v23   ;;  %v2652_v27 = vadd.f32 %v7825_v59, %v2614_v14  ;;  %v2612_v1 = vmul.f32 %v7814_v56, %v2554_v62  ;;  %v2683_v26 = vmax.f32 %v2651_v61, 0.0 }
 0x18c   : > { %v2047_v17 = vadd.f32 %v7832_v13, %v2008_v48  ;;  %v6259_v18 = vpop.f32.mrb[44].mxu1  ;;  %v6503_v29 = vpop.f32.mrb[44].mxu0  ;;  %v2078_v28 = vmax.f32 %v2046_v31, 0.0  ;;  %v2681_v57 = vmax.f32 %v2649_v39, 0.0 }
 0x18d   : > { %v2684_v9 = vmax.f32 %v2652_v27, 0.0  ;;  %v2650_v38 = vadd.f32 %v7825_v59, %v2612_v1  ;;  %v2575_v8 = vadd.f32 %v6503_v29, %v7797_v36  ;;  %v6260_v41 = vpop.f32.mrb[45].mxu1  ;;  %v2566_v42 = vpop.f32.mrb[45].mxu0 }
 0x18e   : > { %v2079_v52 = vmax.f32 %v2047_v17, 0.0  ;;  %v6261_v53 = vadd.f32 %v6260_v41, %v6259_v18  ;;  %v2567_v19 = vadd.f32 %v2566_v42, %v7801_v12  ;;  %v6262_v51 = vpop.f32.mrb[46].mxu1  ;;  %v6504_v32 = vpop.f32.mrb[46].mxu0 }
 0x18f   : > { %v5847_v60 = vpack.c.bf16 %v2684_v9, %v2683_v26  ;;  %v2682_v37 = vmax.f32 %v2650_v38, 0.0  ;;  %v2617_v30 = vmul.f32 %v7814_v56, %v2575_v8  ;;  %v2578_v23 = vadd.f32 %v6504_v32, %v7805_v11  ;;  %v6263_v61 = vpop.f32.mrb[47].mxu1  ;;  %v2569_v14 = vpop.f32.mrb[47].mxu0 }
 0x190   : > { %v5732_v62 = vpack.c.bf16 %v2079_v52, %v2078_v28  ;;  %v2009_v31 = vmul.f32 %v6261_v53, %v7820_v47  ;;  %v2615_v39 = vmul.f32 %v7814_v56, %v2567_v19  ;;  %v6264_v48 = vadd.f32 %v6263_v61, %v6262_v51 }
 0x191   : > { %6126 = vst [vmem:[%s7861_s12 + $0x68] sm:$0xff] %v5847_v60   ;;  %v5842_v27 = vpack.c.bf16 %v2682_v37, %v2681_v57  ;;  %v2655_v1 = vadd.f32 %v7825_v59, %v2617_v30  ;;  %v2618_v26 = vmul.f32 %v7814_v56, %v2578_v23  ;;  %v2570_v17 = vadd.f32 %v2569_v14, %v7809_v25 }
 0x192   : > { %6104 = vst [vmem:[%s7854_s30 + $0x30] sm:$0xff] %v5732_v62   ;;  %v2048_v18 = vadd.f32 %v7832_v13, %v2009_v31  ;;  %v2653_v29 = vadd.f32 %v7825_v59, %v2615_v39  ;;  %v2010_v28 = vmul.f32 %v6264_v48, %v7820_v47 }
 0x193   : > { %6125 = vst [vmem:[%s7861_s12 + $0x60] sm:$0xff] %v5842_v27   ;;  %v2656_v9 = vadd.f32 %v7825_v59, %v2618_v26  ;;  %v2616_v38 = vmul.f32 %v7814_v56, %v2570_v17  ;;  %v2687_v8 = vmax.f32 %v2655_v1, 0.0 }
 0x194   : > { %v2049_v41 = vadd.f32 %v7832_v13, %v2010_v28  ;;  %v6265_v42 = vpop.f32.mrb[48].mxu1  ;;  %v6523_v57 = vpop.f32.mrb[48].mxu0  ;;  %v2080_v52 = vmax.f32 %v2048_v18, 0.0  ;;  %v2685_v37 = vmax.f32 %v2653_v29, 0.0 }
 0x195   : > { %v2688_v53 = vmax.f32 %v2656_v9, 0.0  ;;  %v2654_v19 = vadd.f32 %v7825_v59, %v2616_v38  ;;  %v2988_v51 = vadd.f32 %v6523_v57, %v7745_v10  ;;  %v6266_v32 = vpop.f32.mrb[49].mxu1  ;;  %v2979_v60 = vpop.f32.mrb[49].mxu0 }
 0x196   : > { %v2081_v30 = vmax.f32 %v2049_v41, 0.0  ;;  %v6267_v23 = vadd.f32 %v6266_v32, %v6265_v42  ;;  %v2980_v61 = vadd.f32 %v2979_v60, %v7749_v7  ;;  %v6268_v14 = vpop.f32.mrb[50].mxu1  ;;  %v6524_v62 = vpop.f32.mrb[50].mxu0 }
 0x197   : > { %v5857_v31 = vpack.c.bf16 %v2688_v53, %v2687_v8  ;;  %v2686_v39 = vmax.f32 %v2654_v19, 0.0  ;;  %v3108_v48 = vmul.f32 %v7814_v56, %v2988_v51  ;;  %v2991_v27 = vadd.f32 %v6524_v62, %v7753_v15  ;;  %v6269_v1 = vpop.f32.mrb[51].mxu1  ;;  %v2982_v26 = vpop.f32.mrb[51].mxu0 }
 0x198   : > { %v5737_v17 = vpack.c.bf16 %v2081_v30, %v2080_v52  ;;  %v2011_v18 = vmul.f32 %v6267_v23, %v7820_v47  ;;  %v3106_v29 = vmul.f32 %v7814_v56, %v2980_v61  ;;  %v6270_v28 = vadd.f32 %v6269_v1, %v6268_v14 }
 0x199   : > { %6128 = vst [vmem:[%s7861_s12 + $0x78] sm:$0xff] %v5857_v31   ;;  %v5852_v9 = vpack.c.bf16 %v2686_v39, %v2685_v37  ;;  %v3140_v38 = vadd.f32 %v7825_v59, %v3108_v48  ;;  %v3109_v8 = vmul.f32 %v7814_v56, %v2991_v27  ;;  %v2983_v41 = vadd.f32 %v2982_v26, %v7757_v34 }
 0x19a   : > { %6105 = vst [vmem:[%s7854_s30 + $0x38] sm:$0xff] %v5737_v17   ;;  %v2050_v42 = vadd.f32 %v7832_v13, %v2011_v18  ;;  %v3138_v57 = vadd.f32 %v7825_v59, %v3106_v29  ;;  %v2012_v52 = vmul.f32 %v6270_v28, %v7820_v47 }
 0x19b   : > { %6127 = vst [vmem:[%s7861_s12 + $0x70] sm:$0xff] %v5852_v9   ;;  %v3141_v53 = vadd.f32 %v7825_v59, %v3109_v8  ;;  %v3107_v19 = vmul.f32 %v7814_v56, %v2983_v41  ;;  %v3172_v51 = vmax.f32 %v3140_v38, 0.0 }
 0x19c   : > { %v2051_v32 = vadd.f32 %v7832_v13, %v2012_v52  ;;  %v6271_v60 = vpop.f32.mrb[52].mxu1  ;;  %v6527_v37 = vpop.f32.mrb[52].mxu0  ;;  %v2082_v30 = vmax.f32 %v2050_v42, 0.0  ;;  %v3170_v39 = vmax.f32 %v3138_v57, 0.0 }
 0x19d   : > { %v3173_v23 = vmax.f32 %v3141_v53, 0.0  ;;  %v3139_v61 = vadd.f32 %v7825_v59, %v3107_v19  ;;  %v3004_v14 = vadd.f32 %v6527_v37, %v7763_v49  ;;  %v6272_v62 = vpop.f32.mrb[53].mxu1  ;;  %v2995_v31 = vpop.f32.mrb[53].mxu0 }
 0x19e   : > { %v2083_v48 = vmax.f32 %v2051_v32, 0.0  ;;  %v6273_v27 = vadd.f32 %v6272_v62, %v6271_v60  ;;  %v2996_v1 = vadd.f32 %v2995_v31, %v7767_v22  ;;  %v6274_v26 = vpop.f32.mrb[54].mxu1  ;;  %v6528_v17 = vpop.f32.mrb[54].mxu0 }
 0x19f   : > { %v5867_v18 = vpack.c.bf16 %v3173_v23, %v3172_v51  ;;  %v3171_v29 = vmax.f32 %v3139_v61, 0.0  ;;  %v3112_v28 = vmul.f32 %v7814_v56, %v3004_v14  ;;  %v3007_v9 = vadd.f32 %v6528_v17, %v7771_v63  ;;  %v6275_v38 = vpop.f32.mrb[55].mxu1  ;;  %v2998_v8 = vpop.f32.mrb[55].mxu0 }
 0x1a0   : > { %v5742_v41 = vpack.c.bf16 %v2083_v48, %v2082_v30  ;;  %v2013_v42 = vmul.f32 %v6273_v27, %v7820_v47  ;;  %v3110_v57 = vmul.f32 %v7814_v56, %v2996_v1  ;;  %v6276_v52 = vadd.f32 %v6275_v38, %v6274_v26 }
 0x1a1   : > { %6130 = vst [vmem:[%s7861_s12 + $0x88] sm:$0xff] %v5867_v18   ;;  %v5862_v53 = vpack.c.bf16 %v3171_v29, %v3170_v39  ;;  %v3144_v19 = vadd.f32 %v7825_v59, %v3112_v28  ;;  %v3113_v51 = vmul.f32 %v7814_v56, %v3007_v9  ;;  %v2999_v32 = vadd.f32 %v2998_v8, %v7775_v35 }
 0x1a2   : > { %6106 = vst [vmem:[%s7854_s30 + $0x40] sm:$0xff] %v5742_v41   ;;  %v2052_v60 = vadd.f32 %v7832_v13, %v2013_v42  ;;  %v3142_v37 = vadd.f32 %v7825_v59, %v3110_v57  ;;  %v2014_v30 = vmul.f32 %v6276_v52, %v7820_v47 }
 0x1a3   : > { %6129 = vst [vmem:[%s7861_s12 + $0x80] sm:$0xff] %v5862_v53   ;;  %v3145_v23 = vadd.f32 %v7825_v59, %v3113_v51  ;;  %v3111_v61 = vmul.f32 %v7814_v56, %v2999_v32  ;;  %v3176_v14 = vmax.f32 %v3144_v19, 0.0 }
 0x1a4   : > { %v2053_v62 = vadd.f32 %v7832_v13, %v2014_v30  ;;  %v6277_v31 = vpop.f32.mrb[56].mxu1  ;;  %v6531_v39 = vpop.f32.mrb[56].mxu0  ;;  %v2084_v48 = vmax.f32 %v2052_v60, 0.0  ;;  %v3174_v29 = vmax.f32 %v3142_v37, 0.0 }
 0x1a5   : > { %v3177_v27 = vmax.f32 %v3145_v23, 0.0  ;;  %v3143_v1 = vadd.f32 %v7825_v59, %v3111_v61  ;;  %v3020_v26 = vadd.f32 %v6531_v39, %v7779_v46  ;;  %v6278_v17 = vpop.f32.mrb[57].mxu1  ;;  %v3011_v18 = vpop.f32.mrb[57].mxu0 }
 0x1a6   : > { %v2085_v28 = vmax.f32 %v2053_v62, 0.0  ;;  %v6279_v9 = vadd.f32 %v6278_v17, %v6277_v31  ;;  %v3012_v38 = vadd.f32 %v3011_v18, %v7783_v16  ;;  %v6280_v8 = vpop.f32.mrb[58].mxu1  ;;  %v6532_v41 = vpop.f32.mrb[58].mxu0 }
 0x1a7   : > { %v5877_v42 = vpack.c.bf16 %v3177_v27, %v3176_v14  ;;  %v3175_v57 = vmax.f32 %v3143_v1, 0.0  ;;  %v3116_v52 = vmul.f32 %v7814_v56, %v3020_v26  ;;  %v3023_v53 = vadd.f32 %v6532_v41, %v7787_v2  ;;  %v6281_v19 = vpop.f32.mrb[59].mxu1  ;;  %v3014_v51 = vpop.f32.mrb[59].mxu0 }
 0x1a8   : > { %v5747_v32 = vpack.c.bf16 %v2085_v28, %v2084_v48  ;;  %v2015_v60 = vmul.f32 %v6279_v9, %v7820_v47  ;;  %v3114_v37 = vmul.f32 %v7814_v56, %v3012_v38  ;;  %v6282_v30 = vadd.f32 %v6281_v19, %v6280_v8 }
 0x1a9   : > { %6132 = vst [vmem:[%s7861_s12 + $0x98] sm:$0xff] %v5877_v42   ;;  %v5872_v23 = vpack.c.bf16 %v3175_v57, %v3174_v29  ;;  %v3148_v61 = vadd.f32 %v7825_v59, %v3116_v52  ;;  %v3117_v14 = vmul.f32 %v7814_v56, %v3023_v53  ;;  %v3015_v62 = vadd.f32 %v3014_v51, %v7791_v40 }
 0x1aa   : > { %6107 = vst [vmem:[%s7854_s30 + $0x48] sm:$0xff] %v5747_v32   ;;  %v2054_v31 = vadd.f32 %v7832_v13, %v2015_v60  ;;  %v3146_v39 = vadd.f32 %v7825_v59, %v3114_v37  ;;  %v2016_v48 = vmul.f32 %v6282_v30, %v7820_v47 }
 0x1ab   : > { %6131 = vst [vmem:[%s7861_s12 + $0x90] sm:$0xff] %v5872_v23   ;;  %v3149_v27 = vadd.f32 %v7825_v59, %v3117_v14  ;;  %v3115_v1 = vmul.f32 %v7814_v56, %v3015_v62  ;;  %v3180_v26 = vmax.f32 %v3148_v61, 0.0 }
 0x1ac   : > { %v2055_v17 = vadd.f32 %v7832_v13, %v2016_v48  ;;  %v6283_v18 = vpop.f32.mrb[60].mxu1  ;;  %v6535_v29 = vpop.f32.mrb[60].mxu0  ;;  %v2086_v28 = vmax.f32 %v2054_v31, 0.0  ;;  %v3178_v57 = vmax.f32 %v3146_v39, 0.0 }
 0x1ad   : > { %v3181_v9 = vmax.f32 %v3149_v27, 0.0  ;;  %v3147_v38 = vadd.f32 %v7825_v59, %v3115_v1  ;;  %v3036_v8 = vadd.f32 %v6535_v29, %v7795_v24  ;;  %v6284_v41 = vpop.f32.mrb[61].mxu1  ;;  %v3027_v42 = vpop.f32.mrb[61].mxu0 }
 0x1ae   : > { %v2087_v52 = vmax.f32 %v2055_v17, 0.0  ;;  %v6285_v53 = vadd.f32 %v6284_v41, %v6283_v18  ;;  %v3028_v19 = vadd.f32 %v3027_v42, %v7799_v5  ;;  %v6286_v51 = vpop.f32.mrb[62].mxu1  ;;  %v6536_v32 = vpop.f32.mrb[62].mxu0 }
 0x1af   : > { %v5887_v60 = vpack.c.bf16 %v3181_v9, %v3180_v26  ;;  %v3179_v37 = vmax.f32 %v3147_v38, 0.0  ;;  %v3120_v30 = vmul.f32 %v7814_v56, %v3036_v8  ;;  %v3039_v23 = vadd.f32 %v6536_v32, %v7803_v21  ;;  %v6287_v61 = vpop.f32.mrb[63].mxu1  ;;  %v3030_v14 = vpop.f32.mrb[63].mxu0 }
 0x1b0   : > { %v5752_v62 = vpack.c.bf16 %v2087_v52, %v2086_v28  ;;  %v2017_v31 = vmul.f32 %v6285_v53, %v7820_v47  ;;  %v3118_v39 = vmul.f32 %v7814_v56, %v3028_v19  ;;  %v6288_v48 = vadd.f32 %v6287_v61, %v6286_v51 }
 0x1b1   : > { %6134 = vst [vmem:[%s7861_s12 + $0xa8] sm:$0xff] %v5887_v60   ;;  %v5882_v27 = vpack.c.bf16 %v3179_v37, %v3178_v57  ;;  %v3152_v1 = vadd.f32 %v7825_v59, %v3120_v30  ;;  %v3121_v26 = vmul.f32 %v7814_v56, %v3039_v23  ;;  %v3031_v17 = vadd.f32 %v3030_v14, %v7807_v58 }
 0x1b2   : > { %6108 = vst [vmem:[%s7854_s30 + $0x50] sm:$0xff] %v5752_v62   ;;  %v2056_v18 = vadd.f32 %v7832_v13, %v2017_v31  ;;  %v3150_v29 = vadd.f32 %v7825_v59, %v3118_v39  ;;  %v2018_v28 = vmul.f32 %v6288_v48, %v7820_v47 }
 0x1b3   : > { %6133 = vst [vmem:[%s7861_s12 + $0xa0] sm:$0xff] %v5882_v27   ;;  %v3153_v9 = vadd.f32 %v7825_v59, %v3121_v26  ;;  %v3119_v38 = vmul.f32 %v7814_v56, %v3031_v17  ;;  %v3184_v8 = vmax.f32 %v3152_v1, 0.0 }
 0x1b4   : > { %v2057_v41 = vadd.f32 %v7832_v13, %v2018_v28  ;;  %v6289_v42 = vpop.f32.mrb[64].mxu1  ;;  %v6539_v57 = vpop.f32.mrb[64].mxu0  ;;  %v2088_v52 = vmax.f32 %v2056_v18, 0.0  ;;  %v3182_v37 = vmax.f32 %v3150_v29, 0.0 }
 0x1b5   : > { %v3185_v53 = vmax.f32 %v3153_v9, 0.0  ;;  %v3151_v19 = vadd.f32 %v7825_v59, %v3119_v38  ;;  %v3052_v51 = vadd.f32 %v6539_v57, %v7747_v55  ;;  %v6290_v32 = vpop.f32.mrb[65].mxu1  ;;  %v3043_v60 = vpop.f32.mrb[65].mxu0 }
 0x1b6   : > { %v2089_v30 = vmax.f32 %v2057_v41, 0.0  ;;  %v6291_v23 = vadd.f32 %v6290_v32, %v6289_v42  ;;  %v3044_v61 = vadd.f32 %v3043_v60, %v7751_v3  ;;  %v6292_v14 = vpop.f32.mrb[66].mxu1  ;;  %v6540_v62 = vpop.f32.mrb[66].mxu0 }
 0x1b7   : > { %v5897_v31 = vpack.c.bf16 %v3185_v53, %v3184_v8  ;;  %v3183_v39 = vmax.f32 %v3151_v19, 0.0  ;;  %v3124_v48 = vmul.f32 %v7814_v56, %v3052_v51  ;;  %v3055_v27 = vadd.f32 %v6540_v62, %v7755_v0  ;;  %v6293_v1 = vpop.f32.mrb[67].mxu1  ;;  %v3046_v26 = vpop.f32.mrb[67].mxu0 }
 0x1b8   : > { %v5757_v17 = vpack.c.bf16 %v2089_v30, %v2088_v52  ;;  %v2019_v18 = vmul.f32 %v6291_v23, %v7820_v47  ;;  %v3122_v29 = vmul.f32 %v7814_v56, %v3044_v61  ;;  %v6294_v28 = vadd.f32 %v6293_v1, %v6292_v14 }
 0x1b9   : > { %6136 = vst [vmem:[%s7861_s12 + $0xb8] sm:$0xff] %v5897_v31   ;;  %v5892_v9 = vpack.c.bf16 %v3183_v39, %v3182_v37  ;;  %v3156_v38 = vadd.f32 %v7825_v59, %v3124_v48  ;;  %v3125_v8 = vmul.f32 %v7814_v56, %v3055_v27  ;;  %v3047_v41 = vadd.f32 %v3046_v26, %v7759_v20 }
 0x1ba   : > { %6109 = vst [vmem:[%s7854_s30 + $0x58] sm:$0xff] %v5757_v17   ;;  %v2058_v42 = vadd.f32 %v7832_v13, %v2019_v18  ;;  %v3154_v57 = vadd.f32 %v7825_v59, %v3122_v29  ;;  %v2020_v52 = vmul.f32 %v6294_v28, %v7820_v47 }
 0x1bb   : > { %6135 = vst [vmem:[%s7861_s12 + $0xb0] sm:$0xff] %v5892_v9   ;;  %v3157_v53 = vadd.f32 %v7825_v59, %v3125_v8  ;;  %v3123_v19 = vmul.f32 %v7814_v56, %v3047_v41  ;;  %v3188_v51 = vmax.f32 %v3156_v38, 0.0 }
 0x1bc   : > { %v2059_v32 = vadd.f32 %v7832_v13, %v2020_v52  ;;  %v6295_v60 = vpop.f32.mrb[68].mxu1  ;;  %v6543_v37 = vpop.f32.mrb[68].mxu0  ;;  %v2090_v30 = vmax.f32 %v2058_v42, 0.0  ;;  %v3186_v39 = vmax.f32 %v3154_v57, 0.0 }
 0x1bd   : > { %v3189_v23 = vmax.f32 %v3157_v53, 0.0  ;;  %v3155_v61 = vadd.f32 %v7825_v59, %v3123_v19  ;;  %v3068_v14 = vadd.f32 %v6543_v37, %v7765_v45  ;;  %v6296_v62 = vpop.f32.mrb[69].mxu1  ;;  %v3059_v31 = vpop.f32.mrb[69].mxu0 }
 0x1be   : > { %v2091_v48 = vmax.f32 %v2059_v32, 0.0  ;;  %v6297_v27 = vadd.f32 %v6296_v62, %v6295_v60  ;;  %v3060_v1 = vadd.f32 %v3059_v31, %v7769_v54  ;;  %v6298_v26 = vpop.f32.mrb[70].mxu1  ;;  %v6544_v17 = vpop.f32.mrb[70].mxu0 }
 0x1bf   : > { %v5907_v18 = vpack.c.bf16 %v3189_v23, %v3188_v51  ;;  %v3187_v29 = vmax.f32 %v3155_v61, 0.0  ;;  %v3128_v28 = vmul.f32 %v7814_v56, %v3068_v14  ;;  %v3071_v9 = vadd.f32 %v6544_v17, %v7773_v6  ;;  %v6299_v38 = vpop.f32.mrb[71].mxu1  ;;  %v3062_v8 = vpop.f32.mrb[71].mxu0  ;;  %v8096_v51 = vld [vmem:[%s8540_s5] ss:$0 sm:$0xff] }
 0x1c0   : > { %v5762_v41 = vpack.c.bf16 %v2091_v48, %v2090_v30  ;;  %v2021_v42 = vmul.f32 %v6297_v27, %v7820_v47  ;;  %v3126_v57 = vmul.f32 %v7814_v56, %v3060_v1  ;;  %v6300_v52 = vadd.f32 %v6299_v38, %v6298_v26  ;;  %v8105_v56 = vld [vmem:[%s8541_s6] ss:$0 sm:$0xff] }
 0x1c1   : > { %6138 = vst [vmem:[%s7861_s12 + $0xc8] sm:$0xff] %v5907_v18   ;;  %v5902_v53 = vpack.c.bf16 %v3187_v29, %v3186_v39  ;;  %v3160_v19 = vadd.f32 %v7825_v59, %v3128_v28  ;;  %v3129_v32 = vmul.f32 %v8096_v51, %v3071_v9  ;;  %v3063_v60 = vadd.f32 %v3062_v8, %v7777_v50  ;;  %v8111_v59 = vld [vmem:[%s8542_s7] ss:$0 sm:$0xff] }
 0x1c2   : > { %6110 = vst [vmem:[%s7854_s30 + $0x60] sm:$0xff] %v5762_v41   ;;  %v2060_v37 = vadd.f32 %v7832_v13, %v2021_v42  ;;  %v3158_v47 = vadd.f32 %v8105_v56, %v3126_v57  ;;  %v2022_v30 = vmul.f32 %v8111_v59, %v6300_v52  ;;  %v8120_v14 = vld [vmem:[%s8543_s8] ss:$0 sm:$0xff] }
 0x1c3   : > { %6137 = vst [vmem:[%s7861_s12 + $0xc0] sm:$0xff] %v5902_v53   ;;  %v3161_v23 = vadd.f32 %v8105_v56, %v3129_v32  ;;  %v3127_v61 = vmul.f32 %v8096_v51, %v3063_v60  ;;  %v3192_v13 = vmax.f32 %v3160_v19, 0.0 }
 0x1c4   : > { %v2061_v62 = vadd.f32 %v8120_v14, %v2022_v30  ;;  %v6301_v31 = vpop.f32.mrb[72].mxu1  ;;  %v6547_v39 = vpop.f32.mrb[72].mxu0  ;;  %v2092_v48 = vmax.f32 %v2060_v37, 0.0  ;;  %v3190_v29 = vmax.f32 %v3158_v47, 0.0 }
 0x1c5   : > { %v3193_v27 = vmax.f32 %v3161_v23, 0.0  ;;  %v3159_v1 = vadd.f32 %v8105_v56, %v3127_v61  ;;  %v3084_v26 = vadd.f32 %v6547_v39, %v7781_v44  ;;  %v6302_v17 = vpop.f32.mrb[73].mxu1  ;;  %v3075_v18 = vpop.f32.mrb[73].mxu0 }
 0x1c6   : > { %v2093_v28 = vmax.f32 %v2061_v62, 0.0  ;;  %v6303_v9 = vadd.f32 %v6302_v17, %v6301_v31  ;;  %v3076_v38 = vadd.f32 %v3075_v18, %v7785_v33  ;;  %v6304_v8 = vpop.f32.mrb[74].mxu1  ;;  %v6548_v41 = vpop.f32.mrb[74].mxu0 }
 0x1c7   : > { %v5917_v42 = vpack.c.bf16 %v3193_v27, %v3192_v13  ;;  %v3191_v57 = vmax.f32 %v3159_v1, 0.0  ;;  %v3132_v52 = vmul.f32 %v8096_v51, %v3084_v26  ;;  %v3087_v53 = vadd.f32 %v6548_v41, %v7789_v4  ;;  %v6305_v19 = vpop.f32.mrb[75].mxu1  ;;  %v3078_v32 = vpop.f32.mrb[75].mxu0 }
 0x1c8   : > { %v5767_v60 = vpack.c.bf16 %v2093_v28, %v2092_v48  ;;  %v2023_v37 = vmul.f32 %v8111_v59, %v6303_v9  ;;  %v3130_v47 = vmul.f32 %v8096_v51, %v3076_v38  ;;  %v6306_v30 = vadd.f32 %v6305_v19, %v6304_v8 }
 0x1c9   : > { %6140 = vst [vmem:[%s7861_s12 + $0xd8] sm:$0xff] %v5917_v42   ;;  %v5912_v23 = vpack.c.bf16 %v3191_v57, %v3190_v29  ;;  %v3164_v61 = vadd.f32 %v8105_v56, %v3132_v52  ;;  %v3133_v13 = vmul.f32 %v8096_v51, %v3087_v53  ;;  %v3079_v62 = vadd.f32 %v3078_v32, %v7793_v43 }
 0x1ca   : > { %6111 = vst [vmem:[%s7854_s30 + $0x68] sm:$0xff] %v5767_v60   ;;  %v2062_v31 = vadd.f32 %v8120_v14, %v2023_v37  ;;  %v3162_v39 = vadd.f32 %v8105_v56, %v3130_v47  ;;  %v2024_v48 = vmul.f32 %v8111_v59, %v6306_v30 }
 0x1cb   : > { %6139 = vst [vmem:[%s7861_s12 + $0xd0] sm:$0xff] %v5912_v23   ;;  %v3165_v27 = vadd.f32 %v8105_v56, %v3133_v13  ;;  %v3131_v1 = vmul.f32 %v8096_v51, %v3079_v62  ;;  %v3196_v26 = vmax.f32 %v3164_v61, 0.0 }
 0x1cc   : > { %v2063_v17 = vadd.f32 %v8120_v14, %v2024_v48  ;;  %v6307_v18 = vpop.f32.mrb[76].mxu1  ;;  %v6551_v29 = vpop.f32.mrb[76].mxu0  ;;  %v2094_v28 = vmax.f32 %v2062_v31, 0.0  ;;  %v3194_v57 = vmax.f32 %v3162_v39, 0.0 }
 0x1cd   : > { %v3197_v9 = vmax.f32 %v3165_v27, 0.0  ;;  %v3163_v38 = vadd.f32 %v8105_v56, %v3131_v1  ;;  %v3100_v8 = vadd.f32 %v6551_v29, %v7797_v36  ;;  %v6308_v41 = vpop.f32.mrb[77].mxu1  ;;  %v3091_v42 = vpop.f32.mrb[77].mxu0 }
 0x1ce   : > { %v2095_v52 = vmax.f32 %v2063_v17, 0.0  ;;  %v6309_v53 = vadd.f32 %v6308_v41, %v6307_v18  ;;  %v3092_v19 = vadd.f32 %v3091_v42, %v7801_v12  ;;  %v6310_v32 = vpop.f32.mrb[78].mxu1  ;;  %v6552_v60 = vpop.f32.mrb[78].mxu0 }
 0x1cf   : > { %v5927_v37 = vpack.c.bf16 %v3197_v9, %v3196_v26  ;;  %v3195_v47 = vmax.f32 %v3163_v38, 0.0  ;;  %v3136_v30 = vmul.f32 %v8096_v51, %v3100_v8  ;;  %v3103_v23 = vadd.f32 %v6552_v60, %v7805_v11  ;;  %v6311_v61 = vpop.f32.mrb[79].mxu1  ;;  %v3094_v13 = vpop.f32.mrb[79].mxu0 }
 0x1d0   : > { %v5772_v62 = vpack.c.bf16 %v2095_v52, %v2094_v28  ;;  %v2025_v31 = vmul.f32 %v8111_v59, %v6309_v53  ;;  %v3134_v39 = vmul.f32 %v8096_v51, %v3092_v19  ;;  %v6312_v48 = vadd.f32 %v6311_v61, %v6310_v32 }
 0x1d1   : > { %6142 = vst [vmem:[%s7861_s12 + $0xe8] sm:$0xff] %v5927_v37   ;;  %v5922_v27 = vpack.c.bf16 %v3195_v47, %v3194_v57  ;;  %v3168_v1 = vadd.f32 %v8105_v56, %v3136_v30  ;;  %v3137_v26 = vmul.f32 %v8096_v51, %v3103_v23  ;;  %v3095_v17 = vadd.f32 %v3094_v13, %v7809_v25 }
 0x1d2   : > { %6112 = vst [vmem:[%s7854_s30 + $0x70] sm:$0xff] %v5772_v62   ;;  %v2064_v18 = vadd.f32 %v8120_v14, %v2025_v31  ;;  %v3166_v29 = vadd.f32 %v8105_v56, %v3134_v39  ;;  %v2026_v28 = vmul.f32 %v8111_v59, %v6312_v48 }
 0x1d3   : > { %6141 = vst [vmem:[%s7861_s12 + $0xe0] sm:$0xff] %v5922_v27   ;;  %v3169_v9 = vadd.f32 %v8105_v56, %v3137_v26  ;;  %v3135_v38 = vmul.f32 %v8096_v51, %v3095_v17  ;;  %v3200_v8 = vmax.f32 %v3168_v1, 0.0 }
 0x1d4   : > { %v2096_v41 = vmax.f32 %v2064_v18, 0.0  ;;  %v2065_v42 = vadd.f32 %v8120_v14, %v2026_v28  ;;  %v6571_v57 = vpop.f32.mrb[80].mxu1  ;;  %v6619_v52 = vpop.f32.mrb[80].mxu0  ;;  %v3198_v47 = vmax.f32 %v3166_v29, 0.0 }
 0x1d5   : > { %v3201_v53 = vmax.f32 %v3169_v9, 0.0  ;;  %v3167_v19 = vadd.f32 %v8105_v56, %v3135_v38  ;;  %v3502_v32 = vadd.f32 %v6571_v57, %v7745_v10  ;;  %v4016_v60 = vadd.f32 %v6619_v52, %v7745_v10  ;;  %v3493_v37 = vpop.f32.mrb[81].mxu1  ;;  %v4007_v59 = vpop.f32.mrb[81].mxu0 }
 0x1d6   : > { %v2097_v30 = vmax.f32 %v2065_v42, 0.0  ;;  %v3494_v23 = vadd.f32 %v3493_v37, %v7749_v7  ;;  %v4008_v61 = vadd.f32 %v4007_v59, %v7749_v7  ;;  %v6572_v13 = vpop.f32.mrb[82].mxu1  ;;  %v6620_v14 = vpop.f32.mrb[82].mxu0 }
 0x1d7   : > { %v5937_v62 = vpack.c.bf16 %v3201_v53, %v3200_v8  ;;  %v3199_v31 = vmax.f32 %v3167_v19, 0.0  ;;  %v3622_v39 = vmul.f32 %v8096_v51, %v3502_v32  ;;  %v4136_v48 = vmul.f32 %v8096_v51, %v4016_v60  ;;  %v3496_v10 = vpop.f32.mrb[83].mxu1  ;;  %v4010_v27 = vpop.f32.mrb[83].mxu0 }
 0x1d8   : > { %v5777_v1 = vpack.c.bf16 %v2097_v30, %v2096_v41  ;;  %v3620_v26 = vmul.f32 %v8096_v51, %v3494_v23  ;;  %v4134_v17 = vmul.f32 %v8096_v51, %v4008_v61  ;;  %v3505_v18 = vadd.f32 %v6572_v13, %v7753_v15 }
 0x1d9   : > { %6144 = vst [vmem:[%s7861_s12 + $0xf8] sm:$0xff] %v5937_v62   ;;  %v5932_v7 = vpack.c.bf16 %v3199_v31, %v3198_v47  ;;  %v3654_v29 = vadd.f32 %v8105_v56, %v3622_v39  ;;  %v4168_v28 = vadd.f32 %v8105_v56, %v4136_v48  ;;  %v4019_v9 = vadd.f32 %v6620_v14, %v7753_v15 }
 0x1da   : > { %6113 = vst [vmem:[%s7854_s30 + $0x78] sm:$0xff] %v5777_v1   ;;  %v3652_v38 = vadd.f32 %v8105_v56, %v3620_v26  ;;  %v3623_v8 = vmul.f32 %v8096_v51, %v3505_v18  ;;  %v3497_v41 = vadd.f32 %v3496_v10, %v7757_v34  ;;  %v4166_v57 = vadd.f32 %v8105_v56, %v4134_v17 }
 0x1db   : > { %6143 = vst [vmem:[%s7861_s12 + $0xf0] sm:$0xff] %v5932_v7   ;;  %v3686_v42 = vmax.f32 %v3654_v29, 0.0  ;;  %v4137_v52 = vmul.f32 %v8096_v51, %v4019_v9  ;;  %v4011_v53 = vadd.f32 %v4010_v27, %v7757_v34  ;;  %v4200_v19 = vmax.f32 %v4168_v28, 0.0 }
 0x1dc   : > { %v3684_v32 = vmax.f32 %v3652_v38, 0.0  ;;  %v3655_v60 = vadd.f32 %v8105_v56, %v3623_v8  ;;  %v3621_v15 = vmul.f32 %v8096_v51, %v3497_v41  ;;  %v6575_v37 = vpop.f32.mrb[84].mxu1  ;;  %v6623_v59 = vpop.f32.mrb[84].mxu0  ;;  %v4198_v9 = vmax.f32 %v4166_v57, 0.0 }
 0x1dd   : > { %v4169_v47 = vadd.f32 %v8105_v56, %v4137_v52  ;;  %v4135_v30 = vmul.f32 %v8096_v51, %v4011_v53  ;;  %v3518_v23 = vadd.f32 %v6575_v37, %v7763_v49  ;;  %v4032_v61 = vadd.f32 %v6623_v59, %v7763_v49  ;;  %v3509_v13 = vpop.f32.mrb[85].mxu1  ;;  %v4023_v14 = vpop.f32.mrb[85].mxu0 }
 0x1de   : > { %v3687_v62 = vmax.f32 %v3655_v60, 0.0  ;;  %v3653_v34 = vadd.f32 %v8105_v56, %v3621_v15  ;;  %v3510_v31 = vadd.f32 %v3509_v13, %v7767_v22  ;;  %v4024_v39 = vadd.f32 %v4023_v14, %v7767_v22  ;;  %v6576_v48 = vpop.f32.mrb[86].mxu1  ;;  %v6624_v10 = vpop.f32.mrb[86].mxu0 }
 0x1df   : > { %v4201_v27 = vmax.f32 %v4169_v47, 0.0  ;;  %v4167_v1 = vadd.f32 %v8105_v56, %v4135_v30  ;;  %v3626_v26 = vmul.f32 %v8096_v51, %v3518_v23  ;;  %v4140_v49 = vmul.f32 %v8096_v51, %v4032_v61  ;;  %v3512_v17 = vpop.f32.mrb[87].mxu1  ;;  %v4026_v18 = vpop.f32.mrb[87].mxu0 }
 0x1e0   : > { %v5947_v7 = vpack.c.bf16 %v3687_v62, %v3686_v42  ;;  %v3685_v29 = vmax.f32 %v3653_v34, 0.0  ;;  %v3624_v28 = vmul.f32 %v8096_v51, %v3510_v31  ;;  %v4138_v22 = vmul.f32 %v8096_v51, %v4024_v39 }
 0x1e1   : > { %v6027_v38 = vpack.c.bf16 %v4201_v27, %v4200_v19  ;;  %v4199_v8 = vmax.f32 %v4167_v1, 0.0  ;;  %v3658_v41 = vadd.f32 %v8105_v56, %v3626_v26  ;;  %v3521_v53 = vadd.f32 %v6576_v48, %v7771_v63 }
 0x1e2   : > { %6146 = vst [vmem:[%s7861_s12 + $0x108] sm:$0xff] %v5947_v7   ;;  %v5942_v52 = vpack.c.bf16 %v3685_v29, %v3684_v32  ;;  %v4172_v42 = vadd.f32 %v8105_v56, %v4140_v49  ;;  %v3656_v15 = vadd.f32 %v8105_v56, %v3624_v28  ;;  %v4035_v37 = vadd.f32 %v6624_v10, %v7771_v63 }
 0x1e3   : > { %6162 = vst [vmem:[%s7861_s12 + $0x188] sm:$0xff] %v6027_v38   ;;  %v6022_v60 = vpack.c.bf16 %v4199_v8, %v4198_v9  ;;  %v3690_v59 = vmax.f32 %v3658_v41, 0.0  ;;  %v4170_v57 = vadd.f32 %v8105_v56, %v4138_v22  ;;  %v3627_v19 = vmul.f32 %v8096_v51, %v3521_v53 }
 0x1e4   : > { %6145 = vst [vmem:[%s7861_s12 + $0x100] sm:$0xff] %v5942_v52   ;;  %v3513_v47 = vadd.f32 %v3512_v17, %v7775_v35  ;;  %v6579_v30 = vpop.f32.mrb[88].mxu1  ;;  %v6627_v32 = vpop.f32.mrb[88].mxu0  ;;  %v4141_v23 = vmul.f32 %v8096_v51, %v4035_v37  ;;  %v4027_v61 = vadd.f32 %v4026_v18, %v7775_v35  ;;  %v4204_v28 = vmax.f32 %v4172_v42, 0.0 }
 0x1e5   : > { %6161 = vst [vmem:[%s7861_s12 + $0x180] sm:$0xff] %v6022_v60   ;;  %v3534_v13 = vadd.f32 %v6579_v30, %v7779_v46  ;;  %v4048_v14 = vadd.f32 %v6627_v32, %v7779_v46  ;;  %v3525_v63 = vpop.f32.mrb[89].mxu1  ;;  %v4039_v62 = vpop.f32.mrb[89].mxu0  ;;  %v3659_v34 = vadd.f32 %v8105_v56, %v3627_v19  ;;  %v3688_v38 = vmax.f32 %v3656_v15, 0.0 }
 0x1e6   : > { %v3625_v31 = vmul.f32 %v8096_v51, %v3513_v47  ;;  %v3526_v39 = vadd.f32 %v3525_v63, %v7783_v16  ;;  %v4040_v48 = vadd.f32 %v4039_v62, %v7783_v16  ;;  %v6580_v10 = vpop.f32.mrb[90].mxu1  ;;  %v6628_v27 = vpop.f32.mrb[90].mxu0  ;;  %v4173_v1 = vadd.f32 %v8105_v56, %v4141_v23 }
 0x1e7   : > { %v4139_v35 = vmul.f32 %v8096_v51, %v4027_v61  ;;  %v3630_v26 = vmul.f32 %v8096_v51, %v3534_v13  ;;  %v4144_v46 = vmul.f32 %v8096_v51, %v4048_v14  ;;  %v3528_v49 = vpop.f32.mrb[91].mxu1  ;;  %v4042_v17 = vpop.f32.mrb[91].mxu0  ;;  %v3691_v18 = vmax.f32 %v3659_v34, 0.0 }
 0x1e8   : > { %v3657_v7 = vadd.f32 %v8105_v56, %v3625_v31  ;;  %v3628_v29 = vmul.f32 %v8096_v51, %v3526_v39  ;;  %v4142_v16 = vmul.f32 %v8096_v51, %v4040_v48  ;;  %v4205_v22 = vmax.f32 %v4173_v1, 0.0 }
 0x1e9   : > { %v4171_v9 = vadd.f32 %v8105_v56, %v4139_v35  ;;  %v4202_v8 = vmax.f32 %v4170_v57, 0.0  ;;  %v5957_v41 = vpack.c.bf16 %v3691_v18, %v3690_v59  ;;  %v3662_v37 = vadd.f32 %v8105_v56, %v3630_v26 }
 0x1ea   : > { %v3689_v52 = vmax.f32 %v3657_v7, 0.0  ;;  %v6037_v53 = vpack.c.bf16 %v4205_v22, %v4204_v28  ;;  %v4176_v19 = vadd.f32 %v8105_v56, %v4144_v46  ;;  %v3660_v30 = vadd.f32 %v8105_v56, %v3628_v29 }
 0x1eb   : > { %v4203_v60 = vmax.f32 %v4171_v9, 0.0  ;;  %6148 = vst [vmem:[%s7861_s12 + $0x118] sm:$0xff] %v5957_v41   ;;  %v4174_v42 = vadd.f32 %v8105_v56, %v4142_v16  ;;  %v3537_v32 = vadd.f32 %v6580_v10, %v7787_v2  ;;  %v4051_v57 = vadd.f32 %v6628_v27, %v7787_v2 }
 0x1ec   : > { %v5952_v47 = vpack.c.bf16 %v3689_v52, %v3688_v38  ;;  %v6583_v23 = vpop.f32.mrb[92].mxu1  ;;  %v6631_v15 = vpop.f32.mrb[92].mxu0  ;;  %6164 = vst [vmem:[%s7861_s12 + $0x198] sm:$0xff] %v6037_v53   ;;  %v3529_v61 = vadd.f32 %v3528_v49, %v7791_v40  ;;  %v4043_v13 = vadd.f32 %v4042_v17, %v7791_v40  ;;  %v3694_v28 = vmax.f32 %v3662_v37, 0.0 }
 0x1ed   : > { %v6032_v59 = vpack.c.bf16 %v4203_v60, %v4202_v8  ;;  %v3541_v14 = vpop.f32.mrb[93].mxu1  ;;  %v4055_v63 = vpop.f32.mrb[93].mxu0  ;;  %v3631_v62 = vmul.f32 %v8096_v51, %v3537_v32  ;;  %v3550_v34 = vadd.f32 %v6583_v23, %v7795_v24  ;;  %v4064_v31 = vadd.f32 %v6631_v15, %v7795_v24 }
 0x1ee   : > { %6147 = vst [vmem:[%s7861_s12 + $0x110] sm:$0xff] %v5952_v47   ;;  %v3542_v39 = vadd.f32 %v3541_v14, %v7799_v5  ;;  %v6584_v48 = vpop.f32.mrb[94].mxu1  ;;  %v6632_v10 = vpop.f32.mrb[94].mxu0  ;;  %v4145_v2 = vmul.f32 %v8096_v51, %v4051_v57  ;;  %v3629_v27 = vmul.f32 %v8096_v51, %v3529_v61  ;;  %v4143_v40 = vmul.f32 %v8096_v51, %v4043_v13 }
 0x1ef   : > { %6163 = vst [vmem:[%s7861_s12 + $0x190] sm:$0xff] %v6032_v59   ;;  %v4056_v1 = vadd.f32 %v4055_v63, %v7799_v5  ;;  %v3544_v35 = vpop.f32.mrb[95].mxu1  ;;  %v4058_v26 = vpop.f32.mrb[95].mxu0  ;;  %v3663_v46 = vadd.f32 %v8105_v56, %v3631_v62  ;;  %v3634_v49 = vmul.f32 %v8096_v51, %v3550_v34  ;;  %v4148_v24 = vmul.f32 %v8096_v51, %v4064_v31 }
 0x1f0   : > { %v3632_v17 = vmul.f32 %v8096_v51, %v3542_v39  ;;  %v4177_v18 = vadd.f32 %v8105_v56, %v4145_v2  ;;  %v3661_v7 = vadd.f32 %v8105_v56, %v3629_v27  ;;  %v4175_v29 = vadd.f32 %v8105_v56, %v4143_v40 }
 0x1f1   : > { %v4146_v16 = vmul.f32 %v8096_v51, %v4056_v1  ;;  %v4208_v5 = vmax.f32 %v4176_v19, 0.0  ;;  %v3692_v22 = vmax.f32 %v3660_v30, 0.0  ;;  %v3695_v9 = vmax.f32 %v3663_v46, 0.0 }
 0x1f2   : > { %v4206_v38 = vmax.f32 %v4174_v42, 0.0  ;;  %v4209_v8 = vmax.f32 %v4177_v18, 0.0  ;;  %v3693_v41 = vmax.f32 %v3661_v7, 0.0  ;;  %v4207_v52 = vmax.f32 %v4175_v29, 0.0 }
 0x1f3   : > { %v5967_v53 = vpack.c.bf16 %v3695_v9, %v3694_v28  ;;  %v3666_v60 = vadd.f32 %v8105_v56, %v3634_v49  ;;  %v4180_v47 = vadd.f32 %v8105_v56, %v4148_v24  ;;  %v3664_v32 = vadd.f32 %v8105_v56, %v3632_v17 }
 0x1f4   : > { %v6587_v23 = vpop.f32.mrb[96].mxu1  ;;  %v6635_v15 = vpop.f32.mrb[96].mxu0  ;;  %v6047_v37 = vpack.c.bf16 %v4209_v8, %v4208_v5  ;;  %v5962_v19 = vpack.c.bf16 %v3693_v41, %v3692_v22  ;;  %v6042_v30 = vpack.c.bf16 %v4207_v52, %v4206_v38  ;;  %v4178_v42 = vadd.f32 %v8105_v56, %v4146_v16 }
 0x1f5   : > { %v3557_v59 = vpop.f32.mrb[97].mxu1  ;;  %v4071_v57 = vpop.f32.mrb[97].mxu0  ;;  %6150 = vst [vmem:[%s7861_s12 + $0x128] sm:$0xff] %v5967_v53   ;;  %v3553_v61 = vadd.f32 %v6584_v48, %v7803_v21  ;;  %v4067_v13 = vadd.f32 %v6632_v10, %v7803_v21  ;;  %v3545_v14 = vadd.f32 %v3544_v35, %v7807_v58  ;;  %v4059_v63 = vadd.f32 %v4058_v26, %v7807_v58 }
 0x1f6   : > { %v6588_v62 = vpop.f32.mrb[98].mxu1  ;;  %v6636_v34 = vpop.f32.mrb[98].mxu0  ;;  %6166 = vst [vmem:[%s7861_s12 + $0x1a8] sm:$0xff] %v6047_v37   ;;  %6149 = vst [vmem:[%s7861_s12 + $0x120] sm:$0xff] %v5962_v19   ;;  %v3566_v31 = vadd.f32 %v6587_v23, %v7747_v55  ;;  %v4080_v39 = vadd.f32 %v6635_v15, %v7747_v55  ;;  %v3558_v2 = vadd.f32 %v3557_v59, %v7751_v3  ;;  %v3698_v18 = vmax.f32 %v3666_v60, 0.0 }
 0x1f7   : > { %6165 = vst [vmem:[%s7861_s12 + $0x1a0] sm:$0xff] %v6042_v30   ;;  %v4072_v27 = vadd.f32 %v4071_v57, %v7751_v3  ;;  %v3560_v48 = vpop.f32.mrb[99].mxu1  ;;  %v4074_v40 = vpop.f32.mrb[99].mxu0  ;;  %v3635_v21 = vmul.f32 %v8096_v51, %v3553_v61  ;;  %v4149_v10 = vmul.f32 %v8096_v51, %v4067_v13  ;;  %v3633_v58 = vmul.f32 %v8096_v51, %v3545_v14 }
 0x1f8   : > { %v4147_v1 = vmul.f32 %v8096_v51, %v4059_v63  ;;  %v3638_v35 = vmul.f32 %v8096_v51, %v3566_v31  ;;  %v4152_v26 = vmul.f32 %v8096_v51, %v4080_v39  ;;  %v3636_v55 = vmul.f32 %v8096_v51, %v3558_v2 }
 0x1f9   : > { %v4150_v46 = vmul.f32 %v8096_v51, %v4072_v27  ;;  %v3667_v3 = vadd.f32 %v8105_v56, %v3635_v21  ;;  %v4181_v49 = vadd.f32 %v8105_v56, %v4149_v10  ;;  %v3665_v24 = vadd.f32 %v8105_v56, %v3633_v58 }
 0x1fa   : > { %v4179_v17 = vadd.f32 %v8105_v56, %v4147_v1  ;;  %v4212_v7 = vmax.f32 %v4180_v47, 0.0  ;;  %v3696_v29 = vmax.f32 %v3664_v32, 0.0  ;;  %v4210_v16 = vmax.f32 %v4178_v42, 0.0 }
 0x1fb   : > { %v3699_v28 = vmax.f32 %v3667_v3, 0.0  ;;  %v4213_v5 = vmax.f32 %v4181_v49, 0.0  ;;  %v3697_v22 = vmax.f32 %v3665_v24, 0.0  ;;  %v3670_v41 = vadd.f32 %v8105_v56, %v3638_v35 }
 0x1fc   : > { %v4211_v9 = vmax.f32 %v4179_v17, 0.0  ;;  %v6591_v38 = vpop.f32.mrb[100].mxu1  ;;  %v6639_v8 = vpop.f32.mrb[100].mxu0  ;;  %v4184_v52 = vadd.f32 %v8105_v56, %v4152_v26  ;;  %v3668_v53 = vadd.f32 %v8105_v56, %v3636_v55  ;;  %v4182_v23 = vadd.f32 %v8105_v56, %v4150_v46 }
 0x1fd   : > { %v3573_v60 = vpop.f32.mrb[101].mxu1  ;;  %v4087_v47 = vpop.f32.mrb[101].mxu0  ;;  %v5977_v32 = vpack.c.bf16 %v3699_v28, %v3698_v18  ;;  %v6057_v15 = vpack.c.bf16 %v4213_v5, %v4212_v7  ;;  %v5972_v37 = vpack.c.bf16 %v3697_v22, %v3696_v29  ;;  %v3569_v59 = vadd.f32 %v6588_v62, %v7755_v0 }
 0x1fe   : > { %v6052_v19 = vpack.c.bf16 %v4211_v9, %v4210_v16  ;;  %v6592_v30 = vpop.f32.mrb[102].mxu1  ;;  %v6640_v42 = vpop.f32.mrb[102].mxu0  ;;  %v4083_v57 = vadd.f32 %v6636_v34, %v7755_v0  ;;  %v3561_v61 = vadd.f32 %v3560_v48, %v7759_v20  ;;  %v4075_v13 = vadd.f32 %v4074_v40, %v7759_v20 }
 0x1ff   : > { %v3576_v14 = vpop.f32.mrb[103].mxu1  ;;  %v4090_v63 = vpop.f32.mrb[103].mxu0  ;;  %6152 = vst [vmem:[%s7861_s12 + $0x138] sm:$0xff] %v5977_v32   ;;  %6168 = vst [vmem:[%s7861_s12 + $0x1b8] sm:$0xff] %v6057_v15   ;;  %v3582_v31 = vadd.f32 %v6591_v38, %v7765_v45  ;;  %v4096_v39 = vadd.f32 %v6639_v8, %v7765_v45  ;;  %v3574_v2 = vadd.f32 %v3573_v60, %v7769_v54  ;;  %v3702_v35 = vmax.f32 %v3670_v41, 0.0 }
 0x200   : > { %6151 = vst [vmem:[%s7861_s12 + $0x130] sm:$0xff] %v5972_v37   ;;  %6167 = vst [vmem:[%s7861_s12 + $0x1b0] sm:$0xff] %v6052_v19   ;;  %v4088_v62 = vadd.f32 %v4087_v47, %v7769_v54  ;;  %v3639_v0 = vmul.f32 %v8096_v51, %v3569_v59  ;;  %v4153_v34 = vmul.f32 %v8096_v51, %v4083_v57  ;;  %v4216_v26 = vmax.f32 %v4184_v52, 0.0 }
 0x201   : > { %v3637_v20 = vmul.f32 %v8096_v51, %v3561_v61  ;;  %v4151_v27 = vmul.f32 %v8096_v51, %v4075_v13  ;;  %v3642_v48 = vmul.f32 %v8096_v51, %v3582_v31  ;;  %v4156_v40 = vmul.f32 %v8096_v51, %v4096_v39 }
 0x202   : > { %v3640_v21 = vmul.f32 %v8096_v51, %v3574_v2  ;;  %v4154_v45 = vmul.f32 %v8096_v51, %v4088_v62  ;;  %v3671_v10 = vadd.f32 %v8105_v56, %v3639_v0  ;;  %v4185_v54 = vadd.f32 %v8105_v56, %v4153_v34 }
 0x203   : > { %v3669_v58 = vadd.f32 %v8105_v56, %v3637_v20  ;;  %v4183_v1 = vadd.f32 %v8105_v56, %v4151_v27  ;;  %v3700_v55 = vmax.f32 %v3668_v53, 0.0  ;;  %v4214_v46 = vmax.f32 %v4182_v23, 0.0 }
 0x204   : > { %v6595_v3 = vpop.f32.mrb[104].mxu1  ;;  %v6643_v49 = vpop.f32.mrb[104].mxu0  ;;  %v3703_v24 = vmax.f32 %v3671_v10, 0.0  ;;  %v4217_v17 = vmax.f32 %v4185_v54, 0.0  ;;  %v3674_v28 = vadd.f32 %v8105_v56, %v3642_v48  ;;  %v4188_v5 = vadd.f32 %v8105_v56, %v4156_v40 }
 0x205   : > { %v3701_v18 = vmax.f32 %v3669_v58, 0.0  ;;  %v4215_v7 = vmax.f32 %v4183_v1, 0.0  ;;  %v3589_v29 = vpop.f32.mrb[105].mxu1  ;;  %v4103_v16 = vpop.f32.mrb[105].mxu0  ;;  %v3672_v22 = vadd.f32 %v8105_v56, %v3640_v21  ;;  %v4186_v9 = vadd.f32 %v8105_v56, %v4154_v45 }
 0x206   : > { %v6596_v38 = vpop.f32.mrb[106].mxu1  ;;  %v6644_v8 = vpop.f32.mrb[106].mxu0  ;;  %v5987_v41 = vpack.c.bf16 %v3703_v24, %v3702_v35  ;;  %v6067_v52 = vpack.c.bf16 %v4217_v17, %v4216_v26  ;;  %v3585_v32 = vadd.f32 %v6592_v30, %v7773_v6  ;;  %v4099_v15 = vadd.f32 %v6640_v42, %v7773_v6 }
 0x207   : > { %v5982_v53 = vpack.c.bf16 %v3701_v18, %v3700_v55  ;;  %v6062_v23 = vpack.c.bf16 %v4215_v7, %v4214_v46  ;;  %v3592_v60 = vpop.f32.mrb[107].mxu1  ;;  %v4106_v47 = vpop.f32.mrb[107].mxu0  ;;  %v3577_v37 = vadd.f32 %v3576_v14, %v7777_v50  ;;  %v4091_v19 = vadd.f32 %v4090_v63, %v7777_v50 }
 0x208   : > { %6154 = vst [vmem:[%s7861_s12 + $0x148] sm:$0xff] %v5987_v41   ;;  %6170 = vst [vmem:[%s7861_s12 + $0x1c8] sm:$0xff] %v6067_v52   ;;  %v3598_v59 = vadd.f32 %v6595_v3, %v7781_v44  ;;  %v4112_v57 = vadd.f32 %v6643_v49, %v7781_v44  ;;  %v3590_v61 = vadd.f32 %v3589_v29, %v7785_v33  ;;  %v3706_v20 = vmax.f32 %v3674_v28, 0.0 }
 0x209   : > { %6153 = vst [vmem:[%s7861_s12 + $0x140] sm:$0xff] %v5982_v53   ;;  %6169 = vst [vmem:[%s7861_s12 + $0x1c0] sm:$0xff] %v6062_v23   ;;  %v4104_v13 = vadd.f32 %v4103_v16, %v7785_v33  ;;  %v3643_v30 = vmul.f32 %v8096_v51, %v3585_v32  ;;  %v4157_v6 = vmul.f32 %v8096_v51, %v4099_v15  ;;  %v4220_v27 = vmax.f32 %v4188_v5, 0.0 }
 0x20a   : > { %v3641_v42 = vmul.f32 %v8096_v51, %v3577_v37  ;;  %v4155_v50 = vmul.f32 %v8096_v51, %v4091_v19  ;;  %v3646_v14 = vmul.f32 %v8096_v51, %v3598_v59  ;;  %v4160_v63 = vmul.f32 %v8096_v51, %v4112_v57 }
 0x20b   : > { %v3644_v31 = vmul.f32 %v8096_v51, %v3590_v61  ;;  %v4158_v44 = vmul.f32 %v8096_v51, %v4104_v13  ;;  %v3675_v39 = vadd.f32 %v8105_v56, %v3643_v30  ;;  %v4189_v33 = vadd.f32 %v8105_v56, %v4157_v6 }
 0x20c   : > { %v3673_v2 = vadd.f32 %v8105_v56, %v3641_v42  ;;  %v4187_v62 = vadd.f32 %v8105_v56, %v4155_v50  ;;  %v6599_v0 = vpop.f32.mrb[108].mxu1  ;;  %v6647_v34 = vpop.f32.mrb[108].mxu0  ;;  %v3704_v48 = vmax.f32 %v3672_v22, 0.0  ;;  %v4218_v40 = vmax.f32 %v4186_v9, 0.0 }
 0x20d   : > { %v3605_v21 = vpop.f32.mrb[109].mxu1  ;;  %v4119_v45 = vpop.f32.mrb[109].mxu0  ;;  %v3707_v10 = vmax.f32 %v3675_v39, 0.0  ;;  %v4221_v54 = vmax.f32 %v4189_v33, 0.0  ;;  %v3678_v55 = vadd.f32 %v8105_v56, %v3646_v14  ;;  %v4192_v46 = vadd.f32 %v8105_v56, %v4160_v63 }
 0x20e   : > { %v3705_v58 = vmax.f32 %v3673_v2, 0.0  ;;  %v4219_v1 = vmax.f32 %v4187_v62, 0.0  ;;  %v6600_v35 = vpop.f32.mrb[110].mxu1  ;;  %v6648_v26 = vpop.f32.mrb[110].mxu0  ;;  %v3676_v3 = vadd.f32 %v8105_v56, %v3644_v31  ;;  %v4190_v49 = vadd.f32 %v8105_v56, %v4158_v44 }
 0x20f   : > { %v3608_v24 = vpop.f32.mrb[111].mxu1  ;;  %v4122_v17 = vpop.f32.mrb[111].mxu0  ;;  %v5997_v18 = vpack.c.bf16 %v3707_v10, %v3706_v20  ;;  %v6077_v7 = vpack.c.bf16 %v4221_v54, %v4220_v27  ;;  %v3601_v28 = vadd.f32 %v6596_v38, %v7789_v4  ;;  %v4115_v5 = vadd.f32 %v6644_v8, %v7789_v4 }
 0x210   : > { %v5992_v29 = vpack.c.bf16 %v3705_v58, %v3704_v48  ;;  %v6072_v16 = vpack.c.bf16 %v4219_v1, %v4218_v40  ;;  %v3593_v22 = vadd.f32 %v3592_v60, %v7793_v43  ;;  %v4107_v9 = vadd.f32 %v4106_v47, %v7793_v43 }
 0x211   : > { %6156 = vst [vmem:[%s7861_s12 + $0x158] sm:$0xff] %v5997_v18   ;;  %6172 = vst [vmem:[%s7861_s12 + $0x1d8] sm:$0xff] %v6077_v7   ;;  %v3614_v41 = vadd.f32 %v6599_v0, %v7797_v36  ;;  %v4128_v52 = vadd.f32 %v6647_v34, %v7797_v36  ;;  %v3606_v53 = vadd.f32 %v3605_v21, %v7801_v12  ;;  %v3710_v60 = vmax.f32 %v3678_v55, 0.0  ;;  %v4425_v7 = vld [vmem:[%s7861_s12 + $0x8] sm:$0xff] (%p6983_p5)  }
 0x212   : > { %6155 = vst [vmem:[%s7861_s12 + $0x150] sm:$0xff] %v5992_v29   ;;  %6171 = vst [vmem:[%s7861_s12 + $0x1d0] sm:$0xff] %v6072_v16   ;;  %v4120_v23 = vadd.f32 %v4119_v45, %v7801_v12  ;;  %v3647_v38 = vmul.f32 %v8096_v51, %v3601_v28  ;;  %v4161_v4 = vmul.f32 %v8096_v51, %v4115_v5  ;;  %v4224_v47 = vmax.f32 %v4192_v46, 0.0  ;;  %v4429_v29 = vld [vmem:[%s7861_s12 + $0x10] sm:$0xff] (%p6983_p5)   ;;  %v4433_v16 = vld [vmem:[%s7861_s12 + $0x18] sm:$0xff] (%p6983_p5)  }
 0x213   : > { %v3645_v8 = vmul.f32 %v8096_v51, %v3593_v22  ;;  %v4159_v43 = vmul.f32 %v8096_v51, %v4107_v9  ;;  %v3708_v32 = vmax.f32 %v3676_v3, 0.0  ;;  %v4222_v15 = vmax.f32 %v4190_v49, 0.0  ;;  %v4437_v28 = vld [vmem:[%s7861_s12 + $0x20] sm:$0xff] (%p6983_p5)   ;;  %v4441_v5 = vld [vmem:[%s7861_s12 + $0x28] sm:$0xff] (%p6983_p5)   ;;  %4426 = vst [vmem:[%s8398_s13 + $0x8] sm:$0xff] (%p6983_p5), %v4425_v7   ;;  %4430 = vst [vmem:[%s8398_s13 + $0x10] sm:$0xff] (%p6983_p5), %v4429_v29  }
 0x214   : > { %v3679_v37 = vadd.f32 %v8105_v56, %v3647_v38  ;;  %v4193_v36 = vadd.f32 %v8105_v56, %v4161_v4  ;;  %v3650_v59 = vmul.f32 %v8096_v51, %v3614_v41  ;;  %v4164_v57 = vmul.f32 %v8096_v51, %v4128_v52  ;;  %4434 = vst [vmem:[%s8398_s13 + $0x18] sm:$0xff] (%p6983_p5), %v4433_v16   ;;  %v4445_v22 = vld [vmem:[%s7861_s12 + $0x30] sm:$0xff] (%p6983_p5)   ;;  %v4449_v9 = vld [vmem:[%s7861_s12 + $0x38] sm:$0xff] (%p6983_p5)   ;;  %v4453_v41 = vld [vmem:[%s7861_s12 + $0x40] sm:$0xff] (%p6983_p5)  }
 0x215   : > { %v3677_v19 = vadd.f32 %v8105_v56, %v3645_v8  ;;  %v4191_v12 = vadd.f32 %v8105_v56, %v4159_v43  ;;  %v3648_v61 = vmul.f32 %v8096_v51, %v3606_v53  ;;  %v4162_v13 = vmul.f32 %v8096_v51, %v4120_v23  ;;  %4438 = vst [vmem:[%s8398_s13 + $0x20] sm:$0xff] (%p6983_p5), %v4437_v28   ;;  %v4457_v52 = vld [vmem:[%s7861_s12 + $0x48] sm:$0xff] (%p6983_p5)   ;;  %v4461_v53 = vld [vmem:[%s7861_s12 + $0x50] sm:$0xff] (%p6983_p5)   ;;  %v4465_v23 = vld [vmem:[%s7861_s12 + $0x58] sm:$0xff] (%p6983_p5)  }
 0x216   : > { %v3711_v30 = vmax.f32 %v3679_v37, 0.0  ;;  %v4225_v6 = vmax.f32 %v4193_v36, 0.0  ;;  %v3617_v39 = vadd.f32 %v6600_v35, %v7805_v11  ;;  %v4131_v33 = vadd.f32 %v6648_v26, %v7805_v11  ;;  %4442 = vst [vmem:[%s8398_s13 + $0x28] sm:$0xff] (%p6983_p5), %v4441_v5   ;;  %4446 = vst [vmem:[%s8398_s13 + $0x30] sm:$0xff] (%p6983_p5), %v4445_v22   ;;  %v4469_v38 = vld [vmem:[%s7861_s12 + $0x60] sm:$0xff] (%p6983_p5)   ;;  %v4473_v4 = vld [vmem:[%s7861_s12 + $0x68] sm:$0xff] (%p6983_p5)  }
 0x217   : > { %v3709_v42 = vmax.f32 %v3677_v19, 0.0  ;;  %v4223_v50 = vmax.f32 %v4191_v12, 0.0  ;;  %v3609_v2 = vadd.f32 %v3608_v24, %v7809_v25  ;;  %v4123_v62 = vadd.f32 %v4122_v17, %v7809_v25  ;;  %4450 = vst [vmem:[%s8398_s13 + $0x38] sm:$0xff] (%p6983_p5), %v4449_v9   ;;  %4454 = vst [vmem:[%s8398_s13 + $0x40] sm:$0xff] (%p6983_p5), %v4453_v41   ;;  %v4477_v8 = vld [vmem:[%s7861_s12 + $0x70] sm:$0xff] (%p6983_p5)   ;;  %v4481_v43 = vld [vmem:[%s7861_s12 + $0x78] sm:$0xff] (%p6983_p5)  }
 0x218   : > { %v6007_v14 = vpack.c.bf16 %v3711_v30, %v3710_v60  ;;  %v6087_v63 = vpack.c.bf16 %v4225_v6, %v4224_v47  ;;  %v3682_v0 = vadd.f32 %v8105_v56, %v3650_v59  ;;  %v4196_v34 = vadd.f32 %v8105_v56, %v4164_v57  ;;  %4458 = vst [vmem:[%s8398_s13 + $0x48] sm:$0xff] (%p6983_p5), %v4457_v52   ;;  %v4485_v60 = vld [vmem:[%s7861_s12 + $0x80] sm:$0xff] (%p6983_p5)   ;;  %v4489_v47 = vld [vmem:[%s7861_s12 + $0x88] sm:$0xff] (%p6983_p5)   ;;  %v4509_v19 = vld [vmem:[%s7861_s12 + $0xb0] sm:$0xff] (%p6983_p5)  }
 0x219   : > { %v6002_v31 = vpack.c.bf16 %v3709_v42, %v3708_v32  ;;  %v6082_v44 = vpack.c.bf16 %v4223_v50, %v4222_v15  ;;  %v3680_v20 = vadd.f32 %v8105_v56, %v3648_v61  ;;  %v4194_v27 = vadd.f32 %v8105_v56, %v4162_v13  ;;  %4462 = vst [vmem:[%s8398_s13 + $0x50] sm:$0xff] (%p6983_p5), %v4461_v53   ;;  %v4493_v32 = vld [vmem:[%s7861_s12 + $0x90] sm:$0xff] (%p6983_p5)   ;;  %v4497_v15 = vld [vmem:[%s7861_s12 + $0x98] sm:$0xff] (%p6983_p5)   ;;  %v4501_v37 = vld [vmem:[%s7861_s12 + $0xa0] sm:$0xff] (%p6983_p5)  }
 0x21a   : > { %6158 = vst [vmem:[%s7861_s12 + $0x168] sm:$0xff] %v6007_v14   ;;  %6174 = vst [vmem:[%s7861_s12 + $0x1e8] sm:$0xff] %v6087_v63   ;;  %v3651_v48 = vmul.f32 %v8096_v51, %v3617_v39  ;;  %v4165_v11 = vmul.f32 %v8096_v51, %v4131_v33  ;;  %v3649_v40 = vmul.f32 %v8096_v51, %v3609_v2  ;;  %v3714_v58 = vmax.f32 %v3682_v0, 0.0  ;;  %v4505_v36 = vld [vmem:[%s7861_s12 + $0xa8] sm:$0xff] (%p6983_p5)   ;;  %v4513_v12 = vld [vmem:[%s7861_s12 + $0xb8] sm:$0xff] (%p6983_p5)  }
 0x21b   : > { %6157 = vst [vmem:[%s7861_s12 + $0x160] sm:$0xff] %v6002_v31   ;;  %6173 = vst [vmem:[%s7861_s12 + $0x1e0] sm:$0xff] %v6082_v44   ;;  %v4163_v25 = vmul.f32 %v8096_v51, %v4123_v62  ;;  %v4228_v1 = vmax.f32 %v4196_v34, 0.0  ;;  %v3712_v35 = vmax.f32 %v3680_v20, 0.0  ;;  %v4226_v26 = vmax.f32 %v4194_v27, 0.0  ;;  %v4517_v59 = vld [vmem:[%s7861_s12 + $0xc0] sm:$0xff] (%p6983_p5)  }
 0x21c   : > { %v3683_v21 = vadd.f32 %v8105_v56, %v3651_v48  ;;  %v4197_v45 = vadd.f32 %v8105_v56, %v4165_v11  ;;  %v3681_v10 = vadd.f32 %v8105_v56, %v3649_v40  ;;  %4466 = vst [vmem:[%s8398_s13 + $0x58] sm:$0xff] (%p6983_p5), %v4465_v23   ;;  %4470 = vst [vmem:[%s8398_s13 + $0x60] sm:$0xff] (%p6983_p5), %v4469_v38   ;;  %v4521_v57 = vld [vmem:[%s7861_s12 + $0xc8] sm:$0xff] (%p6983_p5)   ;;  %v4525_v61 = vld [vmem:[%s7861_s12 + $0xd0] sm:$0xff] (%p6983_p5)  }
 0x21d   : > { %v4195_v54 = vadd.f32 %v8105_v56, %v4163_v25  ;;  %4402 = sbr.rel (!%p6983_p5) target bundleno = 569 (0x239), region = 101  ;;  %v4421_v56 = vld [vmem:[%s7861_s12] sm:$0xff] (%p6983_p5)   ;;  %4474 = vst [vmem:[%s8398_s13 + $0x68] sm:$0xff] (%p6983_p5), %v4473_v4   ;;  %4478 = vst [vmem:[%s8398_s13 + $0x70] sm:$0xff] (%p6983_p5), %v4477_v8   ;;  %v4529_v13 = vld [vmem:[%s7861_s12 + $0xd8] sm:$0xff] (%p6983_p5)  }
 0x21e   : > { %v3715_v55 = vmax.f32 %v3683_v21, 0.0  ;;  %v4229_v46 = vmax.f32 %v4197_v45, 0.0  ;;  %v3713_v3 = vmax.f32 %v3681_v10, 0.0  ;;  %4422 = vst [vmem:[%s8398_s13] sm:$0xff] (%p6983_p5), %v4421_v56   ;;  %4482 = vst [vmem:[%s8398_s13 + $0x78] sm:$0xff] (%p6983_p5), %v4481_v43   ;;  %v4533_v30 = vld [vmem:[%s7861_s12 + $0xe0] sm:$0xff] (%p6983_p5)   ;;  %v4537_v6 = vld [vmem:[%s7861_s12 + $0xe8] sm:$0xff] (%p6983_p5)  }
 0x21f   : > { %v4227_v51 = vmax.f32 %v4195_v54, 0.0  ;;  %4486 = vst [vmem:[%s8398_s13 + $0x100] sm:$0xff] (%p6983_p5), %v4485_v60   ;;  %4490 = vst [vmem:[%s8398_s13 + $0x108] sm:$0xff] (%p6983_p5), %v4489_v47   ;;  %v4541_v42 = vld [vmem:[%s7861_s12 + $0xf0] sm:$0xff] (%p6983_p5)   ;;  %v4545_v50 = vld [vmem:[%s7861_s12 + $0xf8] sm:$0xff] (%p6983_p5)  }
 0x220   : > { %v6017_v49 = vpack.c.bf16 %v3715_v55, %v3714_v58  ;;  %v6097_v24 = vpack.c.bf16 %v4229_v46, %v4228_v1  ;;  %v6012_v17 = vpack.c.bf16 %v3713_v3, %v3712_v35  ;;  %4494 = vst [vmem:[%s8398_s13 + $0x110] sm:$0xff] (%p6983_p5), %v4493_v32   ;;  %4498 = vst [vmem:[%s8398_s13 + $0x118] sm:$0xff] (%p6983_p5), %v4497_v15   ;;  %v4549_v14 = vld [vmem:[%s7861_s12 + $0x100] sm:$0xff] (%p6983_p5)   ;;  %v4553_v63 = vld [vmem:[%s7861_s12 + $0x108] sm:$0xff] (%p6983_p5)  }
 0x221   : > { %v6092_v18 = vpack.c.bf16 %v4227_v51, %v4226_v26  ;;  %4502 = vst [vmem:[%s8398_s13 + $0x120] sm:$0xff] (%p6983_p5), %v4501_v37   ;;  %4506 = vst [vmem:[%s8398_s13 + $0x128] sm:$0xff] (%p6983_p5), %v4505_v36   ;;  %v4557_v31 = vld [vmem:[%s7861_s12 + $0x110] sm:$0xff] (%p6983_p5)   ;;  %v4561_v44 = vld [vmem:[%s7861_s12 + $0x118] sm:$0xff] (%p6983_p5)  }
 0x222   : > { %6160 = vst [vmem:[%s7861_s12 + $0x178] sm:$0xff] %v6017_v49   ;;  %6176 = vst [vmem:[%s7861_s12 + $0x1f8] sm:$0xff] %v6097_v24   ;;  %v4565_v39 = vld [vmem:[%s7861_s12 + $0x120] sm:$0xff] (%p6983_p5)   ;;  %v4569_v33 = vld [vmem:[%s7861_s12 + $0x128] sm:$0xff] (%p6983_p5)  }
 0x223   : > { %6159 = vst [vmem:[%s7861_s12 + $0x170] sm:$0xff] %v6012_v17   ;;  %6175 = vst [vmem:[%s7861_s12 + $0x1f0] sm:$0xff] %v6092_v18   ;;  %v4573_v2 = vld [vmem:[%s7861_s12 + $0x130] sm:$0xff] (%p6983_p5)   ;;  %v4577_v62 = vld [vmem:[%s7861_s12 + $0x138] sm:$0xff] (%p6983_p5)  }
 0x224   : > { %4510 = vst [vmem:[%s8398_s13 + $0x130] sm:$0xff] %v4509_v19   ;;  %4514 = vst [vmem:[%s8398_s13 + $0x138] sm:$0xff] %v4513_v12   ;;  %v4581_v0 = vld [vmem:[%s7861_s12 + $0x140] sm:$0xff]   ;;  %v4585_v34 = vld [vmem:[%s7861_s12 + $0x148] sm:$0xff]  }
 0x225   : > { %4518 = vst [vmem:[%s8398_s13 + $0x140] sm:$0xff] %v4517_v59   ;;  %4522 = vst [vmem:[%s8398_s13 + $0x148] sm:$0xff] %v4521_v57   ;;  %v4589_v20 = vld [vmem:[%s7861_s12 + $0x150] sm:$0xff]   ;;  %v4593_v27 = vld [vmem:[%s7861_s12 + $0x158] sm:$0xff]  }
 0x226   : > { %4526 = vst [vmem:[%s8398_s13 + $0x150] sm:$0xff] %v4525_v61   ;;  %4530 = vst [vmem:[%s8398_s13 + $0x158] sm:$0xff] %v4529_v13   ;;  %v4597_v48 = vld [vmem:[%s7861_s12 + $0x160] sm:$0xff]   ;;  %v4601_v11 = vld [vmem:[%s7861_s12 + $0x168] sm:$0xff]  }
 0x227   : > { %4534 = vst [vmem:[%s8398_s13 + $0x160] sm:$0xff] %v4533_v30   ;;  %4538 = vst [vmem:[%s8398_s13 + $0x168] sm:$0xff] %v4537_v6   ;;  %v4613_v21 = vld [vmem:[%s7861_s12 + $0x180] sm:$0xff]   ;;  %v4617_v45 = vld [vmem:[%s7861_s12 + $0x188] sm:$0xff]  }
 0x228   : > { %4542 = vst [vmem:[%s8398_s13 + $0x170] sm:$0xff] %v4541_v42   ;;  %4546 = vst [vmem:[%s8398_s13 + $0x178] sm:$0xff] %v4545_v50   ;;  %v4621_v10 = vld [vmem:[%s7861_s12 + $0x190] sm:$0xff]   ;;  %v4625_v54 = vld [vmem:[%s7861_s12 + $0x198] sm:$0xff]  }
 0x229   : > { %4550 = vst [vmem:[%s8398_s13 + $0x200] sm:$0xff] %v4549_v14   ;;  %4554 = vst [vmem:[%s8398_s13 + $0x208] sm:$0xff] %v4553_v63   ;;  %v4609_v25 = vld [vmem:[%s7861_s12 + $0x178] sm:$0xff]   ;;  %v4629_v58 = vld [vmem:[%s7861_s12 + $0x1a0] sm:$0xff]  }
 0x22a   : > { %4558 = vst [vmem:[%s8398_s13 + $0x210] sm:$0xff] %v4557_v31   ;;  %4562 = vst [vmem:[%s8398_s13 + $0x218] sm:$0xff] %v4561_v44   ;;  %v4605_v40 = vld [vmem:[%s7861_s12 + $0x170] sm:$0xff]   ;;  %v4633_v1 = vld [vmem:[%s7861_s12 + $0x1a8] sm:$0xff]  }
 0x22b   : > { %4566 = vst [vmem:[%s8398_s13 + $0x220] sm:$0xff] %v4565_v39   ;;  %4570 = vst [vmem:[%s8398_s13 + $0x228] sm:$0xff] %v4569_v33   ;;  %v4637_v35 = vld [vmem:[%s7861_s12 + $0x1b0] sm:$0xff]   ;;  %v4641_v26 = vld [vmem:[%s7861_s12 + $0x1b8] sm:$0xff]  }
 0x22c   : > { %4574 = vst [vmem:[%s8398_s13 + $0x230] sm:$0xff] %v4573_v2   ;;  %4578 = vst [vmem:[%s8398_s13 + $0x238] sm:$0xff] %v4577_v62   ;;  %v4645_v55 = vld [vmem:[%s7861_s12 + $0x1c0] sm:$0xff]   ;;  %v4649_v46 = vld [vmem:[%s7861_s12 + $0x1c8] sm:$0xff]  }
 0x22d   : > { %4582 = vst [vmem:[%s8398_s13 + $0x240] sm:$0xff] %v4581_v0   ;;  %4586 = vst [vmem:[%s8398_s13 + $0x248] sm:$0xff] %v4585_v34   ;;  %v4653_v3 = vld [vmem:[%s7861_s12 + $0x1d0] sm:$0xff]   ;;  %v4657_v51 = vld [vmem:[%s7861_s12 + $0x1d8] sm:$0xff]  }
 0x22e   : > { %4590 = vst [vmem:[%s8398_s13 + $0x250] sm:$0xff] %v4589_v20   ;;  %4594 = vst [vmem:[%s8398_s13 + $0x258] sm:$0xff] %v4593_v27   ;;  %v4661_v49 = vld [vmem:[%s7861_s12 + $0x1e0] sm:$0xff]   ;;  %v4665_v24 = vld [vmem:[%s7861_s12 + $0x1e8] sm:$0xff]  }
 0x22f   : > { %4598 = vst [vmem:[%s8398_s13 + $0x260] sm:$0xff] %v4597_v48   ;;  %4602 = vst [vmem:[%s8398_s13 + $0x268] sm:$0xff] %v4601_v11   ;;  %v4669_v17 = vld [vmem:[%s7861_s12 + $0x1f0] sm:$0xff]   ;;  %v4673_v18 = vld [vmem:[%s7861_s12 + $0x1f8] sm:$0xff]  }
 0x230   : > { %4606 = vst [vmem:[%s8398_s13 + $0x270] sm:$0xff] %v4605_v40   ;;  %4610 = vst [vmem:[%s8398_s13 + $0x278] sm:$0xff] %v4609_v25  }
 0x231   : > { %4614 = vst [vmem:[%s8398_s13 + $0x300] sm:$0xff] %v4613_v21   ;;  %4618 = vst [vmem:[%s8398_s13 + $0x308] sm:$0xff] %v4617_v45  }
 0x232   : > { %4622 = vst [vmem:[%s8398_s13 + $0x310] sm:$0xff] %v4621_v10   ;;  %4626 = vst [vmem:[%s8398_s13 + $0x318] sm:$0xff] %v4625_v54  }
 0x233   : > { %4630 = vst [vmem:[%s8398_s13 + $0x320] sm:$0xff] %v4629_v58   ;;  %4634 = vst [vmem:[%s8398_s13 + $0x328] sm:$0xff] %v4633_v1  }
 0x234   : > { %4638 = vst [vmem:[%s8398_s13 + $0x330] sm:$0xff] %v4637_v35   ;;  %4642 = vst [vmem:[%s8398_s13 + $0x338] sm:$0xff] %v4641_v26  }
 0x235   : > { %4646 = vst [vmem:[%s8398_s13 + $0x340] sm:$0xff] %v4645_v55   ;;  %4650 = vst [vmem:[%s8398_s13 + $0x348] sm:$0xff] %v4649_v46  }
 0x236   : > { %4654 = vst [vmem:[%s8398_s13 + $0x350] sm:$0xff] %v4653_v3   ;;  %4658 = vst [vmem:[%s8398_s13 + $0x358] sm:$0xff] %v4657_v51  }
 0x237   : > { %4662 = vst [vmem:[%s8398_s13 + $0x360] sm:$0xff] %v4661_v49   ;;  %4666 = vst [vmem:[%s8398_s13 + $0x368] sm:$0xff] %v4665_v24  }
 0x238   : > { %4670 = vst [vmem:[%s8398_s13 + $0x370] sm:$0xff] %v4669_v17   ;;  %4674 = vst [vmem:[%s8398_s13 + $0x378] sm:$0xff] %v4673_v18  }
 0x239 PF: > { %p18_p11 = scmp.ge.s32.totalorder %s6971_s17, 4   ;;  %s8583_s13 = smov %s6891_s14 }
 0x23a   : > { %s8584_s14 = smov %s6981_s20  ;;  %s8585_s15 = smov %s6971_s17 }
 0x23b   :  { %20 = sbr.rel (!%p18_p11) target bundleno = 2 (0x2), region = 194 }

</bundles_post_ra>
